<compile_context>
chip_gen: v6e
topology: v6e:2x2x1
jax: 0.10.0
libtpu: 0.0.40
codegen_flags: <defaults>
</compile_context>

<pallas_src>
import functools
import math

import jax
import jax.numpy as jnp
from jax import lax
from jax.experimental import pallas as pl
from jax.experimental.pallas import tpu as pltpu

# ----------------------------- config ---------------------------------------
VOCAB = 128
D_MODEL = 64
N_HEADS = 2
HEAD_DIM = D_MODEL // N_HEADS
D_FF = 128
N_ENC_LAYERS = 2
N_DEC_LAYERS = 2
MAX_POS = 64

PAD_ID = 1
BOS_ID = 0
EOS_ID = 2


# ------------------------- in-kernel building blocks ------------------------
def _layernorm(x, g, b):
    """x: (M, D) f32, g/b: (1, D)."""
    mu = jnp.mean(x, axis=-1, keepdims=True)
    var = jnp.mean((x - mu) ** 2, axis=-1, keepdims=True)
    return (x - mu) * lax.rsqrt(var + 1e-5) * g + b


def _attention_block(q, k, v, wo, bo, mask, B, Sq, Sk):
    """Multi-head attention + fused output projection.

    q: (B*Sq, D), k/v: (B*Sk, D), wo: (D, D), bo: (1, D),
    mask: (Sq, Sk) additive bias or None.  Returns (B*Sq, D).
    The per-head output projection is folded into the head loop
    (sum_h (p_h @ v_h) @ wo[h*dh:(h+1)*dh, :]) so no lane-concat is needed.
    """
    scale = 1.0 / math.sqrt(HEAD_DIM)
    out = None
    for h in range(N_HEADS):
        sl = slice(h * HEAD_DIM, (h + 1) * HEAD_DIM)
        qh = q[:, sl].reshape(B, Sq, HEAD_DIM)
        kh = k[:, sl].reshape(B, Sk, HEAD_DIM)
        vh = v[:, sl].reshape(B, Sk, HEAD_DIM)
        s = jnp.einsum("bqd,bkd->bqk", qh, kh,
                       preferred_element_type=jnp.float32) * scale
        if mask is not None:
            s = s + mask[None]
        s = s - jnp.max(s, axis=-1, keepdims=True)
        p = jnp.exp(s)
        p = p * pl.reciprocal(jnp.sum(p, axis=-1, keepdims=True), approx=False)
        oh = jnp.einsum("bqk,bkd->bqd", p, vh,
                        preferred_element_type=jnp.float32)      # (B, Sq, dh)
        contrib = jnp.dot(oh.reshape(B * Sq, HEAD_DIM), wo[sl, :],
                          preferred_element_type=jnp.float32)
        out = contrib if out is None else out + contrib
    return out + bo


# ------------------------------ fused kernels --------------------------------
def _encoder_kernel(x_ref,
                    wqkv_ref, bqkv_ref, wo_ref, bo_ref, ln1g_ref, ln1b_ref,
                    w1_ref, b1_ref, w2_ref, b2_ref, ln2g_ref, ln2b_ref,
                    out_ref):
    """Full encoder (embedding done outside): N_ENC_LAYERS fused in one call."""
    B, S, D = x_ref.shape
    x = x_ref[...].reshape(B * S, D)
    for l in range(N_ENC_LAYERS):
        qkv = jnp.dot(x, wqkv_ref[l],
                      preferred_element_type=jnp.float32) + bqkv_ref[l]
        q = qkv[:, :D]
        k = qkv[:, D:2 * D]
        v = qkv[:, 2 * D:]
        attn = _attention_block(q, k, v, wo_ref[l], bo_ref[l], None, B, S, S)
        x = _layernorm(x + attn, ln1g_ref[l], ln1b_ref[l])
        h = jnp.dot(x, w1_ref[l], preferred_element_type=jnp.float32) + b1_ref[l]
        h = jax.nn.gelu(h, approximate=True)
        h = jnp.dot(h, w2_ref[l], preferred_element_type=jnp.float32) + b2_ref[l]
        x = _layernorm(x + h, ln2g_ref[l], ln2b_ref[l])
    out_ref[...] = x.reshape(B, S, D).astype(out_ref.dtype)


def _decoder_step_kernel(t_ref, x_ref, enc_ref,
                         s_wqkv, s_bqkv, s_wo, s_bo, ln1g, ln1b,
                         c_wq, c_bq, c_wkv, c_bkv, c_wo, c_bo, ln2g, ln2b,
                         f_w1, f_b1, f_w2, f_b2, ln3g, ln3b,
                         lm_w, lm_b, out_ref):
    """Full decoder pass over the fixed buffer + LM head for position t only."""
    B, S, D = x_ref.shape
    Ssrc = enc_ref.shape[1]
    t = t_ref[0]

    x = x_ref[...].reshape(B * S, D)
    enc = enc_ref[...].reshape(B * Ssrc, D)

    # causal mask generated in-kernel (no HBM mask traffic)
    rows = lax.broadcasted_iota(jnp.int32, (S, S), 0)
    cols = lax.broadcasted_iota(jnp.int32, (S, S), 1)
    causal = jnp.where(rows >= cols, 0.0, -1e9).astype(jnp.float32)

    for l in range(N_DEC_LAYERS):
        # masked self-attention (fused QKV)
        qkv = jnp.dot(x, s_wqkv[l],
                      preferred_element_type=jnp.float32) + s_bqkv[l]
        q = qkv[:, :D]
        k = qkv[:, D:2 * D]
        v = qkv[:, 2 * D:]
        attn = _attention_block(q, k, v, s_wo[l], s_bo[l], causal, B, S, S)
        x = _layernorm(x + attn, ln1g[l], ln1b[l])

        # cross-attention (fused KV over encoder states)
        qc = jnp.dot(x, c_wq[l], preferred_element_type=jnp.float32) + c_bq[l]
        kvc = jnp.dot(enc, c_wkv[l],
                      preferred_element_type=jnp.float32) + c_bkv[l]
        kc = kvc[:, :D]
        vc = kvc[:, D:]
        attn = _attention_block(qc, kc, vc, c_wo[l], c_bo[l], None, B, S, Ssrc)
        x = _layernorm(x + attn, ln2g[l], ln2b[l])

        # FFN
        h = jnp.dot(x, f_w1[l], preferred_element_type=jnp.float32) + f_b1[l]
        h = jax.nn.gelu(h, approximate=True)
        h = jnp.dot(h, f_w2[l], preferred_element_type=jnp.float32) + f_b2[l]
        x = _layernorm(x + h, ln3g[l], ln3b[l])

    # select decoder position t via a tiny select-matmul and apply the tied
    # LM head only for that row (lane-dense (B, VOCAB) output).
    ridx = lax.broadcasted_iota(jnp.int32, (B, B * S), 0)
    cidx = lax.broadcasted_iota(jnp.int32, (B, B * S), 1)
    sel = (cidx == ridx * S + t).astype(jnp.float32)
    xt = jnp.dot(sel, x, preferred_element_type=jnp.float32)      # (B, D)
    logits = jnp.dot(xt, lm_w[...],
                     preferred_element_type=jnp.float32) + lm_b[...]
    out_ref[...] = logits.astype(out_ref.dtype)


# ------------------------------ pallas wrappers ------------------------------
def _vmem_spec(a):
    nd = a.ndim
    return pl.BlockSpec(a.shape, lambda *_: (0,) * nd)


def _encoder_pallas(ep, enc_x):
    B, S, D = enc_x.shape
    args = (enc_x,
            ep["wqkv"], ep["bqkv"], ep["wo"], ep["bo"], ep["ln1g"], ep["ln1b"],
            ep["w1"], ep["b1"], ep["w2"], ep["b2"], ep["ln2g"], ep["ln2b"])
    return pl.pallas_call(
        _encoder_kernel,
        out_shape=jax.ShapeDtypeStruct((B, S, D), jnp.float32),
        grid=(1,),
        in_specs=[_vmem_spec(a) for a in args],
        out_specs=pl.BlockSpec((B, S, D), lambda *_: (0, 0, 0)),
        compiler_params=pltpu.CompilerParams(
            dimension_semantics=("arbitrary",)),
    )(*args)


def _decoder_step_pallas(t, dec_x, enc_out, dp, lm_w, lm_b):
    B = dec_x.shape[0]
    args = (dec_x, enc_out,
            dp["wqkv"], dp["bqkv"], dp["wo"], dp["bo"], dp["ln1g"], dp["ln1b"],
            dp["c_wq"], dp["c_bq"], dp["c_wkv"], dp["c_bkv"],
            dp["c_wo"], dp["c_bo"], dp["ln2g"], dp["ln2b"],
            dp["w1"], dp["b1"], dp["w2"], dp["b2"], dp["ln3g"], dp["ln3b"],
            lm_w, lm_b)
    grid_spec = pltpu.PrefetchScalarGridSpec(
        num_scalar_prefetch=1,
        grid=(1,),
        in_specs=[_vmem_spec(a) for a in args],
        out_specs=pl.BlockSpec((B, VOCAB), lambda *_: (0, 0)),
    )
    t_arr = jnp.reshape(t, (1,)).astype(jnp.int32)
    return pl.pallas_call(
        _decoder_step_kernel,
        out_shape=jax.ShapeDtypeStruct((B, VOCAB), jnp.float32),
        grid_spec=grid_spec,
        compiler_params=pltpu.CompilerParams(
            dimension_semantics=("arbitrary",)),
    )(t_arr, *args)


# ------------------------------- forward pass --------------------------------
@functools.partial(jax.jit, static_argnames=("max_len",))
def policy_forward(params, src_ids, max_len=8):
    """Mirrors Policy.forward: greedy generate, return (generated, probs)."""
    B, Ssrc = src_ids.shape
    tok_emb = params["tok_emb"]

    # encoder (embedding lookup in XLA, transformer fused in one pallas_call)
    enc_x = jnp.take(tok_emb, src_ids, axis=0) + params["enc_pos"][:Ssrc][None]
    enc_out = _encoder_pallas(params["enc"], enc_x)

    lm_w = params["lm_w"]                       # tied LM head, hoisted at init
    lm_b = params["final_logits_bias"]
    dec_pos = params["dec_pos"][:max_len]
    dp = params["dec"]

    dec_ids0 = jnp.full((B, max_len), PAD_ID, jnp.int32).at[:, 0].set(BOS_ID)
    finished0 = jnp.zeros((B,), bool)

    def step(carry, t):
        dec_ids, finished = carry
        dec_x = jnp.take(tok_emb, dec_ids, axis=0) + dec_pos[None]
        logits_t = _decoder_step_pallas(t, dec_x, enc_out, dp, lm_w, lm_b)
        p_t = jax.nn.softmax(logits_t, axis=-1)
        nxt = jnp.argmax(logits_t, axis=-1).astype(jnp.int32)
        prob = jnp.take_along_axis(p_t, nxt[:, None], axis=-1)[:, 0]
        nxt = jnp.where(finished, PAD_ID, nxt)
        prob = jnp.where(finished, 1.0, prob)
        dec_ids = lax.dynamic_update_slice(dec_ids, nxt[:, None], (0, t + 1))
        finished = finished | (nxt == EOS_ID)
        return (dec_ids, finished), prob

    (dec_ids, _), probs = lax.scan(
        step, (dec_ids0, finished0), jnp.arange(max_len - 1, dtype=jnp.int32))
    return dec_ids, jnp.transpose(probs)        # probs: (T, B) -> (B, T)


# ------------------------------ parameter init --------------------------------
def init_params(key):
    def nrm(k, shape):
        return jax.random.normal(k, shape, jnp.float32) * 0.02

    D, F, V, H3 = D_MODEL, D_FF, VOCAB, 3 * D_MODEL
    Le, Ld = N_ENC_LAYERS, N_DEC_LAYERS
    k = jax.random.split(key, 16)
    tok_emb = nrm(k[0], (V, D))

    def zeros(shape):
        return jnp.zeros(shape, jnp.float32)

    def ones(shape):
        return jnp.ones(shape, jnp.float32)

    params = {
        "tok_emb": tok_emb,
        "lm_w": tok_emb.T,                      # tied LM head (hoisted transpose)
        "final_logits_bias": zeros((1, V)),
        "enc_pos": nrm(k[1], (MAX_POS, D)),
        "dec_pos": nrm(k[2], (MAX_POS, D)),
        "enc": {
            "wqkv": nrm(k[3], (Le, D, H3)), "bqkv": zeros((Le, 1, H3)),
            "wo": nrm(k[4], (Le, D, D)), "bo": zeros((Le, 1, D)),
            "ln1g": ones((Le, 1, D)), "ln1b": zeros((Le, 1, D)),
            "w1": nrm(k[5], (Le, D, F)), "b1": zeros((Le, 1, F)),
            "w2": nrm(k[6], (Le, F, D)), "b2": zeros((Le, 1, D)),
            "ln2g": ones((Le, 1, D)), "ln2b": zeros((Le, 1, D)),
        },
        "dec": {
            "wqkv": nrm(k[7], (Ld, D, H3)), "bqkv": zeros((Ld, 1, H3)),
            "wo": nrm(k[8], (Ld, D, D)), "bo": zeros((Ld, 1, D)),
            "ln1g": ones((Ld, 1, D)), "ln1b": zeros((Ld, 1, D)),
            "c_wq": nrm(k[9], (Ld, D, D)), "c_bq": zeros((Ld, 1, D)),
            "c_wkv": nrm(k[10], (Ld, D, 2 * D)), "c_bkv": zeros((Ld, 1, 2 * D)),
            "c_wo": nrm(k[11], (Ld, D, D)), "c_bo": zeros((Ld, 1, D)),
            "ln2g": ones((Ld, 1, D)), "ln2b": zeros((Ld, 1, D)),
            "w1": nrm(k[12], (Ld, D, F)), "b1": zeros((Ld, 1, F)),
            "w2": nrm(k[13], (Ld, F, D)), "b2": zeros((Ld, 1, D)),
            "ln3g": ones((Ld, 1, D)), "ln3b": zeros((Ld, 1, D)),
        },
    }
    return params


# ----------------------------------- main -------------------------------------
if __name__ == "__main__":
    root = jax.random.PRNGKey(0)
    k_params, k_input = jax.random.split(root)
    params = init_params(k_params)

    # "tokenized" input: batch=2, source sequence length=8, token ids in vocab
    x = jax.random.randint(k_input, (2, 8), 3, VOCAB, dtype=jnp.int32)

    generated, probs = policy_forward(params, x, max_len=8)
    generated = jax.block_until_ready(generated)
    probs = jax.block_until_ready(probs)

    assert generated.shape == (2, 8) and generated.dtype == jnp.int32
    assert probs.shape == (2, 7) and probs.dtype == jnp.float32
    assert bool(jnp.all(jnp.isfinite(probs)))
    print("KERNEL_OK")
</pallas_src>

<mosaic_0001>
module attributes {stable_mosaic.version = 11 : i64} {
  func.func @_encoder_kernel(%arg0: i32, %arg1: memref<2x8x64xf32, #tpu.memory_space<vmem>>, %arg2: memref<2x64x192xf32, #tpu.memory_space<vmem>>, %arg3: memref<2x1x192xf32, #tpu.memory_space<vmem>>, %arg4: memref<2x64x64xf32, #tpu.memory_space<vmem>>, %arg5: memref<2x1x64xf32, #tpu.memory_space<vmem>>, %arg6: memref<2x1x64xf32, #tpu.memory_space<vmem>>, %arg7: memref<2x1x64xf32, #tpu.memory_space<vmem>>, %arg8: memref<2x64x128xf32, #tpu.memory_space<vmem>>, %arg9: memref<2x1x128xf32, #tpu.memory_space<vmem>>, %arg10: memref<2x128x64xf32, #tpu.memory_space<vmem>>, %arg11: memref<2x1x64xf32, #tpu.memory_space<vmem>>, %arg12: memref<2x1x64xf32, #tpu.memory_space<vmem>>, %arg13: memref<2x1x64xf32, #tpu.memory_space<vmem>>, %arg14: memref<2x8x64xf32, #tpu.memory_space<vmem>>) attributes {dimension_semantics = [#tpu.dimension_semantics<arbitrary>], iteration_bounds = array<i64: 1>, scalar_prefetch = 0 : i64, scratch_operands = 0 : i64, tpu.core_type = #tpu.core_type<tc>, window_params = [{pipeline_mode = #tpu.pipeline_mode<synchronous>, transform_indices = @transform_0, window_bounds = array<i64: 2, 8, 64>}, {pipeline_mode = #tpu.pipeline_mode<synchronous>, transform_indices = @transform_1, window_bounds = array<i64: 2, 64, 192>}, {pipeline_mode = #tpu.pipeline_mode<synchronous>, transform_indices = @transform_2, window_bounds = array<i64: 2, 1, 192>}, {pipeline_mode = #tpu.pipeline_mode<synchronous>, transform_indices = @transform_3, window_bounds = array<i64: 2, 64, 64>}, {pipeline_mode = #tpu.pipeline_mode<synchronous>, transform_indices = @transform_4, window_bounds = array<i64: 2, 1, 64>}, {pipeline_mode = #tpu.pipeline_mode<synchronous>, transform_indices = @transform_5, window_bounds = array<i64: 2, 1, 64>}, {pipeline_mode = #tpu.pipeline_mode<synchronous>, transform_indices = @transform_6, window_bounds = array<i64: 2, 1, 64>}, {pipeline_mode = #tpu.pipeline_mode<synchronous>, transform_indices = @transform_7, window_bounds = array<i64: 2, 64, 128>}, {pipeline_mode = #tpu.pipeline_mode<synchronous>, transform_indices = @transform_8, window_bounds = array<i64: 2, 1, 128>}, {pipeline_mode = #tpu.pipeline_mode<synchronous>, transform_indices = @transform_9, window_bounds = array<i64: 2, 128, 64>}, {pipeline_mode = #tpu.pipeline_mode<synchronous>, transform_indices = @transform_10, window_bounds = array<i64: 2, 1, 64>}, {pipeline_mode = #tpu.pipeline_mode<synchronous>, transform_indices = @transform_11, window_bounds = array<i64: 2, 1, 64>}, {pipeline_mode = #tpu.pipeline_mode<synchronous>, transform_indices = @transform_12, window_bounds = array<i64: 2, 1, 64>}, {pipeline_mode = #tpu.pipeline_mode<synchronous>, transform_indices = @transform_13, window_bounds = array<i64: 2, 8, 64>}]} {
    %c0 = arith.constant 0 : index
    %c0_0 = arith.constant 0 : index
    %c0_1 = arith.constant 0 : index
    %0 = vector.load %arg1[%c0, %c0_0, %c0_1] : memref<2x8x64xf32, #tpu.memory_space<vmem>>, vector<2x8x64xf32>
    %1 = vector.shape_cast %0 : vector<2x8x64xf32> to vector<16x64xf32>
    %c0_2 = arith.constant 0 : index
    %c0_3 = arith.constant 0 : index
    %c0_4 = arith.constant 0 : index
    %2 = vector.load %arg2[%c0_2, %c0_3, %c0_4] : memref<2x64x192xf32, #tpu.memory_space<vmem>>, vector<1x64x192xf32>
    %3 = vector.shape_cast %2 : vector<1x64x192xf32> to vector<64x192xf32>
    %cst = arith.constant dense<0.000000e+00> : vector<16x192xf32>
    %4 = tpu.matmul %1, %3, %cst {dimension_numbers = #tpu.dot_dimension_numbers<[1], [0], [0], [1], [0, 0, 1, 1], [], []>} : vector<16x64xf32>, vector<64x192xf32>, vector<16x192xf32> -> vector<16x192xf32>
    %c0_5 = arith.constant 0 : index
    %c0_6 = arith.constant 0 : index
    %c0_7 = arith.constant 0 : index
    %5 = vector.load %arg3[%c0_5, %c0_6, %c0_7] : memref<2x1x192xf32, #tpu.memory_space<vmem>>, vector<1x1x192xf32>
    %6 = vector.shape_cast %5 : vector<1x1x192xf32> to vector<1x192xf32>
    %7 = vector.broadcast %6 : vector<1x192xf32> to vector<16x192xf32>
    %8 = arith.addf %4, %7 : vector<16x192xf32>
    %9 = vector.extract_strided_slice %8 {offsets = [0, 0], sizes = [16, 64], strides = [1, 1]} : vector<16x192xf32> to vector<16x64xf32>
    %10 = vector.extract_strided_slice %8 {offsets = [0, 64], sizes = [16, 64], strides = [1, 1]} : vector<16x192xf32> to vector<16x64xf32>
    %11 = vector.extract_strided_slice %8 {offsets = [0, 128], sizes = [16, 64], strides = [1, 1]} : vector<16x192xf32> to vector<16x64xf32>
    %c0_8 = arith.constant 0 : index
    %c0_9 = arith.constant 0 : index
    %c0_10 = arith.constant 0 : index
    %12 = vector.load %arg4[%c0_8, %c0_9, %c0_10] : memref<2x64x64xf32, #tpu.memory_space<vmem>>, vector<1x64x64xf32>
    %13 = vector.shape_cast %12 : vector<1x64x64xf32> to vector<64x64xf32>
    %c0_11 = arith.constant 0 : index
    %c0_12 = arith.constant 0 : index
    %c0_13 = arith.constant 0 : index
    %14 = vector.load %arg5[%c0_11, %c0_12, %c0_13] : memref<2x1x64xf32, #tpu.memory_space<vmem>>, vector<1x1x64xf32>
    %15 = vector.shape_cast %14 : vector<1x1x64xf32> to vector<1x64xf32>
    %16 = vector.extract_strided_slice %9 {offsets = [0, 0], sizes = [16, 32], strides = [1, 1]} : vector<16x64xf32> to vector<16x32xf32>
    %17 = vector.shape_cast %16 : vector<16x32xf32> to vector<2x8x32xf32>
    %18 = vector.extract_strided_slice %10 {offsets = [0, 0], sizes = [16, 32], strides = [1, 1]} : vector<16x64xf32> to vector<16x32xf32>
    %19 = vector.shape_cast %18 : vector<16x32xf32> to vector<2x8x32xf32>
    %20 = vector.extract_strided_slice %11 {offsets = [0, 0], sizes = [16, 32], strides = [1, 1]} : vector<16x64xf32> to vector<16x32xf32>
    %21 = vector.shape_cast %20 : vector<16x32xf32> to vector<2x8x32xf32>
    "tpu.trace_start"() <{level = 10 : i32, message = "bqd,bkd->bqk"}> : () -> ()
    %cst_14 = arith.constant dense<0.000000e+00> : vector<2x8x8xf32>
    %22 = tpu.matmul %17, %19, %cst_14 {dimension_numbers = #tpu.dot_dimension_numbers<[2], [2], [1], [1], [0, 0, 0, 1, 1, 1], [0], [0]>} : vector<2x8x32xf32>, vector<2x8x32xf32>, vector<2x8x8xf32> -> vector<2x8x8xf32>
    "tpu.trace_stop"() : () -> ()
    %cst_15 = arith.constant 0.176776692 : f32
    %23 = vector.broadcast %cst_15 : f32 to vector<2x8x8xf32>
    %24 = arith.mulf %22, %23 : vector<2x8x8xf32>
    %cst_16 = arith.constant dense<0xFF800000> : vector<2x8xf32>
    %25 = vector.multi_reduction <maximumf>, %24, %cst_16 [2] : vector<2x8x8xf32> to vector<2x8xf32>
    %26 = vector.shape_cast %25 : vector<2x8xf32> to vector<2x8x1xf32>
    %27 = vector.broadcast %26 : vector<2x8x1xf32> to vector<2x8x8xf32>
    %28 = arith.subf %24, %27 : vector<2x8x8xf32>
    %29 = math.exp %28 : vector<2x8x8xf32>
    %cst_17 = arith.constant dense<0.000000e+00> : vector<2x8xf32>
    %30 = vector.multi_reduction <add>, %29, %cst_17 [2] : vector<2x8x8xf32> to vector<2x8xf32>
    %31 = vector.shape_cast %30 : vector<2x8xf32> to vector<2x8x1xf32>
    %32 = tpu.reciprocal %31 : vector<2x8x1xf32> -> vector<2x8x1xf32>
    %33 = vector.broadcast %32 : vector<2x8x1xf32> to vector<2x8x8xf32>
    %34 = arith.mulf %29, %33 : vector<2x8x8xf32>
    "tpu.trace_start"() <{level = 10 : i32, message = "bqk,bkd->bqd"}> : () -> ()
    %cst_18 = arith.constant dense<0.000000e+00> : vector<2x8x32xf32>
    %35 = tpu.matmul %34, %21, %cst_18 {dimension_numbers = #tpu.dot_dimension_numbers<[2], [1], [1], [2], [0, 0, 0, 1, 1, 2], [0], [0]>} : vector<2x8x8xf32>, vector<2x8x32xf32>, vector<2x8x32xf32> -> vector<2x8x32xf32>
    "tpu.trace_stop"() : () -> ()
    %36 = vector.shape_cast %35 : vector<2x8x32xf32> to vector<16x32xf32>
    %37 = vector.extract_strided_slice %13 {offsets = [0, 0], sizes = [32, 64], strides = [1, 1]} : vector<64x64xf32> to vector<32x64xf32>
    %cst_19 = arith.constant dense<0.000000e+00> : vector<16x64xf32>
    %38 = tpu.matmul %36, %37, %cst_19 {dimension_numbers = #tpu.dot_dimension_numbers<[1], [0], [0], [1], [0, 0, 1, 1], [], []>} : vector<16x32xf32>, vector<32x64xf32>, vector<16x64xf32> -> vector<16x64xf32>
    %39 = vector.extract_strided_slice %9 {offsets = [0, 32], sizes = [16, 32], strides = [1, 1]} : vector<16x64xf32> to vector<16x32xf32>
    %40 = vector.shape_cast %39 : vector<16x32xf32> to vector<2x8x32xf32>
    %41 = vector.extract_strided_slice %10 {offsets = [0, 32], sizes = [16, 32], strides = [1, 1]} : vector<16x64xf32> to vector<16x32xf32>
    %42 = vector.shape_cast %41 : vector<16x32xf32> to vector<2x8x32xf32>
    %43 = vector.extract_strided_slice %11 {offsets = [0, 32], sizes = [16, 32], strides = [1, 1]} : vector<16x64xf32> to vector<16x32xf32>
    %44 = vector.shape_cast %43 : vector<16x32xf32> to vector<2x8x32xf32>
    "tpu.trace_start"() <{level = 10 : i32, message = "bqd,bkd->bqk"}> : () -> ()
    %cst_20 = arith.constant dense<0.000000e+00> : vector<2x8x8xf32>
    %45 = tpu.matmul %40, %42, %cst_20 {dimension_numbers = #tpu.dot_dimension_numbers<[2], [2], [1], [1], [0, 0, 0, 1, 1, 1], [0], [0]>} : vector<2x8x32xf32>, vector<2x8x32xf32>, vector<2x8x8xf32> -> vector<2x8x8xf32>
    "tpu.trace_stop"() : () -> ()
    %cst_21 = arith.constant 0.176776692 : f32
    %46 = vector.broadcast %cst_21 : f32 to vector<2x8x8xf32>
    %47 = arith.mulf %45, %46 : vector<2x8x8xf32>
    %cst_22 = arith.constant dense<0xFF800000> : vector<2x8xf32>
    %48 = vector.multi_reduction <maximumf>, %47, %cst_22 [2] : vector<2x8x8xf32> to vector<2x8xf32>
    %49 = vector.shape_cast %48 : vector<2x8xf32> to vector<2x8x1xf32>
    %50 = vector.broadcast %49 : vector<2x8x1xf32> to vector<2x8x8xf32>
    %51 = arith.subf %47, %50 : vector<2x8x8xf32>
    %52 = math.exp %51 : vector<2x8x8xf32>
    %cst_23 = arith.constant dense<0.000000e+00> : vector<2x8xf32>
    %53 = vector.multi_reduction <add>, %52, %cst_23 [2] : vector<2x8x8xf32> to vector<2x8xf32>
    %54 = vector.shape_cast %53 : vector<2x8xf32> to vector<2x8x1xf32>
    %55 = tpu.reciprocal %54 : vector<2x8x1xf32> -> vector<2x8x1xf32>
    %56 = vector.broadcast %55 : vector<2x8x1xf32> to vector<2x8x8xf32>
    %57 = arith.mulf %52, %56 : vector<2x8x8xf32>
    "tpu.trace_start"() <{level = 10 : i32, message = "bqk,bkd->bqd"}> : () -> ()
    %cst_24 = arith.constant dense<0.000000e+00> : vector<2x8x32xf32>
    %58 = tpu.matmul %57, %44, %cst_24 {dimension_numbers = #tpu.dot_dimension_numbers<[2], [1], [1], [2], [0, 0, 0, 1, 1, 2], [0], [0]>} : vector<2x8x8xf32>, vector<2x8x32xf32>, vector<2x8x32xf32> -> vector<2x8x32xf32>
    "tpu.trace_stop"() : () -> ()
    %59 = vector.shape_cast %58 : vector<2x8x32xf32> to vector<16x32xf32>
    %60 = vector.extract_strided_slice %13 {offsets = [32, 0], sizes = [32, 64], strides = [1, 1]} : vector<64x64xf32> to vector<32x64xf32>
    %cst_25 = arith.constant dense<0.000000e+00> : vector<16x64xf32>
    %61 = tpu.matmul %59, %60, %cst_25 {dimension_numbers = #tpu.dot_dimension_numbers<[1], [0], [0], [1], [0, 0, 1, 1], [], []>} : vector<16x32xf32>, vector<32x64xf32>, vector<16x64xf32> -> vector<16x64xf32>
    %62 = arith.addf %38, %61 : vector<16x64xf32>
    %63 = vector.broadcast %15 : vector<1x64xf32> to vector<16x64xf32>
    %64 = arith.addf %62, %63 : vector<16x64xf32>
    %65 = arith.addf %1, %64 : vector<16x64xf32>
    %c0_26 = arith.constant 0 : index
    %c0_27 = arith.constant 0 : index
    %c0_28 = arith.constant 0 : index
    %66 = vector.load %arg6[%c0_26, %c0_27, %c0_28] : memref<2x1x64xf32, #tpu.memory_space<vmem>>, vector<1x1x64xf32>
    %67 = vector.shape_cast %66 : vector<1x1x64xf32> to vector<1x64xf32>
    %c0_29 = arith.constant 0 : index
    %c0_30 = arith.constant 0 : index
    %c0_31 = arith.constant 0 : index
    %68 = vector.load %arg7[%c0_29, %c0_30, %c0_31] : memref<2x1x64xf32, #tpu.memory_space<vmem>>, vector<1x1x64xf32>
    %69 = vector.shape_cast %68 : vector<1x1x64xf32> to vector<1x64xf32>
    %cst_32 = arith.constant dense<0.000000e+00> : vector<16xf32>
    %70 = vector.multi_reduction <add>, %65, %cst_32 [1] : vector<16x64xf32> to vector<16xf32>
    %71 = vector.shape_cast %70 : vector<16xf32> to vector<16x1xf32>
    %cst_33 = arith.constant 6.400000e+01 : f32
    %72 = vector.broadcast %cst_33 : f32 to vector<16x1xf32>
    %73 = arith.divf %71, %72 : vector<16x1xf32>
    %74 = vector.broadcast %73 : vector<16x1xf32> to vector<16x64xf32>
    %75 = arith.subf %65, %74 : vector<16x64xf32>
    %76 = arith.mulf %75, %75 : vector<16x64xf32>
    %cst_34 = arith.constant dense<0.000000e+00> : vector<16xf32>
    %77 = vector.multi_reduction <add>, %76, %cst_34 [1] : vector<16x64xf32> to vector<16xf32>
    %78 = vector.shape_cast %77 : vector<16xf32> to vector<16x1xf32>
    %cst_35 = arith.constant 6.400000e+01 : f32
    %79 = vector.broadcast %cst_35 : f32 to vector<16x1xf32>
    %80 = arith.divf %78, %79 : vector<16x1xf32>
    %81 = vector.broadcast %73 : vector<16x1xf32> to vector<16x64xf32>
    %82 = arith.subf %65, %81 : vector<16x64xf32>
    %cst_36 = arith.constant 9.99999974E-6 : f32
    %83 = vector.broadcast %cst_36 : f32 to vector<16x1xf32>
    %84 = arith.addf %80, %83 : vector<16x1xf32>
    %85 = math.rsqrt %84 : vector<16x1xf32>
    %86 = vector.broadcast %85 : vector<16x1xf32> to vector<16x64xf32>
    %87 = arith.mulf %82, %86 : vector<16x64xf32>
    %88 = vector.broadcast %67 : vector<1x64xf32> to vector<16x64xf32>
    %89 = arith.mulf %87, %88 : vector<16x64xf32>
    %90 = vector.broadcast %69 : vector<1x64xf32> to vector<16x64xf32>
    %91 = arith.addf %89, %90 : vector<16x64xf32>
    %c0_37 = arith.constant 0 : index
    %c0_38 = arith.constant 0 : index
    %c0_39 = arith.constant 0 : index
    %92 = vector.load %arg8[%c0_37, %c0_38, %c0_39] : memref<2x64x128xf32, #tpu.memory_space<vmem>>, vector<1x64x128xf32>
    %93 = vector.shape_cast %92 : vector<1x64x128xf32> to vector<64x128xf32>
    %cst_40 = arith.constant dense<0.000000e+00> : vector<16x128xf32>
    %94 = tpu.matmul %91, %93, %cst_40 {dimension_numbers = #tpu.dot_dimension_numbers<[1], [0], [0], [1], [0, 0, 1, 1], [], []>} : vector<16x64xf32>, vector<64x128xf32>, vector<16x128xf32> -> vector<16x128xf32>
    %c0_41 = arith.constant 0 : index
    %c0_42 = arith.constant 0 : index
    %c0_43 = arith.constant 0 : index
    %95 = vector.load %arg9[%c0_41, %c0_42, %c0_43] : memref<2x1x128xf32, #tpu.memory_space<vmem>>, vector<1x1x128xf32>
    %96 = vector.shape_cast %95 : vector<1x1x128xf32> to vector<1x128xf32>
    %97 = vector.broadcast %96 : vector<1x128xf32> to vector<16x128xf32>
    %98 = arith.addf %94, %97 : vector<16x128xf32>
    %99 = arith.mulf %98, %98 : vector<16x128xf32>
    %100 = arith.mulf %98, %99 : vector<16x128xf32>
    %cst_44 = arith.constant 4.471500e-02 : f32
    %101 = vector.broadcast %cst_44 : f32 to vector<16x128xf32>
    %102 = arith.mulf %101, %100 : vector<16x128xf32>
    %103 = arith.addf %98, %102 : vector<16x128xf32>
    %cst_45 = arith.constant 0.797884583 : f32
    %104 = vector.broadcast %cst_45 : f32 to vector<16x128xf32>
    %105 = arith.mulf %104, %103 : vector<16x128xf32>
    %106 = math.tanh %105 : vector<16x128xf32>
    %cst_46 = arith.constant 1.000000e+00 : f32
    %107 = vector.broadcast %cst_46 : f32 to vector<16x128xf32>
    %108 = arith.addf %107, %106 : vector<16x128xf32>
    %cst_47 = arith.constant 5.000000e-01 : f32
    %109 = vector.broadcast %cst_47 : f32 to vector<16x128xf32>
    %110 = arith.mulf %109, %108 : vector<16x128xf32>
    %111 = arith.mulf %98, %110 : vector<16x128xf32>
    %c0_48 = arith.constant 0 : index
    %c0_49 = arith.constant 0 : index
    %c0_50 = arith.constant 0 : index
    %112 = vector.load %arg10[%c0_48, %c0_49, %c0_50] : memref<2x128x64xf32, #tpu.memory_space<vmem>>, vector<1x128x64xf32>
    %113 = vector.shape_cast %112 : vector<1x128x64xf32> to vector<128x64xf32>
    %cst_51 = arith.constant dense<0.000000e+00> : vector<16x64xf32>
    %114 = tpu.matmul %111, %113, %cst_51 {dimension_numbers = #tpu.dot_dimension_numbers<[1], [0], [0], [1], [0, 0, 1, 1], [], []>} : vector<16x128xf32>, vector<128x64xf32>, vector<16x64xf32> -> vector<16x64xf32>
    %c0_52 = arith.constant 0 : index
    %c0_53 = arith.constant 0 : index
    %c0_54 = arith.constant 0 : index
    %115 = vector.load %arg11[%c0_52, %c0_53, %c0_54] : memref<2x1x64xf32, #tpu.memory_space<vmem>>, vector<1x1x64xf32>
    %116 = vector.shape_cast %115 : vector<1x1x64xf32> to vector<1x64xf32>
    %117 = vector.broadcast %116 : vector<1x64xf32> to vector<16x64xf32>
    %118 = arith.addf %114, %117 : vector<16x64xf32>
    %119 = arith.addf %91, %118 : vector<16x64xf32>
    %c0_55 = arith.constant 0 : index
    %c0_56 = arith.constant 0 : index
    %c0_57 = arith.constant 0 : index
    %120 = vector.load %arg12[%c0_55, %c0_56, %c0_57] : memref<2x1x64xf32, #tpu.memory_space<vmem>>, vector<1x1x64xf32>
    %121 = vector.shape_cast %120 : vector<1x1x64xf32> to vector<1x64xf32>
    %c0_58 = arith.constant 0 : index
    %c0_59 = arith.constant 0 : index
    %c0_60 = arith.constant 0 : index
    %122 = vector.load %arg13[%c0_58, %c0_59, %c0_60] : memref<2x1x64xf32, #tpu.memory_space<vmem>>, vector<1x1x64xf32>
    %123 = vector.shape_cast %122 : vector<1x1x64xf32> to vector<1x64xf32>
    %cst_61 = arith.constant dense<0.000000e+00> : vector<16xf32>
    %124 = vector.multi_reduction <add>, %119, %cst_61 [1] : vector<16x64xf32> to vector<16xf32>
    %125 = vector.shape_cast %124 : vector<16xf32> to vector<16x1xf32>
    %cst_62 = arith.constant 6.400000e+01 : f32
    %126 = vector.broadcast %cst_62 : f32 to vector<16x1xf32>
    %127 = arith.divf %125, %126 : vector<16x1xf32>
    %128 = vector.broadcast %127 : vector<16x1xf32> to vector<16x64xf32>
    %129 = arith.subf %119, %128 : vector<16x64xf32>
    %130 = arith.mulf %129, %129 : vector<16x64xf32>
    %cst_63 = arith.constant dense<0.000000e+00> : vector<16xf32>
    %131 = vector.multi_reduction <add>, %130, %cst_63 [1] : vector<16x64xf32> to vector<16xf32>
    %132 = vector.shape_cast %131 : vector<16xf32> to vector<16x1xf32>
    %cst_64 = arith.constant 6.400000e+01 : f32
    %133 = vector.broadcast %cst_64 : f32 to vector<16x1xf32>
    %134 = arith.divf %132, %133 : vector<16x1xf32>
    %135 = vector.broadcast %127 : vector<16x1xf32> to vector<16x64xf32>
    %136 = arith.subf %119, %135 : vector<16x64xf32>
    %cst_65 = arith.constant 9.99999974E-6 : f32
    %137 = vector.broadcast %cst_65 : f32 to vector<16x1xf32>
    %138 = arith.addf %134, %137 : vector<16x1xf32>
    %139 = math.rsqrt %138 : vector<16x1xf32>
    %140 = vector.broadcast %139 : vector<16x1xf32> to vector<16x64xf32>
    %141 = arith.mulf %136, %140 : vector<16x64xf32>
    %142 = vector.broadcast %121 : vector<1x64xf32> to vector<16x64xf32>
    %143 = arith.mulf %141, %142 : vector<16x64xf32>
    %144 = vector.broadcast %123 : vector<1x64xf32> to vector<16x64xf32>
    %145 = arith.addf %143, %144 : vector<16x64xf32>
    %c1 = arith.constant 1 : index
    %c0_66 = arith.constant 0 : index
    %c0_67 = arith.constant 0 : index
    %146 = vector.load %arg2[%c1, %c0_66, %c0_67] : memref<2x64x192xf32, #tpu.memory_space<vmem>>, vector<1x64x192xf32>
    %147 = vector.shape_cast %146 : vector<1x64x192xf32> to vector<64x192xf32>
    %cst_68 = arith.constant dense<0.000000e+00> : vector<16x192xf32>
    %148 = tpu.matmul %145, %147, %cst_68 {dimension_numbers = #tpu.dot_dimension_numbers<[1], [0], [0], [1], [0, 0, 1, 1], [], []>} : vector<16x64xf32>, vector<64x192xf32>, vector<16x192xf32> -> vector<16x192xf32>
    %c1_69 = arith.constant 1 : index
    %c0_70 = arith.constant 0 : index
    %c0_71 = arith.constant 0 : index
    %149 = vector.load %arg3[%c1_69, %c0_70, %c0_71] : memref<2x1x192xf32, #tpu.memory_space<vmem>>, vector<1x1x192xf32>
    %150 = vector.shape_cast %149 : vector<1x1x192xf32> to vector<1x192xf32>
    %151 = vector.broadcast %150 : vector<1x192xf32> to vector<16x192xf32>
    %152 = arith.addf %148, %151 : vector<16x192xf32>
    %153 = vector.extract_strided_slice %152 {offsets = [0, 0], sizes = [16, 64], strides = [1, 1]} : vector<16x192xf32> to vector<16x64xf32>
    %154 = vector.extract_strided_slice %152 {offsets = [0, 64], sizes = [16, 64], strides = [1, 1]} : vector<16x192xf32> to vector<16x64xf32>
    %155 = vector.extract_strided_slice %152 {offsets = [0, 128], sizes = [16, 64], strides = [1, 1]} : vector<16x192xf32> to vector<16x64xf32>
    %c1_72 = arith.constant 1 : index
    %c0_73 = arith.constant 0 : index
    %c0_74 = arith.constant 0 : index
    %156 = vector.load %arg4[%c1_72, %c0_73, %c0_74] : memref<2x64x64xf32, #tpu.memory_space<vmem>>, vector<1x64x64xf32>
    %157 = vector.shape_cast %156 : vector<1x64x64xf32> to vector<64x64xf32>
    %c1_75 = arith.constant 1 : index
    %c0_76 = arith.constant 0 : index
    %c0_77 = arith.constant 0 : index
    %158 = vector.load %arg5[%c1_75, %c0_76, %c0_77] : memref<2x1x64xf32, #tpu.memory_space<vmem>>, vector<1x1x64xf32>
    %159 = vector.shape_cast %158 : vector<1x1x64xf32> to vector<1x64xf32>
    %160 = vector.extract_strided_slice %153 {offsets = [0, 0], sizes = [16, 32], strides = [1, 1]} : vector<16x64xf32> to vector<16x32xf32>
    %161 = vector.shape_cast %160 : vector<16x32xf32> to vector<2x8x32xf32>
    %162 = vector.extract_strided_slice %154 {offsets = [0, 0], sizes = [16, 32], strides = [1, 1]} : vector<16x64xf32> to vector<16x32xf32>
    %163 = vector.shape_cast %162 : vector<16x32xf32> to vector<2x8x32xf32>
    %164 = vector.extract_strided_slice %155 {offsets = [0, 0], sizes = [16, 32], strides = [1, 1]} : vector<16x64xf32> to vector<16x32xf32>
    %165 = vector.shape_cast %164 : vector<16x32xf32> to vector<2x8x32xf32>
    "tpu.trace_start"() <{level = 10 : i32, message = "bqd,bkd->bqk"}> : () -> ()
    %cst_78 = arith.constant dense<0.000000e+00> : vector<2x8x8xf32>
    %166 = tpu.matmul %161, %163, %cst_78 {dimension_numbers = #tpu.dot_dimension_numbers<[2], [2], [1], [1], [0, 0, 0, 1, 1, 1], [0], [0]>} : vector<2x8x32xf32>, vector<2x8x32xf32>, vector<2x8x8xf32> -> vector<2x8x8xf32>
    "tpu.trace_stop"() : () -> ()
    %cst_79 = arith.constant 0.176776692 : f32
    %167 = vector.broadcast %cst_79 : f32 to vector<2x8x8xf32>
    %168 = arith.mulf %166, %167 : vector<2x8x8xf32>
    %cst_80 = arith.constant dense<0xFF800000> : vector<2x8xf32>
    %169 = vector.multi_reduction <maximumf>, %168, %cst_80 [2] : vector<2x8x8xf32> to vector<2x8xf32>
    %170 = vector.shape_cast %169 : vector<2x8xf32> to vector<2x8x1xf32>
    %171 = vector.broadcast %170 : vector<2x8x1xf32> to vector<2x8x8xf32>
    %172 = arith.subf %168, %171 : vector<2x8x8xf32>
    %173 = math.exp %172 : vector<2x8x8xf32>
    %cst_81 = arith.constant dense<0.000000e+00> : vector<2x8xf32>
    %174 = vector.multi_reduction <add>, %173, %cst_81 [2] : vector<2x8x8xf32> to vector<2x8xf32>
    %175 = vector.shape_cast %174 : vector<2x8xf32> to vector<2x8x1xf32>
    %176 = tpu.reciprocal %175 : vector<2x8x1xf32> -> vector<2x8x1xf32>
    %177 = vector.broadcast %176 : vector<2x8x1xf32> to vector<2x8x8xf32>
    %178 = arith.mulf %173, %177 : vector<2x8x8xf32>
    "tpu.trace_start"() <{level = 10 : i32, message = "bqk,bkd->bqd"}> : () -> ()
    %cst_82 = arith.constant dense<0.000000e+00> : vector<2x8x32xf32>
    %179 = tpu.matmul %178, %165, %cst_82 {dimension_numbers = #tpu.dot_dimension_numbers<[2], [1], [1], [2], [0, 0, 0, 1, 1, 2], [0], [0]>} : vector<2x8x8xf32>, vector<2x8x32xf32>, vector<2x8x32xf32> -> vector<2x8x32xf32>
    "tpu.trace_stop"() : () -> ()
    %180 = vector.shape_cast %179 : vector<2x8x32xf32> to vector<16x32xf32>
    %181 = vector.extract_strided_slice %157 {offsets = [0, 0], sizes = [32, 64], strides = [1, 1]} : vector<64x64xf32> to vector<32x64xf32>
    %cst_83 = arith.constant dense<0.000000e+00> : vector<16x64xf32>
    %182 = tpu.matmul %180, %181, %cst_83 {dimension_numbers = #tpu.dot_dimension_numbers<[1], [0], [0], [1], [0, 0, 1, 1], [], []>} : vector<16x32xf32>, vector<32x64xf32>, vector<16x64xf32> -> vector<16x64xf32>
    %183 = vector.extract_strided_slice %153 {offsets = [0, 32], sizes = [16, 32], strides = [1, 1]} : vector<16x64xf32> to vector<16x32xf32>
    %184 = vector.shape_cast %183 : vector<16x32xf32> to vector<2x8x32xf32>
    %185 = vector.extract_strided_slice %154 {offsets = [0, 32], sizes = [16, 32], strides = [1, 1]} : vector<16x64xf32> to vector<16x32xf32>
    %186 = vector.shape_cast %185 : vector<16x32xf32> to vector<2x8x32xf32>
    %187 = vector.extract_strided_slice %155 {offsets = [0, 32], sizes = [16, 32], strides = [1, 1]} : vector<16x64xf32> to vector<16x32xf32>
    %188 = vector.shape_cast %187 : vector<16x32xf32> to vector<2x8x32xf32>
    "tpu.trace_start"() <{level = 10 : i32, message = "bqd,bkd->bqk"}> : () -> ()
    %cst_84 = arith.constant dense<0.000000e+00> : vector<2x8x8xf32>
    %189 = tpu.matmul %184, %186, %cst_84 {dimension_numbers = #tpu.dot_dimension_numbers<[2], [2], [1], [1], [0, 0, 0, 1, 1, 1], [0], [0]>} : vector<2x8x32xf32>, vector<2x8x32xf32>, vector<2x8x8xf32> -> vector<2x8x8xf32>
    "tpu.trace_stop"() : () -> ()
    %cst_85 = arith.constant 0.176776692 : f32
    %190 = vector.broadcast %cst_85 : f32 to vector<2x8x8xf32>
    %191 = arith.mulf %189, %190 : vector<2x8x8xf32>
    %cst_86 = arith.constant dense<0xFF800000> : vector<2x8xf32>
    %192 = vector.multi_reduction <maximumf>, %191, %cst_86 [2] : vector<2x8x8xf32> to vector<2x8xf32>
    %193 = vector.shape_cast %192 : vector<2x8xf32> to vector<2x8x1xf32>
    %194 = vector.broadcast %193 : vector<2x8x1xf32> to vector<2x8x8xf32>
    %195 = arith.subf %191, %194 : vector<2x8x8xf32>
    %196 = math.exp %195 : vector<2x8x8xf32>
    %cst_87 = arith.constant dense<0.000000e+00> : vector<2x8xf32>
    %197 = vector.multi_reduction <add>, %196, %cst_87 [2] : vector<2x8x8xf32> to vector<2x8xf32>
    %198 = vector.shape_cast %197 : vector<2x8xf32> to vector<2x8x1xf32>
    %199 = tpu.reciprocal %198 : vector<2x8x1xf32> -> vector<2x8x1xf32>
    %200 = vector.broadcast %199 : vector<2x8x1xf32> to vector<2x8x8xf32>
    %201 = arith.mulf %196, %200 : vector<2x8x8xf32>
    "tpu.trace_start"() <{level = 10 : i32, message = "bqk,bkd->bqd"}> : () -> ()
    %cst_88 = arith.constant dense<0.000000e+00> : vector<2x8x32xf32>
    %202 = tpu.matmul %201, %188, %cst_88 {dimension_numbers = #tpu.dot_dimension_numbers<[2], [1], [1], [2], [0, 0, 0, 1, 1, 2], [0], [0]>} : vector<2x8x8xf32>, vector<2x8x32xf32>, vector<2x8x32xf32> -> vector<2x8x32xf32>
    "tpu.trace_stop"() : () -> ()
    %203 = vector.shape_cast %202 : vector<2x8x32xf32> to vector<16x32xf32>
    %204 = vector.extract_strided_slice %157 {offsets = [32, 0], sizes = [32, 64], strides = [1, 1]} : vector<64x64xf32> to vector<32x64xf32>
    %cst_89 = arith.constant dense<0.000000e+00> : vector<16x64xf32>
    %205 = tpu.matmul %203, %204, %cst_89 {dimension_numbers = #tpu.dot_dimension_numbers<[1], [0], [0], [1], [0, 0, 1, 1], [], []>} : vector<16x32xf32>, vector<32x64xf32>, vector<16x64xf32> -> vector<16x64xf32>
    %206 = arith.addf %182, %205 : vector<16x64xf32>
    %207 = vector.broadcast %159 : vector<1x64xf32> to vector<16x64xf32>
    %208 = arith.addf %206, %207 : vector<16x64xf32>
    %209 = arith.addf %145, %208 : vector<16x64xf32>
    %c1_90 = arith.constant 1 : index
    %c0_91 = arith.constant 0 : index
    %c0_92 = arith.constant 0 : index
    %210 = vector.load %arg6[%c1_90, %c0_91, %c0_92] : memref<2x1x64xf32, #tpu.memory_space<vmem>>, vector<1x1x64xf32>
    %211 = vector.shape_cast %210 : vector<1x1x64xf32> to vector<1x64xf32>
    %c1_93 = arith.constant 1 : index
    %c0_94 = arith.constant 0 : index
    %c0_95 = arith.constant 0 : index
    %212 = vector.load %arg7[%c1_93, %c0_94, %c0_95] : memref<2x1x64xf32, #tpu.memory_space<vmem>>, vector<1x1x64xf32>
    %213 = vector.shape_cast %212 : vector<1x1x64xf32> to vector<1x64xf32>
    %cst_96 = arith.constant dense<0.000000e+00> : vector<16xf32>
    %214 = vector.multi_reduction <add>, %209, %cst_96 [1] : vector<16x64xf32> to vector<16xf32>
    %215 = vector.shape_cast %214 : vector<16xf32> to vector<16x1xf32>
    %cst_97 = arith.constant 6.400000e+01 : f32
    %216 = vector.broadcast %cst_97 : f32 to vector<16x1xf32>
    %217 = arith.divf %215, %216 : vector<16x1xf32>
    %218 = vector.broadcast %217 : vector<16x1xf32> to vector<16x64xf32>
    %219 = arith.subf %209, %218 : vector<16x64xf32>
    %220 = arith.mulf %219, %219 : vector<16x64xf32>
    %cst_98 = arith.constant dense<0.000000e+00> : vector<16xf32>
    %221 = vector.multi_reduction <add>, %220, %cst_98 [1] : vector<16x64xf32> to vector<16xf32>
    %222 = vector.shape_cast %221 : vector<16xf32> to vector<16x1xf32>
    %cst_99 = arith.constant 6.400000e+01 : f32
    %223 = vector.broadcast %cst_99 : f32 to vector<16x1xf32>
    %224 = arith.divf %222, %223 : vector<16x1xf32>
    %225 = vector.broadcast %217 : vector<16x1xf32> to vector<16x64xf32>
    %226 = arith.subf %209, %225 : vector<16x64xf32>
    %cst_100 = arith.constant 9.99999974E-6 : f32
    %227 = vector.broadcast %cst_100 : f32 to vector<16x1xf32>
    %228 = arith.addf %224, %227 : vector<16x1xf32>
    %229 = math.rsqrt %228 : vector<16x1xf32>
    %230 = vector.broadcast %229 : vector<16x1xf32> to vector<16x64xf32>
    %231 = arith.mulf %226, %230 : vector<16x64xf32>
    %232 = vector.broadcast %211 : vector<1x64xf32> to vector<16x64xf32>
    %233 = arith.mulf %231, %232 : vector<16x64xf32>
    %234 = vector.broadcast %213 : vector<1x64xf32> to vector<16x64xf32>
    %235 = arith.addf %233, %234 : vector<16x64xf32>
    %c1_101 = arith.constant 1 : index
    %c0_102 = arith.constant 0 : index
    %c0_103 = arith.constant 0 : index
    %236 = vector.load %arg8[%c1_101, %c0_102, %c0_103] : memref<2x64x128xf32, #tpu.memory_space<vmem>>, vector<1x64x128xf32>
    %237 = vector.shape_cast %236 : vector<1x64x128xf32> to vector<64x128xf32>
    %cst_104 = arith.constant dense<0.000000e+00> : vector<16x128xf32>
    %238 = tpu.matmul %235, %237, %cst_104 {dimension_numbers = #tpu.dot_dimension_numbers<[1], [0], [0], [1], [0, 0, 1, 1], [], []>} : vector<16x64xf32>, vector<64x128xf32>, vector<16x128xf32> -> vector<16x128xf32>
    %c1_105 = arith.constant 1 : index
    %c0_106 = arith.constant 0 : index
    %c0_107 = arith.constant 0 : index
    %239 = vector.load %arg9[%c1_105, %c0_106, %c0_107] : memref<2x1x128xf32, #tpu.memory_space<vmem>>, vector<1x1x128xf32>
    %240 = vector.shape_cast %239 : vector<1x1x128xf32> to vector<1x128xf32>
    %241 = vector.broadcast %240 : vector<1x128xf32> to vector<16x128xf32>
    %242 = arith.addf %238, %241 : vector<16x128xf32>
    %243 = arith.mulf %242, %242 : vector<16x128xf32>
    %244 = arith.mulf %242, %243 : vector<16x128xf32>
    %cst_108 = arith.constant 4.471500e-02 : f32
    %245 = vector.broadcast %cst_108 : f32 to vector<16x128xf32>
    %246 = arith.mulf %245, %244 : vector<16x128xf32>
    %247 = arith.addf %242, %246 : vector<16x128xf32>
    %cst_109 = arith.constant 0.797884583 : f32
    %248 = vector.broadcast %cst_109 : f32 to vector<16x128xf32>
    %249 = arith.mulf %248, %247 : vector<16x128xf32>
    %250 = math.tanh %249 : vector<16x128xf32>
    %cst_110 = arith.constant 1.000000e+00 : f32
    %251 = vector.broadcast %cst_110 : f32 to vector<16x128xf32>
    %252 = arith.addf %251, %250 : vector<16x128xf32>
    %cst_111 = arith.constant 5.000000e-01 : f32
    %253 = vector.broadcast %cst_111 : f32 to vector<16x128xf32>
    %254 = arith.mulf %253, %252 : vector<16x128xf32>
    %255 = arith.mulf %242, %254 : vector<16x128xf32>
    %c1_112 = arith.constant 1 : index
    %c0_113 = arith.constant 0 : index
    %c0_114 = arith.constant 0 : index
    %256 = vector.load %arg10[%c1_112, %c0_113, %c0_114] : memref<2x128x64xf32, #tpu.memory_space<vmem>>, vector<1x128x64xf32>
    %257 = vector.shape_cast %256 : vector<1x128x64xf32> to vector<128x64xf32>
    %cst_115 = arith.constant dense<0.000000e+00> : vector<16x64xf32>
    %258 = tpu.matmul %255, %257, %cst_115 {dimension_numbers = #tpu.dot_dimension_numbers<[1], [0], [0], [1], [0, 0, 1, 1], [], []>} : vector<16x128xf32>, vector<128x64xf32>, vector<16x64xf32> -> vector<16x64xf32>
    %c1_116 = arith.constant 1 : index
    %c0_117 = arith.constant 0 : index
    %c0_118 = arith.constant 0 : index
    %259 = vector.load %arg11[%c1_116, %c0_117, %c0_118] : memref<2x1x64xf32, #tpu.memory_space<vmem>>, vector<1x1x64xf32>
    %260 = vector.shape_cast %259 : vector<1x1x64xf32> to vector<1x64xf32>
    %261 = vector.broadcast %260 : vector<1x64xf32> to vector<16x64xf32>
    %262 = arith.addf %258, %261 : vector<16x64xf32>
    %263 = arith.addf %235, %262 : vector<16x64xf32>
    %c1_119 = arith.constant 1 : index
    %c0_120 = arith.constant 0 : index
    %c0_121 = arith.constant 0 : index
    %264 = vector.load %arg12[%c1_119, %c0_120, %c0_121] : memref<2x1x64xf32, #tpu.memory_space<vmem>>, vector<1x1x64xf32>
    %265 = vector.shape_cast %264 : vector<1x1x64xf32> to vector<1x64xf32>
    %c1_122 = arith.constant 1 : index
    %c0_123 = arith.constant 0 : index
    %c0_124 = arith.constant 0 : index
    %266 = vector.load %arg13[%c1_122, %c0_123, %c0_124] : memref<2x1x64xf32, #tpu.memory_space<vmem>>, vector<1x1x64xf32>
    %267 = vector.shape_cast %266 : vector<1x1x64xf32> to vector<1x64xf32>
    %cst_125 = arith.constant dense<0.000000e+00> : vector<16xf32>
    %268 = vector.multi_reduction <add>, %263, %cst_125 [1] : vector<16x64xf32> to vector<16xf32>
    %269 = vector.shape_cast %268 : vector<16xf32> to vector<16x1xf32>
    %cst_126 = arith.constant 6.400000e+01 : f32
    %270 = vector.broadcast %cst_126 : f32 to vector<16x1xf32>
    %271 = arith.divf %269, %270 : vector<16x1xf32>
    %272 = vector.broadcast %271 : vector<16x1xf32> to vector<16x64xf32>
    %273 = arith.subf %263, %272 : vector<16x64xf32>
    %274 = arith.mulf %273, %273 : vector<16x64xf32>
    %cst_127 = arith.constant dense<0.000000e+00> : vector<16xf32>
    %275 = vector.multi_reduction <add>, %274, %cst_127 [1] : vector<16x64xf32> to vector<16xf32>
    %276 = vector.shape_cast %275 : vector<16xf32> to vector<16x1xf32>
    %cst_128 = arith.constant 6.400000e+01 : f32
    %277 = vector.broadcast %cst_128 : f32 to vector<16x1xf32>
    %278 = arith.divf %276, %277 : vector<16x1xf32>
    %279 = vector.broadcast %271 : vector<16x1xf32> to vector<16x64xf32>
    %280 = arith.subf %263, %279 : vector<16x64xf32>
    %cst_129 = arith.constant 9.99999974E-6 : f32
    %281 = vector.broadcast %cst_129 : f32 to vector<16x1xf32>
    %282 = arith.addf %278, %281 : vector<16x1xf32>
    %283 = math.rsqrt %282 : vector<16x1xf32>
    %284 = vector.broadcast %283 : vector<16x1xf32> to vector<16x64xf32>
    %285 = arith.mulf %280, %284 : vector<16x64xf32>
    %286 = vector.broadcast %265 : vector<1x64xf32> to vector<16x64xf32>
    %287 = arith.mulf %285, %286 : vector<16x64xf32>
    %288 = vector.broadcast %267 : vector<1x64xf32> to vector<16x64xf32>
    %289 = arith.addf %287, %288 : vector<16x64xf32>
    %290 = vector.shape_cast %289 : vector<16x64xf32> to vector<2x8x64xf32>
    %c0_130 = arith.constant 0 : index
    %c0_131 = arith.constant 0 : index
    %c0_132 = arith.constant 0 : index
    %291 = vector.load %arg14[%c0_130, %c0_131, %c0_132] : memref<2x8x64xf32, #tpu.memory_space<vmem>>, vector<2x8x64xf32>
    tpu.vector_store %arg14[%c0_130, %c0_131, %c0_132], %290 {strides = array<i32>} : memref<2x8x64xf32, #tpu.memory_space<vmem>>, vector<2x8x64xf32>,
    return
  }
  func.func @transform_0(%arg0: i32) -> (i32, i32, i32) {
    %c0_i32 = arith.constant 0 : i32
    %c0_i32_0 = arith.constant 0 : i32
    %c0_i32_1 = arith.constant 0 : i32
    %c0_i32_2 = arith.constant 0 : i32
    return %c0_i32, %c0_i32_0, %c0_i32_1 : i32, i32, i32
  }
  func.func @transform_1(%arg0: i32) -> (i32, i32, i32) {
    %c0_i32 = arith.constant 0 : i32
    %c0_i32_0 = arith.constant 0 : i32
    %c0_i32_1 = arith.constant 0 : i32
    %c0_i32_2 = arith.constant 0 : i32
    return %c0_i32, %c0_i32_0, %c0_i32_1 : i32, i32, i32
  }
  func.func @transform_2(%arg0: i32) -> (i32, i32, i32) {
    %c0_i32 = arith.constant 0 : i32
    %c0_i32_0 = arith.constant 0 : i32
    %c0_i32_1 = arith.constant 0 : i32
    %c0_i32_2 = arith.constant 0 : i32
    return %c0_i32, %c0_i32_0, %c0_i32_1 : i32, i32, i32
  }
  func.func @transform_3(%arg0: i32) -> (i32, i32, i32) {
    %c0_i32 = arith.constant 0 : i32
    %c0_i32_0 = arith.constant 0 : i32
    %c0_i32_1 = arith.constant 0 : i32
    %c0_i32_2 = arith.constant 0 : i32
    return %c0_i32, %c0_i32_0, %c0_i32_1 : i32, i32, i32
  }
  func.func @transform_4(%arg0: i32) -> (i32, i32, i32) {
    %c0_i32 = arith.constant 0 : i32
    %c0_i32_0 = arith.constant 0 : i32
    %c0_i32_1 = arith.constant 0 : i32
    %c0_i32_2 = arith.constant 0 : i32
    return %c0_i32, %c0_i32_0, %c0_i32_1 : i32, i32, i32
  }
  func.func @transform_5(%arg0: i32) -> (i32, i32, i32) {
    %c0_i32 = arith.constant 0 : i32
    %c0_i32_0 = arith.constant 0 : i32
    %c0_i32_1 = arith.constant 0 : i32
    %c0_i32_2 = arith.constant 0 : i32
    return %c0_i32, %c0_i32_0, %c0_i32_1 : i32, i32, i32
  }
  func.func @transform_6(%arg0: i32) -> (i32, i32, i32) {
    %c0_i32 = arith.constant 0 : i32
    %c0_i32_0 = arith.constant 0 : i32
    %c0_i32_1 = arith.constant 0 : i32
    %c0_i32_2 = arith.constant 0 : i32
    return %c0_i32, %c0_i32_0, %c0_i32_1 : i32, i32, i32
  }
  func.func @transform_7(%arg0: i32) -> (i32, i32, i32) {
    %c0_i32 = arith.constant 0 : i32
    %c0_i32_0 = arith.constant 0 : i32
    %c0_i32_1 = arith.constant 0 : i32
    %c0_i32_2 = arith.constant 0 : i32
    return %c0_i32, %c0_i32_0, %c0_i32_1 : i32, i32, i32
  }
  func.func @transform_8(%arg0: i32) -> (i32, i32, i32) {
    %c0_i32 = arith.constant 0 : i32
    %c0_i32_0 = arith.constant 0 : i32
    %c0_i32_1 = arith.constant 0 : i32
    %c0_i32_2 = arith.constant 0 : i32
    return %c0_i32, %c0_i32_0, %c0_i32_1 : i32, i32, i32
  }
  func.func @transform_9(%arg0: i32) -> (i32, i32, i32) {
    %c0_i32 = arith.constant 0 : i32
    %c0_i32_0 = arith.constant 0 : i32
    %c0_i32_1 = arith.constant 0 : i32
    %c0_i32_2 = arith.constant 0 : i32
    return %c0_i32, %c0_i32_0, %c0_i32_1 : i32, i32, i32
  }
  func.func @transform_10(%arg0: i32) -> (i32, i32, i32) {
    %c0_i32 = arith.constant 0 : i32
    %c0_i32_0 = arith.constant 0 : i32
    %c0_i32_1 = arith.constant 0 : i32
    %c0_i32_2 = arith.constant 0 : i32
    return %c0_i32, %c0_i32_0, %c0_i32_1 : i32, i32, i32
  }
  func.func @transform_11(%arg0: i32) -> (i32, i32, i32) {
    %c0_i32 = arith.constant 0 : i32
    %c0_i32_0 = arith.constant 0 : i32
    %c0_i32_1 = arith.constant 0 : i32
    %c0_i32_2 = arith.constant 0 : i32
    return %c0_i32, %c0_i32_0, %c0_i32_1 : i32, i32, i32
  }
  func.func @transform_12(%arg0: i32) -> (i32, i32, i32) {
    %c0_i32 = arith.constant 0 : i32
    %c0_i32_0 = arith.constant 0 : i32
    %c0_i32_1 = arith.constant 0 : i32
    %c0_i32_2 = arith.constant 0 : i32
    return %c0_i32, %c0_i32_0, %c0_i32_1 : i32, i32, i32
  }
  func.func @transform_13(%arg0: i32) -> (i32, i32, i32) {
    %c0_i32 = arith.constant 0 : i32
    %c0_i32_0 = arith.constant 0 : i32
    %c0_i32_1 = arith.constant 0 : i32
    %c0_i32_2 = arith.constant 0 : i32
    return %c0_i32, %c0_i32_0, %c0_i32_1 : i32, i32, i32
  }
}

module attributes {stable_mosaic.version = 11 : i64} {
  func.func @_decoder_step_kernel(%arg0: i32, %arg1: memref<1xi32, #tpu.memory_space<smem>>, %arg2: memref<2x8x64xf32, #tpu.memory_space<vmem>>, %arg3: memref<2x8x64xf32, #tpu.memory_space<vmem>>, %arg4: memref<2x64x192xf32, #tpu.memory_space<vmem>>, %arg5: memref<2x1x192xf32, #tpu.memory_space<vmem>>, %arg6: memref<2x64x64xf32, #tpu.memory_space<vmem>>, %arg7: memref<2x1x64xf32, #tpu.memory_space<vmem>>, %arg8: memref<2x1x64xf32, #tpu.memory_space<vmem>>, %arg9: memref<2x1x64xf32, #tpu.memory_space<vmem>>, %arg10: memref<2x64x64xf32, #tpu.memory_space<vmem>>, %arg11: memref<2x1x64xf32, #tpu.memory_space<vmem>>, %arg12: memref<2x64x128xf32, #tpu.memory_space<vmem>>, %arg13: memref<2x1x128xf32, #tpu.memory_space<vmem>>, %arg14: memref<2x64x64xf32, #tpu.memory_space<vmem>>, %arg15: memref<2x1x64xf32, #tpu.memory_space<vmem>>, %arg16: memref<2x1x64xf32, #tpu.memory_space<vmem>>, %arg17: memref<2x1x64xf32, #tpu.memory_space<vmem>>, %arg18: memref<2x64x128xf32, #tpu.memory_space<vmem>>, %arg19: memref<2x1x128xf32, #tpu.memory_space<vmem>>, %arg20: memref<2x128x64xf32, #tpu.memory_space<vmem>>, %arg21: memref<2x1x64xf32, #tpu.memory_space<vmem>>, %arg22: memref<2x1x64xf32, #tpu.memory_space<vmem>>, %arg23: memref<2x1x64xf32, #tpu.memory_space<vmem>>, %arg24: memref<64x128xf32, #tpu.memory_space<vmem>>, %arg25: memref<1x128xf32, #tpu.memory_space<vmem>>, %arg26: memref<2x128xf32, #tpu.memory_space<vmem>>) attributes {dimension_semantics = [#tpu.dimension_semantics<arbitrary>], iteration_bounds = array<i64: 1>, scalar_prefetch = 1 : i64, scratch_operands = 0 : i64, tpu.core_type = #tpu.core_type<tc>, window_params = [{pipeline_mode = #tpu.pipeline_mode<synchronous>, transform_indices = @transform_0, window_bounds = array<i64: 2, 8, 64>}, {pipeline_mode = #tpu.pipeline_mode<synchronous>, transform_indices = @transform_1, window_bounds = array<i64: 2, 8, 64>}, {pipeline_mode = #tpu.pipeline_mode<synchronous>, transform_indices = @transform_2, window_bounds = array<i64: 2, 64, 192>}, {pipeline_mode = #tpu.pipeline_mode<synchronous>, transform_indices = @transform_3, window_bounds = array<i64: 2, 1, 192>}, {pipeline_mode = #tpu.pipeline_mode<synchronous>, transform_indices = @transform_4, window_bounds = array<i64: 2, 64, 64>}, {pipeline_mode = #tpu.pipeline_mode<synchronous>, transform_indices = @transform_5, window_bounds = array<i64: 2, 1, 64>}, {pipeline_mode = #tpu.pipeline_mode<synchronous>, transform_indices = @transform_6, window_bounds = array<i64: 2, 1, 64>}, {pipeline_mode = #tpu.pipeline_mode<synchronous>, transform_indices = @transform_7, window_bounds = array<i64: 2, 1, 64>}, {pipeline_mode = #tpu.pipeline_mode<synchronous>, transform_indices = @transform_8, window_bounds = array<i64: 2, 64, 64>}, {pipeline_mode = #tpu.pipeline_mode<synchronous>, transform_indices = @transform_9, window_bounds = array<i64: 2, 1, 64>}, {pipeline_mode = #tpu.pipeline_mode<synchronous>, transform_indices = @transform_10, window_bounds = array<i64: 2, 64, 128>}, {pipeline_mode = #tpu.pipeline_mode<synchronous>, transform_indices = @transform_11, window_bounds = array<i64: 2, 1, 128>}, {pipeline_mode = #tpu.pipeline_mode<synchronous>, transform_indices = @transform_12, window_bounds = array<i64: 2, 64, 64>}, {pipeline_mode = #tpu.pipeline_mode<synchronous>, transform_indices = @transform_13, window_bounds = array<i64: 2, 1, 64>}, {pipeline_mode = #tpu.pipeline_mode<synchronous>, transform_indices = @transform_14, window_bounds = array<i64: 2, 1, 64>}, {pipeline_mode = #tpu.pipeline_mode<synchronous>, transform_indices = @transform_15, window_bounds = array<i64: 2, 1, 64>}, {pipeline_mode = #tpu.pipeline_mode<synchronous>, transform_indices = @transform_16, window_bounds = array<i64: 2, 64, 128>}, {pipeline_mode = #tpu.pipeline_mode<synchronous>, transform_indices = @transform_17, window_bounds = array<i64: 2, 1, 128>}, {pipeline_mode = #tpu.pipeline_mode<synchronous>, transform_indices = @transform_18, window_bounds = array<i64: 2, 128, 64>}, {pipeline_mode = #tpu.pipeline_mode<synchronous>, transform_indices = @transform_19, window_bounds = array<i64: 2, 1, 64>}, {pipeline_mode = #tpu.pipeline_mode<synchronous>, transform_indices = @transform_20, window_bounds = array<i64: 2, 1, 64>}, {pipeline_mode = #tpu.pipeline_mode<synchronous>, transform_indices = @transform_21, window_bounds = array<i64: 2, 1, 64>}, {pipeline_mode = #tpu.pipeline_mode<synchronous>, transform_indices = @transform_22, window_bounds = array<i64: 64, 128>}, {pipeline_mode = #tpu.pipeline_mode<synchronous>, transform_indices = @transform_23, window_bounds = array<i64: 1, 128>}, {pipeline_mode = #tpu.pipeline_mode<synchronous>, transform_indices = @transform_24, window_bounds = array<i64: 2, 128>}]} {
    %c0 = arith.constant 0 : index
    %0 = memref.load %arg1[%c0] : memref<1xi32, #tpu.memory_space<smem>>
    %c0_0 = arith.constant 0 : index
    %c0_1 = arith.constant 0 : index
    %c0_2 = arith.constant 0 : index
    %1 = vector.load %arg2[%c0_0, %c0_1, %c0_2] : memref<2x8x64xf32, #tpu.memory_space<vmem>>, vector<2x8x64xf32>
    %2 = vector.shape_cast %1 : vector<2x8x64xf32> to vector<16x64xf32>
    %c0_3 = arith.constant 0 : index
    %c0_4 = arith.constant 0 : index
    %c0_5 = arith.constant 0 : index
    %3 = vector.load %arg3[%c0_3, %c0_4, %c0_5] : memref<2x8x64xf32, #tpu.memory_space<vmem>>, vector<2x8x64xf32>
    %4 = vector.shape_cast %3 : vector<2x8x64xf32> to vector<16x64xf32>
    %5 = tpu.iota {dimensions = array<i32: 0>} : vector<8x8xi32>
    %6 = tpu.iota {dimensions = array<i32: 1>} : vector<8x8xi32>
    %7 = arith.cmpi sge, %5, %6 : vector<8x8xi32>
    %cst = arith.constant 0.000000e+00 : f32
    %cst_6 = arith.constant -1.000000e+09 : f32
    %8 = vector.broadcast %cst : f32 to vector<8x8xf32>
    %9 = vector.broadcast %cst_6 : f32 to vector<8x8xf32>
    %10 = arith.select %7, %8, %9 : vector<8x8xi1>, vector<8x8xf32>
    %c0_7 = arith.constant 0 : index
    %c0_8 = arith.constant 0 : index
    %c0_9 = arith.constant 0 : index
    %11 = vector.load %arg4[%c0_7, %c0_8, %c0_9] : memref<2x64x192xf32, #tpu.memory_space<vmem>>, vector<1x64x192xf32>
    %12 = vector.shape_cast %11 : vector<1x64x192xf32> to vector<64x192xf32>
    %cst_10 = arith.constant dense<0.000000e+00> : vector<16x192xf32>
    %13 = tpu.matmul %2, %12, %cst_10 {dimension_numbers = #tpu.dot_dimension_numbers<[1], [0], [0], [1], [0, 0, 1, 1], [], []>} : vector<16x64xf32>, vector<64x192xf32>, vector<16x192xf32> -> vector<16x192xf32>
    %c0_11 = arith.constant 0 : index
    %c0_12 = arith.constant 0 : index
    %c0_13 = arith.constant 0 : index
    %14 = vector.load %arg5[%c0_11, %c0_12, %c0_13] : memref<2x1x192xf32, #tpu.memory_space<vmem>>, vector<1x1x192xf32>
    %15 = vector.shape_cast %14 : vector<1x1x192xf32> to vector<1x192xf32>
    %16 = vector.broadcast %15 : vector<1x192xf32> to vector<16x192xf32>
    %17 = arith.addf %13, %16 : vector<16x192xf32>
    %18 = vector.extract_strided_slice %17 {offsets = [0, 0], sizes = [16, 64], strides = [1, 1]} : vector<16x192xf32> to vector<16x64xf32>
    %19 = vector.extract_strided_slice %17 {offsets = [0, 64], sizes = [16, 64], strides = [1, 1]} : vector<16x192xf32> to vector<16x64xf32>
    %20 = vector.extract_strided_slice %17 {offsets = [0, 128], sizes = [16, 64], strides = [1, 1]} : vector<16x192xf32> to vector<16x64xf32>
    %c0_14 = arith.constant 0 : index
    %c0_15 = arith.constant 0 : index
    %c0_16 = arith.constant 0 : index
    %21 = vector.load %arg6[%c0_14, %c0_15, %c0_16] : memref<2x64x64xf32, #tpu.memory_space<vmem>>, vector<1x64x64xf32>
    %22 = vector.shape_cast %21 : vector<1x64x64xf32> to vector<64x64xf32>
    %c0_17 = arith.constant 0 : index
    %c0_18 = arith.constant 0 : index
    %c0_19 = arith.constant 0 : index
    %23 = vector.load %arg7[%c0_17, %c0_18, %c0_19] : memref<2x1x64xf32, #tpu.memory_space<vmem>>, vector<1x1x64xf32>
    %24 = vector.shape_cast %23 : vector<1x1x64xf32> to vector<1x64xf32>
    %25 = vector.extract_strided_slice %18 {offsets = [0, 0], sizes = [16, 32], strides = [1, 1]} : vector<16x64xf32> to vector<16x32xf32>
    %26 = vector.shape_cast %25 : vector<16x32xf32> to vector<2x8x32xf32>
    %27 = vector.extract_strided_slice %19 {offsets = [0, 0], sizes = [16, 32], strides = [1, 1]} : vector<16x64xf32> to vector<16x32xf32>
    %28 = vector.shape_cast %27 : vector<16x32xf32> to vector<2x8x32xf32>
    %29 = vector.extract_strided_slice %20 {offsets = [0, 0], sizes = [16, 32], strides = [1, 1]} : vector<16x64xf32> to vector<16x32xf32>
    %30 = vector.shape_cast %29 : vector<16x32xf32> to vector<2x8x32xf32>
    "tpu.trace_start"() <{level = 10 : i32, message = "bqd,bkd->bqk"}> : () -> ()
    %cst_20 = arith.constant dense<0.000000e+00> : vector<2x8x8xf32>
    %31 = tpu.matmul %26, %28, %cst_20 {dimension_numbers = #tpu.dot_dimension_numbers<[2], [2], [1], [1], [0, 0, 0, 1, 1, 1], [0], [0]>} : vector<2x8x32xf32>, vector<2x8x32xf32>, vector<2x8x8xf32> -> vector<2x8x8xf32>
    "tpu.trace_stop"() : () -> ()
    %cst_21 = arith.constant 0.176776692 : f32
    %32 = vector.broadcast %cst_21 : f32 to vector<2x8x8xf32>
    %33 = arith.mulf %31, %32 : vector<2x8x8xf32>
    %34 = vector.shape_cast %10 : vector<8x8xf32> to vector<1x8x8xf32>
    %35 = vector.broadcast %34 : vector<1x8x8xf32> to vector<2x8x8xf32>
    %36 = arith.addf %33, %35 : vector<2x8x8xf32>
    %cst_22 = arith.constant dense<0xFF800000> : vector<2x8xf32>
    %37 = vector.multi_reduction <maximumf>, %36, %cst_22 [2] : vector<2x8x8xf32> to vector<2x8xf32>
    %38 = vector.shape_cast %37 : vector<2x8xf32> to vector<2x8x1xf32>
    %39 = vector.broadcast %38 : vector<2x8x1xf32> to vector<2x8x8xf32>
    %40 = arith.subf %36, %39 : vector<2x8x8xf32>
    %41 = math.exp %40 : vector<2x8x8xf32>
    %cst_23 = arith.constant dense<0.000000e+00> : vector<2x8xf32>
    %42 = vector.multi_reduction <add>, %41, %cst_23 [2] : vector<2x8x8xf32> to vector<2x8xf32>
    %43 = vector.shape_cast %42 : vector<2x8xf32> to vector<2x8x1xf32>
    %44 = tpu.reciprocal %43 : vector<2x8x1xf32> -> vector<2x8x1xf32>
    %45 = vector.broadcast %44 : vector<2x8x1xf32> to vector<2x8x8xf32>
    %46 = arith.mulf %41, %45 : vector<2x8x8xf32>
    "tpu.trace_start"() <{level = 10 : i32, message = "bqk,bkd->bqd"}> : () -> ()
    %cst_24 = arith.constant dense<0.000000e+00> : vector<2x8x32xf32>
    %47 = tpu.matmul %46, %30, %cst_24 {dimension_numbers = #tpu.dot_dimension_numbers<[2], [1], [1], [2], [0, 0, 0, 1, 1, 2], [0], [0]>} : vector<2x8x8xf32>, vector<2x8x32xf32>, vector<2x8x32xf32> -> vector<2x8x32xf32>
    "tpu.trace_stop"() : () -> ()
    %48 = vector.shape_cast %47 : vector<2x8x32xf32> to vector<16x32xf32>
    %49 = vector.extract_strided_slice %22 {offsets = [0, 0], sizes = [32, 64], strides = [1, 1]} : vector<64x64xf32> to vector<32x64xf32>
    %cst_25 = arith.constant dense<0.000000e+00> : vector<16x64xf32>
    %50 = tpu.matmul %48, %49, %cst_25 {dimension_numbers = #tpu.dot_dimension_numbers<[1], [0], [0], [1], [0, 0, 1, 1], [], []>} : vector<16x32xf32>, vector<32x64xf32>, vector<16x64xf32> -> vector<16x64xf32>
    %51 = vector.extract_strided_slice %18 {offsets = [0, 32], sizes = [16, 32], strides = [1, 1]} : vector<16x64xf32> to vector<16x32xf32>
    %52 = vector.shape_cast %51 : vector<16x32xf32> to vector<2x8x32xf32>
    %53 = vector.extract_strided_slice %19 {offsets = [0, 32], sizes = [16, 32], strides = [1, 1]} : vector<16x64xf32> to vector<16x32xf32>
    %54 = vector.shape_cast %53 : vector<16x32xf32> to vector<2x8x32xf32>
    %55 = vector.extract_strided_slice %20 {offsets = [0, 32], sizes = [16, 32], strides = [1, 1]} : vector<16x64xf32> to vector<16x32xf32>
    %56 = vector.shape_cast %55 : vector<16x32xf32> to vector<2x8x32xf32>
    "tpu.trace_start"() <{level = 10 : i32, message = "bqd,bkd->bqk"}> : () -> ()
    %cst_26 = arith.constant dense<0.000000e+00> : vector<2x8x8xf32>
    %57 = tpu.matmul %52, %54, %cst_26 {dimension_numbers = #tpu.dot_dimension_numbers<[2], [2], [1], [1], [0, 0, 0, 1, 1, 1], [0], [0]>} : vector<2x8x32xf32>, vector<2x8x32xf32>, vector<2x8x8xf32> -> vector<2x8x8xf32>
    "tpu.trace_stop"() : () -> ()
    %cst_27 = arith.constant 0.176776692 : f32
    %58 = vector.broadcast %cst_27 : f32 to vector<2x8x8xf32>
    %59 = arith.mulf %57, %58 : vector<2x8x8xf32>
    %60 = vector.shape_cast %10 : vector<8x8xf32> to vector<1x8x8xf32>
    %61 = vector.broadcast %60 : vector<1x8x8xf32> to vector<2x8x8xf32>
    %62 = arith.addf %59, %61 : vector<2x8x8xf32>
    %cst_28 = arith.constant dense<0xFF800000> : vector<2x8xf32>
    %63 = vector.multi_reduction <maximumf>, %62, %cst_28 [2] : vector<2x8x8xf32> to vector<2x8xf32>
    %64 = vector.shape_cast %63 : vector<2x8xf32> to vector<2x8x1xf32>
    %65 = vector.broadcast %64 : vector<2x8x1xf32> to vector<2x8x8xf32>
    %66 = arith.subf %62, %65 : vector<2x8x8xf32>
    %67 = math.exp %66 : vector<2x8x8xf32>
    %cst_29 = arith.constant dense<0.000000e+00> : vector<2x8xf32>
    %68 = vector.multi_reduction <add>, %67, %cst_29 [2] : vector<2x8x8xf32> to vector<2x8xf32>
    %69 = vector.shape_cast %68 : vector<2x8xf32> to vector<2x8x1xf32>
    %70 = tpu.reciprocal %69 : vector<2x8x1xf32> -> vector<2x8x1xf32>
    %71 = vector.broadcast %70 : vector<2x8x1xf32> to vector<2x8x8xf32>
    %72 = arith.mulf %67, %71 : vector<2x8x8xf32>
    "tpu.trace_start"() <{level = 10 : i32, message = "bqk,bkd->bqd"}> : () -> ()
    %cst_30 = arith.constant dense<0.000000e+00> : vector<2x8x32xf32>
    %73 = tpu.matmul %72, %56, %cst_30 {dimension_numbers = #tpu.dot_dimension_numbers<[2], [1], [1], [2], [0, 0, 0, 1, 1, 2], [0], [0]>} : vector<2x8x8xf32>, vector<2x8x32xf32>, vector<2x8x32xf32> -> vector<2x8x32xf32>
    "tpu.trace_stop"() : () -> ()
    %74 = vector.shape_cast %73 : vector<2x8x32xf32> to vector<16x32xf32>
    %75 = vector.extract_strided_slice %22 {offsets = [32, 0], sizes = [32, 64], strides = [1, 1]} : vector<64x64xf32> to vector<32x64xf32>
    %cst_31 = arith.constant dense<0.000000e+00> : vector<16x64xf32>
    %76 = tpu.matmul %74, %75, %cst_31 {dimension_numbers = #tpu.dot_dimension_numbers<[1], [0], [0], [1], [0, 0, 1, 1], [], []>} : vector<16x32xf32>, vector<32x64xf32>, vector<16x64xf32> -> vector<16x64xf32>
    %77 = arith.addf %50, %76 : vector<16x64xf32>
    %78 = vector.broadcast %24 : vector<1x64xf32> to vector<16x64xf32>
    %79 = arith.addf %77, %78 : vector<16x64xf32>
    %80 = arith.addf %2, %79 : vector<16x64xf32>
    %c0_32 = arith.constant 0 : index
    %c0_33 = arith.constant 0 : index
    %c0_34 = arith.constant 0 : index
    %81 = vector.load %arg8[%c0_32, %c0_33, %c0_34] : memref<2x1x64xf32, #tpu.memory_space<vmem>>, vector<1x1x64xf32>
    %82 = vector.shape_cast %81 : vector<1x1x64xf32> to vector<1x64xf32>
    %c0_35 = arith.constant 0 : index
    %c0_36 = arith.constant 0 : index
    %c0_37 = arith.constant 0 : index
    %83 = vector.load %arg9[%c0_35, %c0_36, %c0_37] : memref<2x1x64xf32, #tpu.memory_space<vmem>>, vector<1x1x64xf32>
    %84 = vector.shape_cast %83 : vector<1x1x64xf32> to vector<1x64xf32>
    %cst_38 = arith.constant dense<0.000000e+00> : vector<16xf32>
    %85 = vector.multi_reduction <add>, %80, %cst_38 [1] : vector<16x64xf32> to vector<16xf32>
    %86 = vector.shape_cast %85 : vector<16xf32> to vector<16x1xf32>
    %cst_39 = arith.constant 6.400000e+01 : f32
    %87 = vector.broadcast %cst_39 : f32 to vector<16x1xf32>
    %88 = arith.divf %86, %87 : vector<16x1xf32>
    %89 = vector.broadcast %88 : vector<16x1xf32> to vector<16x64xf32>
    %90 = arith.subf %80, %89 : vector<16x64xf32>
    %91 = arith.mulf %90, %90 : vector<16x64xf32>
    %cst_40 = arith.constant dense<0.000000e+00> : vector<16xf32>
    %92 = vector.multi_reduction <add>, %91, %cst_40 [1] : vector<16x64xf32> to vector<16xf32>
    %93 = vector.shape_cast %92 : vector<16xf32> to vector<16x1xf32>
    %cst_41 = arith.constant 6.400000e+01 : f32
    %94 = vector.broadcast %cst_41 : f32 to vector<16x1xf32>
    %95 = arith.divf %93, %94 : vector<16x1xf32>
    %96 = vector.broadcast %88 : vector<16x1xf32> to vector<16x64xf32>
    %97 = arith.subf %80, %96 : vector<16x64xf32>
    %cst_42 = arith.constant 9.99999974E-6 : f32
    %98 = vector.broadcast %cst_42 : f32 to vector<16x1xf32>
    %99 = arith.addf %95, %98 : vector<16x1xf32>
    %100 = math.rsqrt %99 : vector<16x1xf32>
    %101 = vector.broadcast %100 : vector<16x1xf32> to vector<16x64xf32>
    %102 = arith.mulf %97, %101 : vector<16x64xf32>
    %103 = vector.broadcast %82 : vector<1x64xf32> to vector<16x64xf32>
    %104 = arith.mulf %102, %103 : vector<16x64xf32>
    %105 = vector.broadcast %84 : vector<1x64xf32> to vector<16x64xf32>
    %106 = arith.addf %104, %105 : vector<16x64xf32>
    %c0_43 = arith.constant 0 : index
    %c0_44 = arith.constant 0 : index
    %c0_45 = arith.constant 0 : index
    %107 = vector.load %arg10[%c0_43, %c0_44, %c0_45] : memref<2x64x64xf32, #tpu.memory_space<vmem>>, vector<1x64x64xf32>
    %108 = vector.shape_cast %107 : vector<1x64x64xf32> to vector<64x64xf32>
    %cst_46 = arith.constant dense<0.000000e+00> : vector<16x64xf32>
    %109 = tpu.matmul %106, %108, %cst_46 {dimension_numbers = #tpu.dot_dimension_numbers<[1], [0], [0], [1], [0, 0, 1, 1], [], []>} : vector<16x64xf32>, vector<64x64xf32>, vector<16x64xf32> -> vector<16x64xf32>
    %c0_47 = arith.constant 0 : index
    %c0_48 = arith.constant 0 : index
    %c0_49 = arith.constant 0 : index
    %110 = vector.load %arg11[%c0_47, %c0_48, %c0_49] : memref<2x1x64xf32, #tpu.memory_space<vmem>>, vector<1x1x64xf32>
    %111 = vector.shape_cast %110 : vector<1x1x64xf32> to vector<1x64xf32>
    %112 = vector.broadcast %111 : vector<1x64xf32> to vector<16x64xf32>
    %113 = arith.addf %109, %112 : vector<16x64xf32>
    %c0_50 = arith.constant 0 : index
    %c0_51 = arith.constant 0 : index
    %c0_52 = arith.constant 0 : index
    %114 = vector.load %arg12[%c0_50, %c0_51, %c0_52] : memref<2x64x128xf32, #tpu.memory_space<vmem>>, vector<1x64x128xf32>
    %115 = vector.shape_cast %114 : vector<1x64x128xf32> to vector<64x128xf32>
    %cst_53 = arith.constant dense<0.000000e+00> : vector<16x128xf32>
    %116 = tpu.matmul %4, %115, %cst_53 {dimension_numbers = #tpu.dot_dimension_numbers<[1], [0], [0], [1], [0, 0, 1, 1], [], []>} : vector<16x64xf32>, vector<64x128xf32>, vector<16x128xf32> -> vector<16x128xf32>
    %c0_54 = arith.constant 0 : index
    %c0_55 = arith.constant 0 : index
    %c0_56 = arith.constant 0 : index
    %117 = vector.load %arg13[%c0_54, %c0_55, %c0_56] : memref<2x1x128xf32, #tpu.memory_space<vmem>>, vector<1x1x128xf32>
    %118 = vector.shape_cast %117 : vector<1x1x128xf32> to vector<1x128xf32>
    %119 = vector.broadcast %118 : vector<1x128xf32> to vector<16x128xf32>
    %120 = arith.addf %116, %119 : vector<16x128xf32>
    %121 = vector.extract_strided_slice %120 {offsets = [0, 0], sizes = [16, 64], strides = [1, 1]} : vector<16x128xf32> to vector<16x64xf32>
    %122 = vector.extract_strided_slice %120 {offsets = [0, 64], sizes = [16, 64], strides = [1, 1]} : vector<16x128xf32> to vector<16x64xf32>
    %c0_57 = arith.constant 0 : index
    %c0_58 = arith.constant 0 : index
    %c0_59 = arith.constant 0 : index
    %123 = vector.load %arg14[%c0_57, %c0_58, %c0_59] : memref<2x64x64xf32, #tpu.memory_space<vmem>>, vector<1x64x64xf32>
    %124 = vector.shape_cast %123 : vector<1x64x64xf32> to vector<64x64xf32>
    %c0_60 = arith.constant 0 : index
    %c0_61 = arith.constant 0 : index
    %c0_62 = arith.constant 0 : index
    %125 = vector.load %arg15[%c0_60, %c0_61, %c0_62] : memref<2x1x64xf32, #tpu.memory_space<vmem>>, vector<1x1x64xf32>
    %126 = vector.shape_cast %125 : vector<1x1x64xf32> to vector<1x64xf32>
    %127 = vector.extract_strided_slice %113 {offsets = [0, 0], sizes = [16, 32], strides = [1, 1]} : vector<16x64xf32> to vector<16x32xf32>
    %128 = vector.shape_cast %127 : vector<16x32xf32> to vector<2x8x32xf32>
    %129 = vector.extract_strided_slice %121 {offsets = [0, 0], sizes = [16, 32], strides = [1, 1]} : vector<16x64xf32> to vector<16x32xf32>
    %130 = vector.shape_cast %129 : vector<16x32xf32> to vector<2x8x32xf32>
    %131 = vector.extract_strided_slice %122 {offsets = [0, 0], sizes = [16, 32], strides = [1, 1]} : vector<16x64xf32> to vector<16x32xf32>
    %132 = vector.shape_cast %131 : vector<16x32xf32> to vector<2x8x32xf32>
    "tpu.trace_start"() <{level = 10 : i32, message = "bqd,bkd->bqk"}> : () -> ()
    %cst_63 = arith.constant dense<0.000000e+00> : vector<2x8x8xf32>
    %133 = tpu.matmul %128, %130, %cst_63 {dimension_numbers = #tpu.dot_dimension_numbers<[2], [2], [1], [1], [0, 0, 0, 1, 1, 1], [0], [0]>} : vector<2x8x32xf32>, vector<2x8x32xf32>, vector<2x8x8xf32> -> vector<2x8x8xf32>
    "tpu.trace_stop"() : () -> ()
    %cst_64 = arith.constant 0.176776692 : f32
    %134 = vector.broadcast %cst_64 : f32 to vector<2x8x8xf32>
    %135 = arith.mulf %133, %134 : vector<2x8x8xf32>
    %cst_65 = arith.constant dense<0xFF800000> : vector<2x8xf32>
    %136 = vector.multi_reduction <maximumf>, %135, %cst_65 [2] : vector<2x8x8xf32> to vector<2x8xf32>
    %137 = vector.shape_cast %136 : vector<2x8xf32> to vector<2x8x1xf32>
    %138 = vector.broadcast %137 : vector<2x8x1xf32> to vector<2x8x8xf32>
    %139 = arith.subf %135, %138 : vector<2x8x8xf32>
    %140 = math.exp %139 : vector<2x8x8xf32>
    %cst_66 = arith.constant dense<0.000000e+00> : vector<2x8xf32>
    %141 = vector.multi_reduction <add>, %140, %cst_66 [2] : vector<2x8x8xf32> to vector<2x8xf32>
    %142 = vector.shape_cast %141 : vector<2x8xf32> to vector<2x8x1xf32>
    %143 = tpu.reciprocal %142 : vector<2x8x1xf32> -> vector<2x8x1xf32>
    %144 = vector.broadcast %143 : vector<2x8x1xf32> to vector<2x8x8xf32>
    %145 = arith.mulf %140, %144 : vector<2x8x8xf32>
    "tpu.trace_start"() <{level = 10 : i32, message = "bqk,bkd->bqd"}> : () -> ()
    %cst_67 = arith.constant dense<0.000000e+00> : vector<2x8x32xf32>
    %146 = tpu.matmul %145, %132, %cst_67 {dimension_numbers = #tpu.dot_dimension_numbers<[2], [1], [1], [2], [0, 0, 0, 1, 1, 2], [0], [0]>} : vector<2x8x8xf32>, vector<2x8x32xf32>, vector<2x8x32xf32> -> vector<2x8x32xf32>
    "tpu.trace_stop"() : () -> ()
    %147 = vector.shape_cast %146 : vector<2x8x32xf32> to vector<16x32xf32>
    %148 = vector.extract_strided_slice %124 {offsets = [0, 0], sizes = [32, 64], strides = [1, 1]} : vector<64x64xf32> to vector<32x64xf32>
    %cst_68 = arith.constant dense<0.000000e+00> : vector<16x64xf32>
    %149 = tpu.matmul %147, %148, %cst_68 {dimension_numbers = #tpu.dot_dimension_numbers<[1], [0], [0], [1], [0, 0, 1, 1], [], []>} : vector<16x32xf32>, vector<32x64xf32>, vector<16x64xf32> -> vector<16x64xf32>
    %150 = vector.extract_strided_slice %113 {offsets = [0, 32], sizes = [16, 32], strides = [1, 1]} : vector<16x64xf32> to vector<16x32xf32>
    %151 = vector.shape_cast %150 : vector<16x32xf32> to vector<2x8x32xf32>
    %152 = vector.extract_strided_slice %121 {offsets = [0, 32], sizes = [16, 32], strides = [1, 1]} : vector<16x64xf32> to vector<16x32xf32>
    %153 = vector.shape_cast %152 : vector<16x32xf32> to vector<2x8x32xf32>
    %154 = vector.extract_strided_slice %122 {offsets = [0, 32], sizes = [16, 32], strides = [1, 1]} : vector<16x64xf32> to vector<16x32xf32>
    %155 = vector.shape_cast %154 : vector<16x32xf32> to vector<2x8x32xf32>
    "tpu.trace_start"() <{level = 10 : i32, message = "bqd,bkd->bqk"}> : () -> ()
    %cst_69 = arith.constant dense<0.000000e+00> : vector<2x8x8xf32>
    %156 = tpu.matmul %151, %153, %cst_69 {dimension_numbers = #tpu.dot_dimension_numbers<[2], [2], [1], [1], [0, 0, 0, 1, 1, 1], [0], [0]>} : vector<2x8x32xf32>, vector<2x8x32xf32>, vector<2x8x8xf32> -> vector<2x8x8xf32>
    "tpu.trace_stop"() : () -> ()
    %cst_70 = arith.constant 0.176776692 : f32
    %157 = vector.broadcast %cst_70 : f32 to vector<2x8x8xf32>
    %158 = arith.mulf %156, %157 : vector<2x8x8xf32>
    %cst_71 = arith.constant dense<0xFF800000> : vector<2x8xf32>
    %159 = vector.multi_reduction <maximumf>, %158, %cst_71 [2] : vector<2x8x8xf32> to vector<2x8xf32>
    %160 = vector.shape_cast %159 : vector<2x8xf32> to vector<2x8x1xf32>
    %161 = vector.broadcast %160 : vector<2x8x1xf32> to vector<2x8x8xf32>
    %162 = arith.subf %158, %161 : vector<2x8x8xf32>
    %163 = math.exp %162 : vector<2x8x8xf32>
    %cst_72 = arith.constant dense<0.000000e+00> : vector<2x8xf32>
    %164 = vector.multi_reduction <add>, %163, %cst_72 [2] : vector<2x8x8xf32> to vector<2x8xf32>
    %165 = vector.shape_cast %164 : vector<2x8xf32> to vector<2x8x1xf32>
    %166 = tpu.reciprocal %165 : vector<2x8x1xf32> -> vector<2x8x1xf32>
    %167 = vector.broadcast %166 : vector<2x8x1xf32> to vector<2x8x8xf32>
    %168 = arith.mulf %163, %167 : vector<2x8x8xf32>
    "tpu.trace_start"() <{level = 10 : i32, message = "bqk,bkd->bqd"}> : () -> ()
    %cst_73 = arith.constant dense<0.000000e+00> : vector<2x8x32xf32>
    %169 = tpu.matmul %168, %155, %cst_73 {dimension_numbers = #tpu.dot_dimension_numbers<[2], [1], [1], [2], [0, 0, 0, 1, 1, 2], [0], [0]>} : vector<2x8x8xf32>, vector<2x8x32xf32>, vector<2x8x32xf32> -> vector<2x8x32xf32>
    "tpu.trace_stop"() : () -> ()
    %170 = vector.shape_cast %169 : vector<2x8x32xf32> to vector<16x32xf32>
    %171 = vector.extract_strided_slice %124 {offsets = [32, 0], sizes = [32, 64], strides = [1, 1]} : vector<64x64xf32> to vector<32x64xf32>
    %cst_74 = arith.constant dense<0.000000e+00> : vector<16x64xf32>
    %172 = tpu.matmul %170, %171, %cst_74 {dimension_numbers = #tpu.dot_dimension_numbers<[1], [0], [0], [1], [0, 0, 1, 1], [], []>} : vector<16x32xf32>, vector<32x64xf32>, vector<16x64xf32> -> vector<16x64xf32>
    %173 = arith.addf %149, %172 : vector<16x64xf32>
    %174 = vector.broadcast %126 : vector<1x64xf32> to vector<16x64xf32>
    %175 = arith.addf %173, %174 : vector<16x64xf32>
    %176 = arith.addf %106, %175 : vector<16x64xf32>
    %c0_75 = arith.constant 0 : index
    %c0_76 = arith.constant 0 : index
    %c0_77 = arith.constant 0 : index
    %177 = vector.load %arg16[%c0_75, %c0_76, %c0_77] : memref<2x1x64xf32, #tpu.memory_space<vmem>>, vector<1x1x64xf32>
    %178 = vector.shape_cast %177 : vector<1x1x64xf32> to vector<1x64xf32>
    %c0_78 = arith.constant 0 : index
    %c0_79 = arith.constant 0 : index
    %c0_80 = arith.constant 0 : index
    %179 = vector.load %arg17[%c0_78, %c0_79, %c0_80] : memref<2x1x64xf32, #tpu.memory_space<vmem>>, vector<1x1x64xf32>
    %180 = vector.shape_cast %179 : vector<1x1x64xf32> to vector<1x64xf32>
    %cst_81 = arith.constant dense<0.000000e+00> : vector<16xf32>
    %181 = vector.multi_reduction <add>, %176, %cst_81 [1] : vector<16x64xf32> to vector<16xf32>
    %182 = vector.shape_cast %181 : vector<16xf32> to vector<16x1xf32>
    %cst_82 = arith.constant 6.400000e+01 : f32
    %183 = vector.broadcast %cst_82 : f32 to vector<16x1xf32>
    %184 = arith.divf %182, %183 : vector<16x1xf32>
    %185 = vector.broadcast %184 : vector<16x1xf32> to vector<16x64xf32>
    %186 = arith.subf %176, %185 : vector<16x64xf32>
    %187 = arith.mulf %186, %186 : vector<16x64xf32>
    %cst_83 = arith.constant dense<0.000000e+00> : vector<16xf32>
    %188 = vector.multi_reduction <add>, %187, %cst_83 [1] : vector<16x64xf32> to vector<16xf32>
    %189 = vector.shape_cast %188 : vector<16xf32> to vector<16x1xf32>
    %cst_84 = arith.constant 6.400000e+01 : f32
    %190 = vector.broadcast %cst_84 : f32 to vector<16x1xf32>
    %191 = arith.divf %189, %190 : vector<16x1xf32>
    %192 = vector.broadcast %184 : vector<16x1xf32> to vector<16x64xf32>
    %193 = arith.subf %176, %192 : vector<16x64xf32>
    %cst_85 = arith.constant 9.99999974E-6 : f32
    %194 = vector.broadcast %cst_85 : f32 to vector<16x1xf32>
    %195 = arith.addf %191, %194 : vector<16x1xf32>
    %196 = math.rsqrt %195 : vector<16x1xf32>
    %197 = vector.broadcast %196 : vector<16x1xf32> to vector<16x64xf32>
    %198 = arith.mulf %193, %197 : vector<16x64xf32>
    %199 = vector.broadcast %178 : vector<1x64xf32> to vector<16x64xf32>
    %200 = arith.mulf %198, %199 : vector<16x64xf32>
    %201 = vector.broadcast %180 : vector<1x64xf32> to vector<16x64xf32>
    %202 = arith.addf %200, %201 : vector<16x64xf32>
    %c0_86 = arith.constant 0 : index
    %c0_87 = arith.constant 0 : index
    %c0_88 = arith.constant 0 : index
    %203 = vector.load %arg18[%c0_86, %c0_87, %c0_88] : memref<2x64x128xf32, #tpu.memory_space<vmem>>, vector<1x64x128xf32>
    %204 = vector.shape_cast %203 : vector<1x64x128xf32> to vector<64x128xf32>
    %cst_89 = arith.constant dense<0.000000e+00> : vector<16x128xf32>
    %205 = tpu.matmul %202, %204, %cst_89 {dimension_numbers = #tpu.dot_dimension_numbers<[1], [0], [0], [1], [0, 0, 1, 1], [], []>} : vector<16x64xf32>, vector<64x128xf32>, vector<16x128xf32> -> vector<16x128xf32>
    %c0_90 = arith.constant 0 : index
    %c0_91 = arith.constant 0 : index
    %c0_92 = arith.constant 0 : index
    %206 = vector.load %arg19[%c0_90, %c0_91, %c0_92] : memref<2x1x128xf32, #tpu.memory_space<vmem>>, vector<1x1x128xf32>
    %207 = vector.shape_cast %206 : vector<1x1x128xf32> to vector<1x128xf32>
    %208 = vector.broadcast %207 : vector<1x128xf32> to vector<16x128xf32>
    %209 = arith.addf %205, %208 : vector<16x128xf32>
    %210 = arith.mulf %209, %209 : vector<16x128xf32>
    %211 = arith.mulf %209, %210 : vector<16x128xf32>
    %cst_93 = arith.constant 4.471500e-02 : f32
    %212 = vector.broadcast %cst_93 : f32 to vector<16x128xf32>
    %213 = arith.mulf %212, %211 : vector<16x128xf32>
    %214 = arith.addf %209, %213 : vector<16x128xf32>
    %cst_94 = arith.constant 0.797884583 : f32
    %215 = vector.broadcast %cst_94 : f32 to vector<16x128xf32>
    %216 = arith.mulf %215, %214 : vector<16x128xf32>
    %217 = math.tanh %216 : vector<16x128xf32>
    %cst_95 = arith.constant 1.000000e+00 : f32
    %218 = vector.broadcast %cst_95 : f32 to vector<16x128xf32>
    %219 = arith.addf %218, %217 : vector<16x128xf32>
    %cst_96 = arith.constant 5.000000e-01 : f32
    %220 = vector.broadcast %cst_96 : f32 to vector<16x128xf32>
    %221 = arith.mulf %220, %219 : vector<16x128xf32>
    %222 = arith.mulf %209, %221 : vector<16x128xf32>
    %c0_97 = arith.constant 0 : index
    %c0_98 = arith.constant 0 : index
    %c0_99 = arith.constant 0 : index
    %223 = vector.load %arg20[%c0_97, %c0_98, %c0_99] : memref<2x128x64xf32, #tpu.memory_space<vmem>>, vector<1x128x64xf32>
    %224 = vector.shape_cast %223 : vector<1x128x64xf32> to vector<128x64xf32>
    %cst_100 = arith.constant dense<0.000000e+00> : vector<16x64xf32>
    %225 = tpu.matmul %222, %224, %cst_100 {dimension_numbers = #tpu.dot_dimension_numbers<[1], [0], [0], [1], [0, 0, 1, 1], [], []>} : vector<16x128xf32>, vector<128x64xf32>, vector<16x64xf32> -> vector<16x64xf32>
    %c0_101 = arith.constant 0 : index
    %c0_102 = arith.constant 0 : index
    %c0_103 = arith.constant 0 : index
    %226 = vector.load %arg21[%c0_101, %c0_102, %c0_103] : memref<2x1x64xf32, #tpu.memory_space<vmem>>, vector<1x1x64xf32>
    %227 = vector.shape_cast %226 : vector<1x1x64xf32> to vector<1x64xf32>
    %228 = vector.broadcast %227 : vector<1x64xf32> to vector<16x64xf32>
    %229 = arith.addf %225, %228 : vector<16x64xf32>
    %230 = arith.addf %202, %229 : vector<16x64xf32>
    %c0_104 = arith.constant 0 : index
    %c0_105 = arith.constant 0 : index
    %c0_106 = arith.constant 0 : index
    %231 = vector.load %arg22[%c0_104, %c0_105, %c0_106] : memref<2x1x64xf32, #tpu.memory_space<vmem>>, vector<1x1x64xf32>
    %232 = vector.shape_cast %231 : vector<1x1x64xf32> to vector<1x64xf32>
    %c0_107 = arith.constant 0 : index
    %c0_108 = arith.constant 0 : index
    %c0_109 = arith.constant 0 : index
    %233 = vector.load %arg23[%c0_107, %c0_108, %c0_109] : memref<2x1x64xf32, #tpu.memory_space<vmem>>, vector<1x1x64xf32>
    %234 = vector.shape_cast %233 : vector<1x1x64xf32> to vector<1x64xf32>
    %cst_110 = arith.constant dense<0.000000e+00> : vector<16xf32>
    %235 = vector.multi_reduction <add>, %230, %cst_110 [1] : vector<16x64xf32> to vector<16xf32>
    %236 = vector.shape_cast %235 : vector<16xf32> to vector<16x1xf32>
    %cst_111 = arith.constant 6.400000e+01 : f32
    %237 = vector.broadcast %cst_111 : f32 to vector<16x1xf32>
    %238 = arith.divf %236, %237 : vector<16x1xf32>
    %239 = vector.broadcast %238 : vector<16x1xf32> to vector<16x64xf32>
    %240 = arith.subf %230, %239 : vector<16x64xf32>
    %241 = arith.mulf %240, %240 : vector<16x64xf32>
    %cst_112 = arith.constant dense<0.000000e+00> : vector<16xf32>
    %242 = vector.multi_reduction <add>, %241, %cst_112 [1] : vector<16x64xf32> to vector<16xf32>
    %243 = vector.shape_cast %242 : vector<16xf32> to vector<16x1xf32>
    %cst_113 = arith.constant 6.400000e+01 : f32
    %244 = vector.broadcast %cst_113 : f32 to vector<16x1xf32>
    %245 = arith.divf %243, %244 : vector<16x1xf32>
    %246 = vector.broadcast %238 : vector<16x1xf32> to vector<16x64xf32>
    %247 = arith.subf %230, %246 : vector<16x64xf32>
    %cst_114 = arith.constant 9.99999974E-6 : f32
    %248 = vector.broadcast %cst_114 : f32 to vector<16x1xf32>
    %249 = arith.addf %245, %248 : vector<16x1xf32>
    %250 = math.rsqrt %249 : vector<16x1xf32>
    %251 = vector.broadcast %250 : vector<16x1xf32> to vector<16x64xf32>
    %252 = arith.mulf %247, %251 : vector<16x64xf32>
    %253 = vector.broadcast %232 : vector<1x64xf32> to vector<16x64xf32>
    %254 = arith.mulf %252, %253 : vector<16x64xf32>
    %255 = vector.broadcast %234 : vector<1x64xf32> to vector<16x64xf32>
    %256 = arith.addf %254, %255 : vector<16x64xf32>
    %c1 = arith.constant 1 : index
    %c0_115 = arith.constant 0 : index
    %c0_116 = arith.constant 0 : index
    %257 = vector.load %arg4[%c1, %c0_115, %c0_116] : memref<2x64x192xf32, #tpu.memory_space<vmem>>, vector<1x64x192xf32>
    %258 = vector.shape_cast %257 : vector<1x64x192xf32> to vector<64x192xf32>
    %cst_117 = arith.constant dense<0.000000e+00> : vector<16x192xf32>
    %259 = tpu.matmul %256, %258, %cst_117 {dimension_numbers = #tpu.dot_dimension_numbers<[1], [0], [0], [1], [0, 0, 1, 1], [], []>} : vector<16x64xf32>, vector<64x192xf32>, vector<16x192xf32> -> vector<16x192xf32>
    %c1_118 = arith.constant 1 : index
    %c0_119 = arith.constant 0 : index
    %c0_120 = arith.constant 0 : index
    %260 = vector.load %arg5[%c1_118, %c0_119, %c0_120] : memref<2x1x192xf32, #tpu.memory_space<vmem>>, vector<1x1x192xf32>
    %261 = vector.shape_cast %260 : vector<1x1x192xf32> to vector<1x192xf32>
    %262 = vector.broadcast %261 : vector<1x192xf32> to vector<16x192xf32>
    %263 = arith.addf %259, %262 : vector<16x192xf32>
    %264 = vector.extract_strided_slice %263 {offsets = [0, 0], sizes = [16, 64], strides = [1, 1]} : vector<16x192xf32> to vector<16x64xf32>
    %265 = vector.extract_strided_slice %263 {offsets = [0, 64], sizes = [16, 64], strides = [1, 1]} : vector<16x192xf32> to vector<16x64xf32>
    %266 = vector.extract_strided_slice %263 {offsets = [0, 128], sizes = [16, 64], strides = [1, 1]} : vector<16x192xf32> to vector<16x64xf32>
    %c1_121 = arith.constant 1 : index
    %c0_122 = arith.constant 0 : index
    %c0_123 = arith.constant 0 : index
    %267 = vector.load %arg6[%c1_121, %c0_122, %c0_123] : memref<2x64x64xf32, #tpu.memory_space<vmem>>, vector<1x64x64xf32>
    %268 = vector.shape_cast %267 : vector<1x64x64xf32> to vector<64x64xf32>
    %c1_124 = arith.constant 1 : index
    %c0_125 = arith.constant 0 : index
    %c0_126 = arith.constant 0 : index
    %269 = vector.load %arg7[%c1_124, %c0_125, %c0_126] : memref<2x1x64xf32, #tpu.memory_space<vmem>>, vector<1x1x64xf32>
    %270 = vector.shape_cast %269 : vector<1x1x64xf32> to vector<1x64xf32>
    %271 = vector.extract_strided_slice %264 {offsets = [0, 0], sizes = [16, 32], strides = [1, 1]} : vector<16x64xf32> to vector<16x32xf32>
    %272 = vector.shape_cast %271 : vector<16x32xf32> to vector<2x8x32xf32>
    %273 = vector.extract_strided_slice %265 {offsets = [0, 0], sizes = [16, 32], strides = [1, 1]} : vector<16x64xf32> to vector<16x32xf32>
    %274 = vector.shape_cast %273 : vector<16x32xf32> to vector<2x8x32xf32>
    %275 = vector.extract_strided_slice %266 {offsets = [0, 0], sizes = [16, 32], strides = [1, 1]} : vector<16x64xf32> to vector<16x32xf32>
    %276 = vector.shape_cast %275 : vector<16x32xf32> to vector<2x8x32xf32>
    "tpu.trace_start"() <{level = 10 : i32, message = "bqd,bkd->bqk"}> : () -> ()
    %cst_127 = arith.constant dense<0.000000e+00> : vector<2x8x8xf32>
    %277 = tpu.matmul %272, %274, %cst_127 {dimension_numbers = #tpu.dot_dimension_numbers<[2], [2], [1], [1], [0, 0, 0, 1, 1, 1], [0], [0]>} : vector<2x8x32xf32>, vector<2x8x32xf32>, vector<2x8x8xf32> -> vector<2x8x8xf32>
    "tpu.trace_stop"() : () -> ()
    %cst_128 = arith.constant 0.176776692 : f32
    %278 = vector.broadcast %cst_128 : f32 to vector<2x8x8xf32>
    %279 = arith.mulf %277, %278 : vector<2x8x8xf32>
    %280 = vector.shape_cast %10 : vector<8x8xf32> to vector<1x8x8xf32>
    %281 = vector.broadcast %280 : vector<1x8x8xf32> to vector<2x8x8xf32>
    %282 = arith.addf %279, %281 : vector<2x8x8xf32>
    %cst_129 = arith.constant dense<0xFF800000> : vector<2x8xf32>
    %283 = vector.multi_reduction <maximumf>, %282, %cst_129 [2] : vector<2x8x8xf32> to vector<2x8xf32>
    %284 = vector.shape_cast %283 : vector<2x8xf32> to vector<2x8x1xf32>
    %285 = vector.broadcast %284 : vector<2x8x1xf32> to vector<2x8x8xf32>
    %286 = arith.subf %282, %285 : vector<2x8x8xf32>
    %287 = math.exp %286 : vector<2x8x8xf32>
    %cst_130 = arith.constant dense<0.000000e+00> : vector<2x8xf32>
    %288 = vector.multi_reduction <add>, %287, %cst_130 [2] : vector<2x8x8xf32> to vector<2x8xf32>
    %289 = vector.shape_cast %288 : vector<2x8xf32> to vector<2x8x1xf32>
    %290 = tpu.reciprocal %289 : vector<2x8x1xf32> -> vector<2x8x1xf32>
    %291 = vector.broadcast %290 : vector<2x8x1xf32> to vector<2x8x8xf32>
    %292 = arith.mulf %287, %291 : vector<2x8x8xf32>
    "tpu.trace_start"() <{level = 10 : i32, message = "bqk,bkd->bqd"}> : () -> ()
    %cst_131 = arith.constant dense<0.000000e+00> : vector<2x8x32xf32>
    %293 = tpu.matmul %292, %276, %cst_131 {dimension_numbers = #tpu.dot_dimension_numbers<[2], [1], [1], [2], [0, 0, 0, 1, 1, 2], [0], [0]>} : vector<2x8x8xf32>, vector<2x8x32xf32>, vector<2x8x32xf32> -> vector<2x8x32xf32>
    "tpu.trace_stop"() : () -> ()
    %294 = vector.shape_cast %293 : vector<2x8x32xf32> to vector<16x32xf32>
    %295 = vector.extract_strided_slice %268 {offsets = [0, 0], sizes = [32, 64], strides = [1, 1]} : vector<64x64xf32> to vector<32x64xf32>
    %cst_132 = arith.constant dense<0.000000e+00> : vector<16x64xf32>
    %296 = tpu.matmul %294, %295, %cst_132 {dimension_numbers = #tpu.dot_dimension_numbers<[1], [0], [0], [1], [0, 0, 1, 1], [], []>} : vector<16x32xf32>, vector<32x64xf32>, vector<16x64xf32> -> vector<16x64xf32>
    %297 = vector.extract_strided_slice %264 {offsets = [0, 32], sizes = [16, 32], strides = [1, 1]} : vector<16x64xf32> to vector<16x32xf32>
    %298 = vector.shape_cast %297 : vector<16x32xf32> to vector<2x8x32xf32>
    %299 = vector.extract_strided_slice %265 {offsets = [0, 32], sizes = [16, 32], strides = [1, 1]} : vector<16x64xf32> to vector<16x32xf32>
    %300 = vector.shape_cast %299 : vector<16x32xf32> to vector<2x8x32xf32>
    %301 = vector.extract_strided_slice %266 {offsets = [0, 32], sizes = [16, 32], strides = [1, 1]} : vector<16x64xf32> to vector<16x32xf32>
    %302 = vector.shape_cast %301 : vector<16x32xf32> to vector<2x8x32xf32>
    "tpu.trace_start"() <{level = 10 : i32, message = "bqd,bkd->bqk"}> : () -> ()
    %cst_133 = arith.constant dense<0.000000e+00> : vector<2x8x8xf32>
    %303 = tpu.matmul %298, %300, %cst_133 {dimension_numbers = #tpu.dot_dimension_numbers<[2], [2], [1], [1], [0, 0, 0, 1, 1, 1], [0], [0]>} : vector<2x8x32xf32>, vector<2x8x32xf32>, vector<2x8x8xf32> -> vector<2x8x8xf32>
    "tpu.trace_stop"() : () -> ()
    %cst_134 = arith.constant 0.176776692 : f32
    %304 = vector.broadcast %cst_134 : f32 to vector<2x8x8xf32>
    %305 = arith.mulf %303, %304 : vector<2x8x8xf32>
    %306 = vector.shape_cast %10 : vector<8x8xf32> to vector<1x8x8xf32>
    %307 = vector.broadcast %306 : vector<1x8x8xf32> to vector<2x8x8xf32>
    %308 = arith.addf %305, %307 : vector<2x8x8xf32>
    %cst_135 = arith.constant dense<0xFF800000> : vector<2x8xf32>
    %309 = vector.multi_reduction <maximumf>, %308, %cst_135 [2] : vector<2x8x8xf32> to vector<2x8xf32>
    %310 = vector.shape_cast %309 : vector<2x8xf32> to vector<2x8x1xf32>
    %311 = vector.broadcast %310 : vector<2x8x1xf32> to vector<2x8x8xf32>
    %312 = arith.subf %308, %311 : vector<2x8x8xf32>
    %313 = math.exp %312 : vector<2x8x8xf32>
    %cst_136 = arith.constant dense<0.000000e+00> : vector<2x8xf32>
    %314 = vector.multi_reduction <add>, %313, %cst_136 [2] : vector<2x8x8xf32> to vector<2x8xf32>
    %315 = vector.shape_cast %314 : vector<2x8xf32> to vector<2x8x1xf32>
    %316 = tpu.reciprocal %315 : vector<2x8x1xf32> -> vector<2x8x1xf32>
    %317 = vector.broadcast %316 : vector<2x8x1xf32> to vector<2x8x8xf32>
    %318 = arith.mulf %313, %317 : vector<2x8x8xf32>
    "tpu.trace_start"() <{level = 10 : i32, message = "bqk,bkd->bqd"}> : () -> ()
    %cst_137 = arith.constant dense<0.000000e+00> : vector<2x8x32xf32>
    %319 = tpu.matmul %318, %302, %cst_137 {dimension_numbers = #tpu.dot_dimension_numbers<[2], [1], [1], [2], [0, 0, 0, 1, 1, 2], [0], [0]>} : vector<2x8x8xf32>, vector<2x8x32xf32>, vector<2x8x32xf32> -> vector<2x8x32xf32>
    "tpu.trace_stop"() : () -> ()
    %320 = vector.shape_cast %319 : vector<2x8x32xf32> to vector<16x32xf32>
    %321 = vector.extract_strided_slice %268 {offsets = [32, 0], sizes = [32, 64], strides = [1, 1]} : vector<64x64xf32> to vector<32x64xf32>
    %cst_138 = arith.constant dense<0.000000e+00> : vector<16x64xf32>
    %322 = tpu.matmul %320, %321, %cst_138 {dimension_numbers = #tpu.dot_dimension_numbers<[1], [0], [0], [1], [0, 0, 1, 1], [], []>} : vector<16x32xf32>, vector<32x64xf32>, vector<16x64xf32> -> vector<16x64xf32>
    %323 = arith.addf %296, %322 : vector<16x64xf32>
    %324 = vector.broadcast %270 : vector<1x64xf32> to vector<16x64xf32>
    %325 = arith.addf %323, %324 : vector<16x64xf32>
    %326 = arith.addf %256, %325 : vector<16x64xf32>
    %c1_139 = arith.constant 1 : index
    %c0_140 = arith.constant 0 : index
    %c0_141 = arith.constant 0 : index
    %327 = vector.load %arg8[%c1_139, %c0_140, %c0_141] : memref<2x1x64xf32, #tpu.memory_space<vmem>>, vector<1x1x64xf32>
    %328 = vector.shape_cast %327 : vector<1x1x64xf32> to vector<1x64xf32>
    %c1_142 = arith.constant 1 : index
    %c0_143 = arith.constant 0 : index
    %c0_144 = arith.constant 0 : index
    %329 = vector.load %arg9[%c1_142, %c0_143, %c0_144] : memref<2x1x64xf32, #tpu.memory_space<vmem>>, vector<1x1x64xf32>
    %330 = vector.shape_cast %329 : vector<1x1x64xf32> to vector<1x64xf32>
    %cst_145 = arith.constant dense<0.000000e+00> : vector<16xf32>
    %331 = vector.multi_reduction <add>, %326, %cst_145 [1] : vector<16x64xf32> to vector<16xf32>
    %332 = vector.shape_cast %331 : vector<16xf32> to vector<16x1xf32>
    %cst_146 = arith.constant 6.400000e+01 : f32
    %333 = vector.broadcast %cst_146 : f32 to vector<16x1xf32>
    %334 = arith.divf %332, %333 : vector<16x1xf32>
    %335 = vector.broadcast %334 : vector<16x1xf32> to vector<16x64xf32>
    %336 = arith.subf %326, %335 : vector<16x64xf32>
    %337 = arith.mulf %336, %336 : vector<16x64xf32>
    %cst_147 = arith.constant dense<0.000000e+00> : vector<16xf32>
    %338 = vector.multi_reduction <add>, %337, %cst_147 [1] : vector<16x64xf32> to vector<16xf32>
    %339 = vector.shape_cast %338 : vector<16xf32> to vector<16x1xf32>
    %cst_148 = arith.constant 6.400000e+01 : f32
    %340 = vector.broadcast %cst_148 : f32 to vector<16x1xf32>
    %341 = arith.divf %339, %340 : vector<16x1xf32>
    %342 = vector.broadcast %334 : vector<16x1xf32> to vector<16x64xf32>
    %343 = arith.subf %326, %342 : vector<16x64xf32>
    %cst_149 = arith.constant 9.99999974E-6 : f32
    %344 = vector.broadcast %cst_149 : f32 to vector<16x1xf32>
    %345 = arith.addf %341, %344 : vector<16x1xf32>
    %346 = math.rsqrt %345 : vector<16x1xf32>
    %347 = vector.broadcast %346 : vector<16x1xf32> to vector<16x64xf32>
    %348 = arith.mulf %343, %347 : vector<16x64xf32>
    %349 = vector.broadcast %328 : vector<1x64xf32> to vector<16x64xf32>
    %350 = arith.mulf %348, %349 : vector<16x64xf32>
    %351 = vector.broadcast %330 : vector<1x64xf32> to vector<16x64xf32>
    %352 = arith.addf %350, %351 : vector<16x64xf32>
    %c1_150 = arith.constant 1 : index
    %c0_151 = arith.constant 0 : index
    %c0_152 = arith.constant 0 : index
    %353 = vector.load %arg10[%c1_150, %c0_151, %c0_152] : memref<2x64x64xf32, #tpu.memory_space<vmem>>, vector<1x64x64xf32>
    %354 = vector.shape_cast %353 : vector<1x64x64xf32> to vector<64x64xf32>
    %cst_153 = arith.constant dense<0.000000e+00> : vector<16x64xf32>
    %355 = tpu.matmul %352, %354, %cst_153 {dimension_numbers = #tpu.dot_dimension_numbers<[1], [0], [0], [1], [0, 0, 1, 1], [], []>} : vector<16x64xf32>, vector<64x64xf32>, vector<16x64xf32> -> vector<16x64xf32>
    %c1_154 = arith.constant 1 : index
    %c0_155 = arith.constant 0 : index
    %c0_156 = arith.constant 0 : index
    %356 = vector.load %arg11[%c1_154, %c0_155, %c0_156] : memref<2x1x64xf32, #tpu.memory_space<vmem>>, vector<1x1x64xf32>
    %357 = vector.shape_cast %356 : vector<1x1x64xf32> to vector<1x64xf32>
    %358 = vector.broadcast %357 : vector<1x64xf32> to vector<16x64xf32>
    %359 = arith.addf %355, %358 : vector<16x64xf32>
    %c1_157 = arith.constant 1 : index
    %c0_158 = arith.constant 0 : index
    %c0_159 = arith.constant 0 : index
    %360 = vector.load %arg12[%c1_157, %c0_158, %c0_159] : memref<2x64x128xf32, #tpu.memory_space<vmem>>, vector<1x64x128xf32>
    %361 = vector.shape_cast %360 : vector<1x64x128xf32> to vector<64x128xf32>
    %cst_160 = arith.constant dense<0.000000e+00> : vector<16x128xf32>
    %362 = tpu.matmul %4, %361, %cst_160 {dimension_numbers = #tpu.dot_dimension_numbers<[1], [0], [0], [1], [0, 0, 1, 1], [], []>} : vector<16x64xf32>, vector<64x128xf32>, vector<16x128xf32> -> vector<16x128xf32>
    %c1_161 = arith.constant 1 : index
    %c0_162 = arith.constant 0 : index
    %c0_163 = arith.constant 0 : index
    %363 = vector.load %arg13[%c1_161, %c0_162, %c0_163] : memref<2x1x128xf32, #tpu.memory_space<vmem>>, vector<1x1x128xf32>
    %364 = vector.shape_cast %363 : vector<1x1x128xf32> to vector<1x128xf32>
    %365 = vector.broadcast %364 : vector<1x128xf32> to vector<16x128xf32>
    %366 = arith.addf %362, %365 : vector<16x128xf32>
    %367 = vector.extract_strided_slice %366 {offsets = [0, 0], sizes = [16, 64], strides = [1, 1]} : vector<16x128xf32> to vector<16x64xf32>
    %368 = vector.extract_strided_slice %366 {offsets = [0, 64], sizes = [16, 64], strides = [1, 1]} : vector<16x128xf32> to vector<16x64xf32>
    %c1_164 = arith.constant 1 : index
    %c0_165 = arith.constant 0 : index
    %c0_166 = arith.constant 0 : index
    %369 = vector.load %arg14[%c1_164, %c0_165, %c0_166] : memref<2x64x64xf32, #tpu.memory_space<vmem>>, vector<1x64x64xf32>
    %370 = vector.shape_cast %369 : vector<1x64x64xf32> to vector<64x64xf32>
    %c1_167 = arith.constant 1 : index
    %c0_168 = arith.constant 0 : index
    %c0_169 = arith.constant 0 : index
    %371 = vector.load %arg15[%c1_167, %c0_168, %c0_169] : memref<2x1x64xf32, #tpu.memory_space<vmem>>, vector<1x1x64xf32>
    %372 = vector.shape_cast %371 : vector<1x1x64xf32> to vector<1x64xf32>
    %373 = vector.extract_strided_slice %359 {offsets = [0, 0], sizes = [16, 32], strides = [1, 1]} : vector<16x64xf32> to vector<16x32xf32>
    %374 = vector.shape_cast %373 : vector<16x32xf32> to vector<2x8x32xf32>
    %375 = vector.extract_strided_slice %367 {offsets = [0, 0], sizes = [16, 32], strides = [1, 1]} : vector<16x64xf32> to vector<16x32xf32>
    %376 = vector.shape_cast %375 : vector<16x32xf32> to vector<2x8x32xf32>
    %377 = vector.extract_strided_slice %368 {offsets = [0, 0], sizes = [16, 32], strides = [1, 1]} : vector<16x64xf32> to vector<16x32xf32>
    %378 = vector.shape_cast %377 : vector<16x32xf32> to vector<2x8x32xf32>
    "tpu.trace_start"() <{level = 10 : i32, message = "bqd,bkd->bqk"}> : () -> ()
    %cst_170 = arith.constant dense<0.000000e+00> : vector<2x8x8xf32>
    %379 = tpu.matmul %374, %376, %cst_170 {dimension_numbers = #tpu.dot_dimension_numbers<[2], [2], [1], [1], [0, 0, 0, 1, 1, 1], [0], [0]>} : vector<2x8x32xf32>, vector<2x8x32xf32>, vector<2x8x8xf32> -> vector<2x8x8xf32>
    "tpu.trace_stop"() : () -> ()
    %cst_171 = arith.constant 0.176776692 : f32
    %380 = vector.broadcast %cst_171 : f32 to vector<2x8x8xf32>
    %381 = arith.mulf %379, %380 : vector<2x8x8xf32>
    %cst_172 = arith.constant dense<0xFF800000> : vector<2x8xf32>
    %382 = vector.multi_reduction <maximumf>, %381, %cst_172 [2] : vector<2x8x8xf32> to vector<2x8xf32>
    %383 = vector.shape_cast %382 : vector<2x8xf32> to vector<2x8x1xf32>
    %384 = vector.broadcast %383 : vector<2x8x1xf32> to vector<2x8x8xf32>
    %385 = arith.subf %381, %384 : vector<2x8x8xf32>
    %386 = math.exp %385 : vector<2x8x8xf32>
    %cst_173 = arith.constant dense<0.000000e+00> : vector<2x8xf32>
    %387 = vector.multi_reduction <add>, %386, %cst_173 [2] : vector<2x8x8xf32> to vector<2x8xf32>
    %388 = vector.shape_cast %387 : vector<2x8xf32> to vector<2x8x1xf32>
    %389 = tpu.reciprocal %388 : vector<2x8x1xf32> -> vector<2x8x1xf32>
    %390 = vector.broadcast %389 : vector<2x8x1xf32> to vector<2x8x8xf32>
    %391 = arith.mulf %386, %390 : vector<2x8x8xf32>
    "tpu.trace_start"() <{level = 10 : i32, message = "bqk,bkd->bqd"}> : () -> ()
    %cst_174 = arith.constant dense<0.000000e+00> : vector<2x8x32xf32>
    %392 = tpu.matmul %391, %378, %cst_174 {dimension_numbers = #tpu.dot_dimension_numbers<[2], [1], [1], [2], [0, 0, 0, 1, 1, 2], [0], [0]>} : vector<2x8x8xf32>, vector<2x8x32xf32>, vector<2x8x32xf32> -> vector<2x8x32xf32>
    "tpu.trace_stop"() : () -> ()
    %393 = vector.shape_cast %392 : vector<2x8x32xf32> to vector<16x32xf32>
    %394 = vector.extract_strided_slice %370 {offsets = [0, 0], sizes = [32, 64], strides = [1, 1]} : vector<64x64xf32> to vector<32x64xf32>
    %cst_175 = arith.constant dense<0.000000e+00> : vector<16x64xf32>
    %395 = tpu.matmul %393, %394, %cst_175 {dimension_numbers = #tpu.dot_dimension_numbers<[1], [0], [0], [1], [0, 0, 1, 1], [], []>} : vector<16x32xf32>, vector<32x64xf32>, vector<16x64xf32> -> vector<16x64xf32>
    %396 = vector.extract_strided_slice %359 {offsets = [0, 32], sizes = [16, 32], strides = [1, 1]} : vector<16x64xf32> to vector<16x32xf32>
    %397 = vector.shape_cast %396 : vector<16x32xf32> to vector<2x8x32xf32>
    %398 = vector.extract_strided_slice %367 {offsets = [0, 32], sizes = [16, 32], strides = [1, 1]} : vector<16x64xf32> to vector<16x32xf32>
    %399 = vector.shape_cast %398 : vector<16x32xf32> to vector<2x8x32xf32>
    %400 = vector.extract_strided_slice %368 {offsets = [0, 32], sizes = [16, 32], strides = [1, 1]} : vector<16x64xf32> to vector<16x32xf32>
    %401 = vector.shape_cast %400 : vector<16x32xf32> to vector<2x8x32xf32>
    "tpu.trace_start"() <{level = 10 : i32, message = "bqd,bkd->bqk"}> : () -> ()
    %cst_176 = arith.constant dense<0.000000e+00> : vector<2x8x8xf32>
    %402 = tpu.matmul %397, %399, %cst_176 {dimension_numbers = #tpu.dot_dimension_numbers<[2], [2], [1], [1], [0, 0, 0, 1, 1, 1], [0], [0]>} : vector<2x8x32xf32>, vector<2x8x32xf32>, vector<2x8x8xf32> -> vector<2x8x8xf32>
    "tpu.trace_stop"() : () -> ()
    %cst_177 = arith.constant 0.176776692 : f32
    %403 = vector.broadcast %cst_177 : f32 to vector<2x8x8xf32>
    %404 = arith.mulf %402, %403 : vector<2x8x8xf32>
    %cst_178 = arith.constant dense<0xFF800000> : vector<2x8xf32>
    %405 = vector.multi_reduction <maximumf>, %404, %cst_178 [2] : vector<2x8x8xf32> to vector<2x8xf32>
    %406 = vector.shape_cast %405 : vector<2x8xf32> to vector<2x8x1xf32>
    %407 = vector.broadcast %406 : vector<2x8x1xf32> to vector<2x8x8xf32>
    %408 = arith.subf %404, %407 : vector<2x8x8xf32>
    %409 = math.exp %408 : vector<2x8x8xf32>
    %cst_179 = arith.constant dense<0.000000e+00> : vector<2x8xf32>
    %410 = vector.multi_reduction <add>, %409, %cst_179 [2] : vector<2x8x8xf32> to vector<2x8xf32>
    %411 = vector.shape_cast %410 : vector<2x8xf32> to vector<2x8x1xf32>
    %412 = tpu.reciprocal %411 : vector<2x8x1xf32> -> vector<2x8x1xf32>
    %413 = vector.broadcast %412 : vector<2x8x1xf32> to vector<2x8x8xf32>
    %414 = arith.mulf %409, %413 : vector<2x8x8xf32>
    "tpu.trace_start"() <{level = 10 : i32, message = "bqk,bkd->bqd"}> : () -> ()
    %cst_180 = arith.constant dense<0.000000e+00> : vector<2x8x32xf32>
    %415 = tpu.matmul %414, %401, %cst_180 {dimension_numbers = #tpu.dot_dimension_numbers<[2], [1], [1], [2], [0, 0, 0, 1, 1, 2], [0], [0]>} : vector<2x8x8xf32>, vector<2x8x32xf32>, vector<2x8x32xf32> -> vector<2x8x32xf32>
    "tpu.trace_stop"() : () -> ()
    %416 = vector.shape_cast %415 : vector<2x8x32xf32> to vector<16x32xf32>
    %417 = vector.extract_strided_slice %370 {offsets = [32, 0], sizes = [32, 64], strides = [1, 1]} : vector<64x64xf32> to vector<32x64xf32>
    %cst_181 = arith.constant dense<0.000000e+00> : vector<16x64xf32>
    %418 = tpu.matmul %416, %417, %cst_181 {dimension_numbers = #tpu.dot_dimension_numbers<[1], [0], [0], [1], [0, 0, 1, 1], [], []>} : vector<16x32xf32>, vector<32x64xf32>, vector<16x64xf32> -> vector<16x64xf32>
    %419 = arith.addf %395, %418 : vector<16x64xf32>
    %420 = vector.broadcast %372 : vector<1x64xf32> to vector<16x64xf32>
    %421 = arith.addf %419, %420 : vector<16x64xf32>
    %422 = arith.addf %352, %421 : vector<16x64xf32>
    %c1_182 = arith.constant 1 : index
    %c0_183 = arith.constant 0 : index
    %c0_184 = arith.constant 0 : index
    %423 = vector.load %arg16[%c1_182, %c0_183, %c0_184] : memref<2x1x64xf32, #tpu.memory_space<vmem>>, vector<1x1x64xf32>
    %424 = vector.shape_cast %423 : vector<1x1x64xf32> to vector<1x64xf32>
    %c1_185 = arith.constant 1 : index
    %c0_186 = arith.constant 0 : index
    %c0_187 = arith.constant 0 : index
    %425 = vector.load %arg17[%c1_185, %c0_186, %c0_187] : memref<2x1x64xf32, #tpu.memory_space<vmem>>, vector<1x1x64xf32>
    %426 = vector.shape_cast %425 : vector<1x1x64xf32> to vector<1x64xf32>
    %cst_188 = arith.constant dense<0.000000e+00> : vector<16xf32>
    %427 = vector.multi_reduction <add>, %422, %cst_188 [1] : vector<16x64xf32> to vector<16xf32>
    %428 = vector.shape_cast %427 : vector<16xf32> to vector<16x1xf32>
    %cst_189 = arith.constant 6.400000e+01 : f32
    %429 = vector.broadcast %cst_189 : f32 to vector<16x1xf32>
    %430 = arith.divf %428, %429 : vector<16x1xf32>
    %431 = vector.broadcast %430 : vector<16x1xf32> to vector<16x64xf32>
    %432 = arith.subf %422, %431 : vector<16x64xf32>
    %433 = arith.mulf %432, %432 : vector<16x64xf32>
    %cst_190 = arith.constant dense<0.000000e+00> : vector<16xf32>
    %434 = vector.multi_reduction <add>, %433, %cst_190 [1] : vector<16x64xf32> to vector<16xf32>
    %435 = vector.shape_cast %434 : vector<16xf32> to vector<16x1xf32>
    %cst_191 = arith.constant 6.400000e+01 : f32
    %436 = vector.broadcast %cst_191 : f32 to vector<16x1xf32>
    %437 = arith.divf %435, %436 : vector<16x1xf32>
    %438 = vector.broadcast %430 : vector<16x1xf32> to vector<16x64xf32>
    %439 = arith.subf %422, %438 : vector<16x64xf32>
    %cst_192 = arith.constant 9.99999974E-6 : f32
    %440 = vector.broadcast %cst_192 : f32 to vector<16x1xf32>
    %441 = arith.addf %437, %440 : vector<16x1xf32>
    %442 = math.rsqrt %441 : vector<16x1xf32>
    %443 = vector.broadcast %442 : vector<16x1xf32> to vector<16x64xf32>
    %444 = arith.mulf %439, %443 : vector<16x64xf32>
    %445 = vector.broadcast %424 : vector<1x64xf32> to vector<16x64xf32>
    %446 = arith.mulf %444, %445 : vector<16x64xf32>
    %447 = vector.broadcast %426 : vector<1x64xf32> to vector<16x64xf32>
    %448 = arith.addf %446, %447 : vector<16x64xf32>
    %c1_193 = arith.constant 1 : index
    %c0_194 = arith.constant 0 : index
    %c0_195 = arith.constant 0 : index
    %449 = vector.load %arg18[%c1_193, %c0_194, %c0_195] : memref<2x64x128xf32, #tpu.memory_space<vmem>>, vector<1x64x128xf32>
    %450 = vector.shape_cast %449 : vector<1x64x128xf32> to vector<64x128xf32>
    %cst_196 = arith.constant dense<0.000000e+00> : vector<16x128xf32>
    %451 = tpu.matmul %448, %450, %cst_196 {dimension_numbers = #tpu.dot_dimension_numbers<[1], [0], [0], [1], [0, 0, 1, 1], [], []>} : vector<16x64xf32>, vector<64x128xf32>, vector<16x128xf32> -> vector<16x128xf32>
    %c1_197 = arith.constant 1 : index
    %c0_198 = arith.constant 0 : index
    %c0_199 = arith.constant 0 : index
    %452 = vector.load %arg19[%c1_197, %c0_198, %c0_199] : memref<2x1x128xf32, #tpu.memory_space<vmem>>, vector<1x1x128xf32>
    %453 = vector.shape_cast %452 : vector<1x1x128xf32> to vector<1x128xf32>
    %454 = vector.broadcast %453 : vector<1x128xf32> to vector<16x128xf32>
    %455 = arith.addf %451, %454 : vector<16x128xf32>
    %456 = arith.mulf %455, %455 : vector<16x128xf32>
    %457 = arith.mulf %455, %456 : vector<16x128xf32>
    %cst_200 = arith.constant 4.471500e-02 : f32
    %458 = vector.broadcast %cst_200 : f32 to vector<16x128xf32>
    %459 = arith.mulf %458, %457 : vector<16x128xf32>
    %460 = arith.addf %455, %459 : vector<16x128xf32>
    %cst_201 = arith.constant 0.797884583 : f32
    %461 = vector.broadcast %cst_201 : f32 to vector<16x128xf32>
    %462 = arith.mulf %461, %460 : vector<16x128xf32>
    %463 = math.tanh %462 : vector<16x128xf32>
    %cst_202 = arith.constant 1.000000e+00 : f32
    %464 = vector.broadcast %cst_202 : f32 to vector<16x128xf32>
    %465 = arith.addf %464, %463 : vector<16x128xf32>
    %cst_203 = arith.constant 5.000000e-01 : f32
    %466 = vector.broadcast %cst_203 : f32 to vector<16x128xf32>
    %467 = arith.mulf %466, %465 : vector<16x128xf32>
    %468 = arith.mulf %455, %467 : vector<16x128xf32>
    %c1_204 = arith.constant 1 : index
    %c0_205 = arith.constant 0 : index
    %c0_206 = arith.constant 0 : index
    %469 = vector.load %arg20[%c1_204, %c0_205, %c0_206] : memref<2x128x64xf32, #tpu.memory_space<vmem>>, vector<1x128x64xf32>
    %470 = vector.shape_cast %469 : vector<1x128x64xf32> to vector<128x64xf32>
    %cst_207 = arith.constant dense<0.000000e+00> : vector<16x64xf32>
    %471 = tpu.matmul %468, %470, %cst_207 {dimension_numbers = #tpu.dot_dimension_numbers<[1], [0], [0], [1], [0, 0, 1, 1], [], []>} : vector<16x128xf32>, vector<128x64xf32>, vector<16x64xf32> -> vector<16x64xf32>
    %c1_208 = arith.constant 1 : index
    %c0_209 = arith.constant 0 : index
    %c0_210 = arith.constant 0 : index
    %472 = vector.load %arg21[%c1_208, %c0_209, %c0_210] : memref<2x1x64xf32, #tpu.memory_space<vmem>>, vector<1x1x64xf32>
    %473 = vector.shape_cast %472 : vector<1x1x64xf32> to vector<1x64xf32>
    %474 = vector.broadcast %473 : vector<1x64xf32> to vector<16x64xf32>
    %475 = arith.addf %471, %474 : vector<16x64xf32>
    %476 = arith.addf %448, %475 : vector<16x64xf32>
    %c1_211 = arith.constant 1 : index
    %c0_212 = arith.constant 0 : index
    %c0_213 = arith.constant 0 : index
    %477 = vector.load %arg22[%c1_211, %c0_212, %c0_213] : memref<2x1x64xf32, #tpu.memory_space<vmem>>, vector<1x1x64xf32>
    %478 = vector.shape_cast %477 : vector<1x1x64xf32> to vector<1x64xf32>
    %c1_214 = arith.constant 1 : index
    %c0_215 = arith.constant 0 : index
    %c0_216 = arith.constant 0 : index
    %479 = vector.load %arg23[%c1_214, %c0_215, %c0_216] : memref<2x1x64xf32, #tpu.memory_space<vmem>>, vector<1x1x64xf32>
    %480 = vector.shape_cast %479 : vector<1x1x64xf32> to vector<1x64xf32>
    %cst_217 = arith.constant dense<0.000000e+00> : vector<16xf32>
    %481 = vector.multi_reduction <add>, %476, %cst_217 [1] : vector<16x64xf32> to vector<16xf32>
    %482 = vector.shape_cast %481 : vector<16xf32> to vector<16x1xf32>
    %cst_218 = arith.constant 6.400000e+01 : f32
    %483 = vector.broadcast %cst_218 : f32 to vector<16x1xf32>
    %484 = arith.divf %482, %483 : vector<16x1xf32>
    %485 = vector.broadcast %484 : vector<16x1xf32> to vector<16x64xf32>
    %486 = arith.subf %476, %485 : vector<16x64xf32>
    %487 = arith.mulf %486, %486 : vector<16x64xf32>
    %cst_219 = arith.constant dense<0.000000e+00> : vector<16xf32>
    %488 = vector.multi_reduction <add>, %487, %cst_219 [1] : vector<16x64xf32> to vector<16xf32>
    %489 = vector.shape_cast %488 : vector<16xf32> to vector<16x1xf32>
    %cst_220 = arith.constant 6.400000e+01 : f32
    %490 = vector.broadcast %cst_220 : f32 to vector<16x1xf32>
    %491 = arith.divf %489, %490 : vector<16x1xf32>
    %492 = vector.broadcast %484 : vector<16x1xf32> to vector<16x64xf32>
    %493 = arith.subf %476, %492 : vector<16x64xf32>
    %cst_221 = arith.constant 9.99999974E-6 : f32
    %494 = vector.broadcast %cst_221 : f32 to vector<16x1xf32>
    %495 = arith.addf %491, %494 : vector<16x1xf32>
    %496 = math.rsqrt %495 : vector<16x1xf32>
    %497 = vector.broadcast %496 : vector<16x1xf32> to vector<16x64xf32>
    %498 = arith.mulf %493, %497 : vector<16x64xf32>
    %499 = vector.broadcast %478 : vector<1x64xf32> to vector<16x64xf32>
    %500 = arith.mulf %498, %499 : vector<16x64xf32>
    %501 = vector.broadcast %480 : vector<1x64xf32> to vector<16x64xf32>
    %502 = arith.addf %500, %501 : vector<16x64xf32>
    %503 = tpu.iota {dimensions = array<i32: 0>} : vector<2x16xi32>
    %504 = tpu.iota {dimensions = array<i32: 1>} : vector<2x16xi32>
    %c8_i32 = arith.constant 8 : i32
    %505 = vector.broadcast %c8_i32 : i32 to vector<2x16xi32>
    %506 = arith.muli %503, %505 : vector<2x16xi32>
    %507 = vector.broadcast %0 : i32 to vector<2x16xi32>
    %508 = arith.addi %506, %507 : vector<2x16xi32>
    %509 = arith.cmpi eq, %504, %508 : vector<2x16xi32>
    %510 = arith.extui %509 : vector<2x16xi1> to vector<2x16xi32>
    %511 = arith.sitofp %510 : vector<2x16xi32> to vector<2x16xf32>
    %cst_222 = arith.constant dense<0.000000e+00> : vector<2x64xf32>
    %512 = tpu.matmul %511, %502, %cst_222 {dimension_numbers = #tpu.dot_dimension_numbers<[1], [0], [0], [1], [0, 0, 1, 1], [], []>} : vector<2x16xf32>, vector<16x64xf32>, vector<2x64xf32> -> vector<2x64xf32>
    %c0_223 = arith.constant 0 : index
    %c0_224 = arith.constant 0 : index
    %513 = vector.load %arg24[%c0_223, %c0_224] : memref<64x128xf32, #tpu.memory_space<vmem>>, vector<64x128xf32>
    %cst_225 = arith.constant dense<0.000000e+00> : vector<2x128xf32>
    %514 = tpu.matmul %512, %513, %cst_225 {dimension_numbers = #tpu.dot_dimension_numbers<[1], [0], [0], [1], [0, 0, 1, 1], [], []>} : vector<2x64xf32>, vector<64x128xf32>, vector<2x128xf32> -> vector<2x128xf32>
    %c0_226 = arith.constant 0 : index
    %c0_227 = arith.constant 0 : index
    %515 = vector.load %arg25[%c0_226, %c0_227] : memref<1x128xf32, #tpu.memory_space<vmem>>, vector<1x128xf32>
    %516 = vector.broadcast %515 : vector<1x128xf32> to vector<2x128xf32>
    %517 = arith.addf %514, %516 : vector<2x128xf32>
    %c0_228 = arith.constant 0 : index
    %c0_229 = arith.constant 0 : index
    %518 = vector.load %arg26[%c0_228, %c0_229] : memref<2x128xf32, #tpu.memory_space<vmem>>, vector<2x128xf32>
    tpu.vector_store %arg26[%c0_228, %c0_229], %517 {strides = array<i32>} : memref<2x128xf32, #tpu.memory_space<vmem>>, vector<2x128xf32>,
    return
  }
  func.func @transform_0(%arg0: i32, %arg1: memref<1xi32, #tpu.memory_space<smem>>) -> (i32, i32, i32) {
    %c0_i32 = arith.constant 0 : i32
    %c0_i32_0 = arith.constant 0 : i32
    %c0_i32_1 = arith.constant 0 : i32
    %c0_i32_2 = arith.constant 0 : i32
    return %c0_i32, %c0_i32_0, %c0_i32_1 : i32, i32, i32
  }
  func.func @transform_1(%arg0: i32, %arg1: memref<1xi32, #tpu.memory_space<smem>>) -> (i32, i32, i32) {
    %c0_i32 = arith.constant 0 : i32
    %c0_i32_0 = arith.constant 0 : i32
    %c0_i32_1 = arith.constant 0 : i32
    %c0_i32_2 = arith.constant 0 : i32
    return %c0_i32, %c0_i32_0, %c0_i32_1 : i32, i32, i32
  }
  func.func @transform_2(%arg0: i32, %arg1: memref<1xi32, #tpu.memory_space<smem>>) -> (i32, i32, i32) {
    %c0_i32 = arith.constant 0 : i32
    %c0_i32_0 = arith.constant 0 : i32
    %c0_i32_1 = arith.constant 0 : i32
    %c0_i32_2 = arith.constant 0 : i32
    return %c0_i32, %c0_i32_0, %c0_i32_1 : i32, i32, i32
  }
  func.func @transform_3(%arg0: i32, %arg1: memref<1xi32, #tpu.memory_space<smem>>) -> (i32, i32, i32) {
    %c0_i32 = arith.constant 0 : i32
    %c0_i32_0 = arith.constant 0 : i32
    %c0_i32_1 = arith.constant 0 : i32
    %c0_i32_2 = arith.constant 0 : i32
    return %c0_i32, %c0_i32_0, %c0_i32_1 : i32, i32, i32
  }
  func.func @transform_4(%arg0: i32, %arg1: memref<1xi32, #tpu.memory_space<smem>>) -> (i32, i32, i32) {
    %c0_i32 = arith.constant 0 : i32
    %c0_i32_0 = arith.constant 0 : i32
    %c0_i32_1 = arith.constant 0 : i32
    %c0_i32_2 = arith.constant 0 : i32
    return %c0_i32, %c0_i32_0, %c0_i32_1 : i32, i32, i32
  }
  func.func @transform_5(%arg0: i32, %arg1: memref<1xi32, #tpu.memory_space<smem>>) -> (i32, i32, i32) {
    %c0_i32 = arith.constant 0 : i32
    %c0_i32_0 = arith.constant 0 : i32
    %c0_i32_1 = arith.constant 0 : i32
    %c0_i32_2 = arith.constant 0 : i32
    return %c0_i32, %c0_i32_0, %c0_i32_1 : i32, i32, i32
  }
  func.func @transform_6(%arg0: i32, %arg1: memref<1xi32, #tpu.memory_space<smem>>) -> (i32, i32, i32) {
    %c0_i32 = arith.constant 0 : i32
    %c0_i32_0 = arith.constant 0 : i32
    %c0_i32_1 = arith.constant 0 : i32
    %c0_i32_2 = arith.constant 0 : i32
    return %c0_i32, %c0_i32_0, %c0_i32_1 : i32, i32, i32
  }
  func.func @transform_7(%arg0: i32, %arg1: memref<1xi32, #tpu.memory_space<smem>>) -> (i32, i32, i32) {
    %c0_i32 = arith.constant 0 : i32
    %c0_i32_0 = arith.constant 0 : i32
    %c0_i32_1 = arith.constant 0 : i32
    %c0_i32_2 = arith.constant 0 : i32
    return %c0_i32, %c0_i32_0, %c0_i32_1 : i32, i32, i32
  }
  func.func @transform_8(%arg0: i32, %arg1: memref<1xi32, #tpu.memory_space<smem>>) -> (i32, i32, i32) {
    %c0_i32 = arith.constant 0 : i32
    %c0_i32_0 = arith.constant 0 : i32
    %c0_i32_1 = arith.constant 0 : i32
    %c0_i32_2 = arith.constant 0 : i32
    return %c0_i32, %c0_i32_0, %c0_i32_1 : i32, i32, i32
  }
  func.func @transform_9(%arg0: i32, %arg1: memref<1xi32, #tpu.memory_space<smem>>) -> (i32, i32, i32) {
    %c0_i32 = arith.constant 0 : i32
    %c0_i32_0 = arith.constant 0 : i32
    %c0_i32_1 = arith.constant 0 : i32
    %c0_i32_2 = arith.constant 0 : i32
    return %c0_i32, %c0_i32_0, %c0_i32_1 : i32, i32, i32
  }
  func.func @transform_10(%arg0: i32, %arg1: memref<1xi32, #tpu.memory_space<smem>>) -> (i32, i32, i32) {
    %c0_i32 = arith.constant 0 : i32
    %c0_i32_0 = arith.constant 0 : i32
    %c0_i32_1 = arith.constant 0 : i32
    %c0_i32_2 = arith.constant 0 : i32
    return %c0_i32, %c0_i32_0, %c0_i32_1 : i32, i32, i32
  }
  func.func @transform_11(%arg0: i32, %arg1: memref<1xi32, #tpu.memory_space<smem>>) -> (i32, i32, i32) {
    %c0_i32 = arith.constant 0 : i32
    %c0_i32_0 = arith.constant 0 : i32
    %c0_i32_1 = arith.constant 0 : i32
    %c0_i32_2 = arith.constant 0 : i32
    return %c0_i32, %c0_i32_0, %c0_i32_1 : i32, i32, i32
  }
  func.func @transform_12(%arg0: i32, %arg1: memref<1xi32, #tpu.memory_space<smem>>) -> (i32, i32, i32) {
    %c0_i32 = arith.constant 0 : i32
    %c0_i32_0 = arith.constant 0 : i32
    %c0_i32_1 = arith.constant 0 : i32
    %c0_i32_2 = arith.constant 0 : i32
    return %c0_i32, %c0_i32_0, %c0_i32_1 : i32, i32, i32
  }
  func.func @transform_13(%arg0: i32, %arg1: memref<1xi32, #tpu.memory_space<smem>>) -> (i32, i32, i32) {
    %c0_i32 = arith.constant 0 : i32
    %c0_i32_0 = arith.constant 0 : i32
    %c0_i32_1 = arith.constant 0 : i32
    %c0_i32_2 = arith.constant 0 : i32
    return %c0_i32, %c0_i32_0, %c0_i32_1 : i32, i32, i32
  }
  func.func @transform_14(%arg0: i32, %arg1: memref<1xi32, #tpu.memory_space<smem>>) -> (i32, i32, i32) {
    %c0_i32 = arith.constant 0 : i32
    %c0_i32_0 = arith.constant 0 : i32
    %c0_i32_1 = arith.constant 0 : i32
    %c0_i32_2 = arith.constant 0 : i32
    return %c0_i32, %c0_i32_0, %c0_i32_1 : i32, i32, i32
  }
  func.func @transform_15(%arg0: i32, %arg1: memref<1xi32, #tpu.memory_space<smem>>) -> (i32, i32, i32) {
    %c0_i32 = arith.constant 0 : i32
    %c0_i32_0 = arith.constant 0 : i32
    %c0_i32_1 = arith.constant 0 : i32
    %c0_i32_2 = arith.constant 0 : i32
    return %c0_i32, %c0_i32_0, %c0_i32_1 : i32, i32, i32
  }
  func.func @transform_16(%arg0: i32, %arg1: memref<1xi32, #tpu.memory_space<smem>>) -> (i32, i32, i32) {
    %c0_i32 = arith.constant 0 : i32
    %c0_i32_0 = arith.constant 0 : i32
    %c0_i32_1 = arith.constant 0 : i32
    %c0_i32_2 = arith.constant 0 : i32
    return %c0_i32, %c0_i32_0, %c0_i32_1 : i32, i32, i32
  }
  func.func @transform_17(%arg0: i32, %arg1: memref<1xi32, #tpu.memory_space<smem>>) -> (i32, i32, i32) {
    %c0_i32 = arith.constant 0 : i32
    %c0_i32_0 = arith.constant 0 : i32
    %c0_i32_1 = arith.constant 0 : i32
    %c0_i32_2 = arith.constant 0 : i32
    return %c0_i32, %c0_i32_0, %c0_i32_1 : i32, i32, i32
  }
  func.func @transform_18(%arg0: i32, %arg1: memref<1xi32, #tpu.memory_space<smem>>) -> (i32, i32, i32) {
    %c0_i32 = arith.constant 0 : i32
    %c0_i32_0 = arith.constant 0 : i32
    %c0_i32_1 = arith.constant 0 : i32
    %c0_i32_2 = arith.constant 0 : i32
    return %c0_i32, %c0_i32_0, %c0_i32_1 : i32, i32, i32
  }
  func.func @transform_19(%arg0: i32, %arg1: memref<1xi32, #tpu.memory_space<smem>>) -> (i32, i32, i32) {
    %c0_i32 = arith.constant 0 : i32
    %c0_i32_0 = arith.constant 0 : i32
    %c0_i32_1 = arith.constant 0 : i32
    %c0_i32_2 = arith.constant 0 : i32
    return %c0_i32, %c0_i32_0, %c0_i32_1 : i32, i32, i32
  }
  func.func @transform_20(%arg0: i32, %arg1: memref<1xi32, #tpu.memory_space<smem>>) -> (i32, i32, i32) {
    %c0_i32 = arith.constant 0 : i32
    %c0_i32_0 = arith.constant 0 : i32
    %c0_i32_1 = arith.constant 0 : i32
    %c0_i32_2 = arith.constant 0 : i32
    return %c0_i32, %c0_i32_0, %c0_i32_1 : i32, i32, i32
  }
  func.func @transform_21(%arg0: i32, %arg1: memref<1xi32, #tpu.memory_space<smem>>) -> (i32, i32, i32) {
    %c0_i32 = arith.constant 0 : i32
    %c0_i32_0 = arith.constant 0 : i32
    %c0_i32_1 = arith.constant 0 : i32
    %c0_i32_2 = arith.constant 0 : i32
    return %c0_i32, %c0_i32_0, %c0_i32_1 : i32, i32, i32
  }
  func.func @transform_22(%arg0: i32, %arg1: memref<1xi32, #tpu.memory_space<smem>>) -> (i32, i32) {
    %c0_i32 = arith.constant 0 : i32
    %c0_i32_0 = arith.constant 0 : i32
    %c0_i32_1 = arith.constant 0 : i32
    return %c0_i32, %c0_i32_0 : i32, i32
  }
  func.func @transform_23(%arg0: i32, %arg1: memref<1xi32, #tpu.memory_space<smem>>) -> (i32, i32) {
    %c0_i32 = arith.constant 0 : i32
    %c0_i32_0 = arith.constant 0 : i32
    %c0_i32_1 = arith.constant 0 : i32
    return %c0_i32, %c0_i32_0 : i32, i32
  }
  func.func @transform_24(%arg0: i32, %arg1: memref<1xi32, #tpu.memory_space<smem>>) -> (i32, i32) {
    %c0_i32 = arith.constant 0 : i32
    %c0_i32_0 = arith.constant 0 : i32
    %c0_i32_1 = arith.constant 0 : i32
    return %c0_i32, %c0_i32_0 : i32, i32
  }
}

</mosaic_0001>

<bundles_post_ra>
// kernel: custom-call.8
= control target key start
LH: loop header
LB: loop body
LE: loop exit
PB: predicated region body
PF: predicated region fallthrough
CT: control target
= control target key end

     0   :  { %s6_s0 = inlined_call_operand.vmem [shape: f32[7,2], index: 0, kind: output, shape index: {}]  }

// kernel: custom-call.2
= control target key start
LH: loop header
LB: loop body
LE: loop exit
PB: predicated region body
PF: predicated region fallthrough
CT: control target
= control target key end

     0   :  { %s6_s0 = inlined_call_operand.vmem [shape: pred[2], index: 0, kind: output, shape index: {}]  }

// kernel: policy_forward.1
= control target key start
LH: loop header
LB: loop body
LE: loop exit
PB: predicated region body
PF: predicated region fallthrough
CT: control target
= control target key end

     0   :  { %v3087_v3 = vmov 0.0   ;;  %vm74_vm0 = vcmask 523264   ;;  %v64_v19 = vlaneseq  ;;  %vm3088_vm1 = vmmov 0   ;;  %s3090_s29 = smov 32   ;;  %s3091_s30 = smov 96   ;;  %s3711_s1 = inlined_call_operand.vmem [shape: f32[2,64,192], index: 1, kind: input, shape index: {}]   ;;  %s3712_s0 = inlined_call_operand.vmem [shape: f32[2,8,64], index: 0, kind: input, shape index: {}]   ;;  %s3713_s2 = inlined_call_operand.vmem [shape: f32[2,1,192], index: 2, kind: input, shape index: {}]   ;;  %s3714_s3 = inlined_call_operand.vmem [shape: f32[2,64,64], index: 3, kind: input, shape index: {}]   ;;  %s3715_s4 = inlined_call_operand.vmem [shape: f32[2,1,64], index: 4, kind: input, shape index: {}]   ;;  %s3716_s7 = inlined_call_operand.vmem [shape: f32[2,64,128], index: 7, kind: input, shape index: {}]   ;;  %s3717_s5 = inlined_call_operand.vmem [shape: f32[2,1,64], index: 5, kind: input, shape index: {}]   ;;  %s3718_s6 = inlined_call_operand.vmem [shape: f32[2,1,64], index: 6, kind: input, shape index: {}]   ;;  %s3719_s9 = inlined_call_operand.vmem [shape: f32[2,128,64], index: 9, kind: input, shape index: {}]   ;;  %s3720_s8 = inlined_call_operand.vmem [shape: f32[2,1,128], index: 8, kind: input, shape index: {}]   ;;  %s3721_s10 = inlined_call_operand.vmem [shape: f32[2,1,64], index: 10, kind: input, shape index: {}]   ;;  %s3722_s11 = inlined_call_operand.vmem [shape: f32[2,1,64], index: 11, kind: input, shape index: {}]   ;;  %s3723_s12 = inlined_call_operand.vmem [shape: f32[2,1,64], index: 12, kind: input, shape index: {}]   ;;  %s3724_s13 = inlined_call_operand.vmem [shape: f32[2,8,64], index: 13, kind: output, shape index: {}]  }
   0x1   :  { %v61_v0 = vld [vmem:[%s3711_s1 + $0x78] sm:$0xff]  ;;  %v60_v1 = vld [vmem:[%s3711_s1 + $0x70] sm:$0xff]  ;;  %v59_v2 = vld [vmem:[%s3711_s1 + $0x68] sm:$0xff]  ;;  %145 = vmatprep.mubr.f32.mxu0 %v3087_v3  ;;  %2794 = vmatprep.subr.mxu1 %v3087_v3  ;;  %vm170_vm2 = vcmask 261120   ;;  %vm324_vm3 = vcmask 64512  }
   0x2   :  { %97 = vmatprep.subr.mxu0 %v61_v0  ;;  %v58_v4 = vld [vmem:[%s3711_s1 + $0x60] sm:$0xff]  ;;  %v57_v5 = vld [vmem:[%s3711_s1 + $0x58] sm:$0xff]  ;;  %v56_v6 = vld [vmem:[%s3711_s1 + $0x50] sm:$0xff]  ;;  %v3228_v20 = vshrl.u32 %v64_v19, 7  ;;  %2796 = vmatprep.mubr.msk.f32.mxu1 %vm3088_vm1, %v3087_v3 }
   0x3   :  { %98 = vmatpush1.msra.mxu0 %v60_v1  ;;  %v55_v7 = vld [vmem:[%s3711_s1 + $0x48] sm:$0xff]  ;;  %v54_v8 = vld [vmem:[%s3711_s1 + $0x40] sm:$0xff]  ;;  %v53_v9 = vld [vmem:[%s3711_s1 + $0x38] sm:$0xff] }
   0x4   :  { %99 = vmatprep.subr.mxu0 %v59_v2  ;;  %v52_v10 = vld [vmem:[%s3711_s1 + $0x30] sm:$0xff]  ;;  %v51_v11 = vld [vmem:[%s3711_s1 + $0x28] sm:$0xff]  ;;  %v50_v12 = vld [vmem:[%s3711_s1 + $0x20] sm:$0xff]  ;;  %v66_v21 = vsub.s32 0, %v3228_v20  ;;  %v70_v29 = vsub.s32 1, %v3228_v20 }
   0x5   :  { %100 = vmatpush1.msra.mxu0 %v58_v4  ;;  %v49_v13 = vld [vmem:[%s3711_s1 + $0x18] sm:$0xff]  ;;  %v48_v14 = vld [vmem:[%s3711_s1 + $0x10] sm:$0xff]  ;;  %v47_v15 = vld [vmem:[%s3711_s1 + $0x8] sm:$0xff] }
   0x6   :  { %101 = vmatprep.subr.mxu0 %v57_v5  ;;  %v46_v16 = vld [vmem:[%s3711_s1] sm:$0xff]  ;;  %v3224_v18 = vld [vmem:[%s3712_s0 + $0x8] sm:$0xff] }
   0x7   :  { %102 = vmatpush1.msra.mxu0 %v56_v6  ;;  %v3215_v17 = vld [vmem:[%s3712_s0] sm:$0xff]  ;;  %s3089_s0 = smov 64  }
   0x8   :  { %103 = vmatprep.subr.mxu0 %v55_v7  ;;  %v62_v22 = vld [vmem:[%s3713_s2] sm:$0x3] }
   0x9   :  { %104 = vmatpush1.msra.mxu0 %v54_v8  ;;  %v67_v23 = vrot.slane %v62_v22, %v66_v21  ;;  %v71_v31 = vrot.slane %v62_v22, %v70_v29 }
   0xa   :  { %105 = vmatprep.subr.mxu0 %v53_v9 }
   0xb   :  { %106 = vmatpush1.msra.mxu0 %v52_v10 }
   0xc   :  { %107 = vmatprep.subr.mxu0 %v51_v11 }
   0xd   :  { %108 = vmatpush1.msra.mxu0 %v50_v12 }
   0xe   :  { %109 = vmatprep.subr.mxu0 %v49_v13 }
   0xf   :  { %110 = vmatpush1.msra.mxu0 %v48_v14 }
  0x10   :  { %111 = vmatprep.subr.mxu0 %v47_v15 }
  0x11   :  { %112 = vmatpush1.msra.mxu0 %v46_v16 }
  0x12   :  { %2572 = vmatmul.mubr.msk.f32.vlgmr.msra.gmra.mxu0 %vm74_vm0, %v3215_v17  ;;  %2819 = vmatprep.subr.mxu0 %v3087_v3 }
  0x13   :  { %151 = vmatprep.mubr.f32.mxu0 %v3087_v3 }
  0x16   :  { %2573 = vmatmul.mubr.msk.f32.gmra.mxu0 %vm74_vm0, %v3224_v18 }
  0x17   :  { %2821 = vmatprep.mubr.msk.f32.mxu0 %vm3088_vm1, %v3087_v3 }
  0xd2   :  { %v147_v24 = vpop.f32.mrf.mxu0 }
  0xd3   :  { %v148_v25 = vadd.f32 %v147_v24, %v67_v23 }
  0xd4   :  { %v149_v26 = vpop.f32.mrf.mxu0 }
  0xd5   :  { %168 = vrot.lane.b32.xlu0 %v148_v25, %s3089_s0  ;;  %v3252_v33 = vadd.f32 %v149_v26, %v71_v31 }
  0xd6   :  { %v153_v27 = vpop.f32.mrf.mxu0 }
  0xd7   :  { %v154_v28 = vadd.f32 %v153_v27, %v67_v23 }
  0xd8   :  { %v155_v58 = vpop.f32.mrf.mxu0 }
  0xd9   :  { %246 = vrot.lane.b32.xlu0 %v154_v28, %s3089_s0  ;;  %v156_v61 = vadd.f32 %v155_v58, %v71_v31 }
 0x147   :  { %v169_v30 = vpop.permute.xlu0 %168 }
 0x148   :  { %2795 = vmatpush3.xpose.msk.msra.mxu1 %vm170_vm2, %v169_v30 }
 0x149   :  { %2799 = vmatprep.subr.mxu1 %v3087_v3 }
 0x14b   :  { %2797 = vmatmul.mubr.msk.f32.vlgmr.msra.gmra.mxu1 %vm170_vm2, %v148_v25  ;;  %v247_v32 = vpop.permute.xlu0 %246 }
 0x14c   :  { %2800 = vmatpush3.xpose.msk.msra.mxu1 %vm170_vm2, %v247_v32  ;;  %2801 = vmatprep.mubr.msk.f32.mxu1 %vm3088_vm1, %v3087_v3 }
 0x14d   :  { %2804 = vmatprep.subr.mxu1 %v3087_v3 }
 0x14f   :  { %2802 = vmatmul.mubr.msk.f32.vlgmr.msra.gmra.mxu1 %vm170_vm2, %v154_v28 }
 0x150   :  { %2805 = vmatpush3.msra.mxu1 %v3252_v33  ;;  %2806 = vmatprep.mubr.msk.f32.mxu1 %vm3088_vm1, %v3087_v3 }
 0x151   :  { %2809 = vmatprep.subr.mxu1 %v3087_v3 }
 0x20b   :  { %v241_v34 = vpop.f32.mrf.mxu1 }
 0x20c   :  { %v322_v35 = vmul.f32 0.17677669, %v241_v34 }
 0x20d   :  { %v2798_v36 = vpop.f32.mrf.mxu1 }
 0x20e   :  { %v325_v37 = vsel %vm324_vm3, %v322_v35, -inf  ;;  %v165_v36 = vld [vmem:[%s3714_s3 + $0x38] sm:$0xff] }
 0x20f   :  { %326 = vmax.xlane.f32.xlu1 %v325_v37  ;;  %v318_v38 = vpop.f32.mrf.mxu1  ;;  %v164_v37 = vld [vmem:[%s3714_s3 + $0x30] sm:$0xff] }
 0x210   :  { %v323_v39 = vmul.f32 0.17677669, %v318_v38  ;;  %v163_v38 = vld [vmem:[%s3714_s3 + $0x28] sm:$0xff] }
 0x211   :  { %v2803_v40 = vpop.f32.mrf.mxu1 }
 0x212   :  { %v328_v41 = vsel %vm324_vm3, %v323_v39, -inf  ;;  %v161_v40 = vld [vmem:[%s3714_s3 + $0x18] sm:$0xff] }
 0x213   :  { %329 = vmax.xlane.f32.xlu1 %v328_v41 }
 0x224   :  { %495 = vrot.lane.b32.xlu1 %v148_v25, %s3090_s29 }
 0x228   :  { %573 = vrot.lane.b32.xlu1 %v154_v28, %s3090_s29 }
 0x22c   :  { %493 = vrot.lane.b32.xlu1 %v148_v25, %s3091_s30 }
 0x298   :  { %v327_v42 = vpop.xlane.xlu1 %326 }
 0x299   :  { %v331_v43 = vsub.f32 %v322_v35, %v327_v42 }
 0x29b   :  { %v333_v44 = vmul.f32 1.442695, %v331_v43 }
 0x29c   :  { %v330_v45 = vpop.xlane.xlu1 %329 }
 0x29d   :  { %3031 = vpow2.f32 %v333_v44  ;;  %v332_v46 = vsub.f32 %v323_v39, %v330_v45  ;;  %v162_v39 = vld [vmem:[%s3714_s3 + $0x20] sm:$0xff]  ;;  %v160_v44 = vld [vmem:[%s3714_s3 + $0x10] sm:$0xff] }
 0x29f   :  { %v335_v47 = vmul.f32 1.442695, %v332_v46  ;;  %v159_v46 = vld [vmem:[%s3714_s3 + $0x8] sm:$0xff] }
 0x2a0   :  { %v496_v48 = vpop.permute.xlu1 %495 }
 0x2a1   :  { %3033 = vpow2.f32 %v335_v47  ;;  %v158_v47 = vld [vmem:[%s3714_s3] sm:$0xff] }
 0x2a4   :  { %v574_v49 = vpop.permute.xlu1 %573 }
 0x2a5   :  { %2820 = vmatpush3.xpose.msk.msra.mxu0 %vm170_vm2, %v574_v49 }
 0x2a6   :  { %2829 = vmatprep.subr.mxu0 %v3087_v3 }
 0x2a8   :  { %v494_v54 = vpop.permute.xlu1 %493 }
 0x2aa   :  { %v3032_v50 = vpop.eup %3031 }
 0x2ab   :  { %v337_v51 = vsel %vm324_vm3, %v3032_v50, 0.0 }
 0x2ac   :  { %338 = vadd.xlane.f32.xlu0 %v337_v51 }
 0x2ae   :  { %v3034_v52 = vpop.eup %3033 }
 0x2af   :  { %v340_v53 = vsel %vm324_vm3, %v3034_v52, 0.0 }
 0x2b0   :  { %341 = vadd.xlane.f32.xlu1 %v340_v53 }
 0x2c1   :  { %571 = vrot.lane.b32.xlu1 %v154_v28, %s3091_s30 }
 0x335   :  { %v339_v55 = vpop.xlane.xlu0 %338 }
 0x336   :  { %3035 = vrcp.f32 %v339_v55 }
 0x339   :  { %v342_v56 = vpop.xlane.xlu1 %341 }
 0x33a   :  { %3037 = vrcp.f32 %v342_v56 }
 0x33d   :  { %v572_v57 = vpop.permute.xlu1 %571 }
 0x33e   :  { %2822 = vmatmul.mubr.msk.f32.vlgmr.msra.gmra.mxu0 %vm170_vm2, %v572_v57 }
 0x33f   :  { %2831 = vmatprep.mubr.msk.f32.mxu0 %vm3088_vm1, %v3087_v3 }
 0x343   :  { %v3036_v59 = vpop.eup %3035 }
 0x344   :  { %v345_v60 = vmul.f32 %v3036_v59, %v3032_v50  ;;  %v2590_v50 = vld [vmem:[%s3715_s4] ss:$0 sm:$0xff] }
 0x346   :  { %2807 = vmatmul.mubr.msk.f32.vlgmr.msra.gmra.mxu1 %vm324_vm3, %v345_v60 }
 0x347   :  { %v3038_v62 = vpop.eup %3037  ;;  %2810 = vmatpush3.msra.mxu1 %v156_v61  ;;  %2811 = vmatprep.mubr.msk.f32.mxu1 %vm3088_vm1, %v3087_v3 }
 0x348   :  { %2814 = vmatprep.subr.mxu1 %v3087_v3  ;;  %v346_v63 = vmul.f32 %v3038_v62, %v3034_v52 }
 0x34a   :  { %2812 = vmatmul.mubr.msk.f32.vlgmr.msra.gmra.mxu1 %vm324_vm3, %v346_v63 }
 0x34b   :  { %2815 = vmatpush3.xpose.msk.msra.mxu1 %vm170_vm2, %v496_v48  ;;  %2816 = vmatprep.mubr.msk.f32.mxu1 %vm3088_vm1, %v3087_v3 }
 0x34c   :  { %2824 = vmatprep.subr.mxu1 %v3087_v3 }
 0x34e   :  { %2817 = vmatmul.mubr.msk.f32.vlgmr.msra.gmra.mxu1 %vm170_vm2, %v494_v54 }
 0x34f   :  { %2826 = vmatprep.mubr.msk.f32.mxu1 %vm3088_vm1, %v3087_v3 }
 0x3fe   :  { %v645_v0 = vpop.f32.mrf.mxu0 }
 0x3ff   :  { %v650_v1 = vmul.f32 0.17677669, %v645_v0 }
 0x400   :  { %v2823_v2 = vpop.f32.mrf.mxu0 }
 0x401   :  { %v654_v4 = vsel %vm324_vm3, %v650_v1, -inf }
 0x402   :  { %655 = vmax.xlane.f32.xlu1 %v654_v4 }
 0x406   :  { %v416_v5 = vpop.f32.mrf.mxu1 }
 0x408   :  { %v2808_v6 = vpop.f32.mrf.mxu1 }
 0x40a   :  { %v3285_v7 = vpop.f32.mrf.mxu1 }
 0x40c   :  { %v2813_v8 = vpop.f32.mrf.mxu1 }
 0x40d   :  { %v1049_v8 = vld [vmem:[%s3716_s7 + $0x28] sm:$0xff] }
 0x40e   :  { %v567_v9 = vpop.f32.mrf.mxu1 }
 0x40f   :  { %v649_v10 = vmul.f32 0.17677669, %v567_v9  ;;  %v1048_v9 = vld [vmem:[%s3716_s7 + $0x20] sm:$0xff] }
 0x410   :  { %v2818_v11 = vpop.f32.mrf.mxu1 }
 0x411   :  { %v651_v12 = vsel %vm324_vm3, %v649_v10, -inf  ;;  %v1046_v11 = vld [vmem:[%s3716_s7 + $0x10] sm:$0xff] }
 0x412   :  { %652 = vmax.xlane.f32.xlu0 %v651_v12  ;;  %v1045_v12 = vld [vmem:[%s3716_s7 + $0x8] sm:$0xff] }
 0x48b   :  { %v656_v13 = vpop.xlane.xlu1 %655 }
 0x48c   :  { %v658_v14 = vsub.f32 %v650_v1, %v656_v13  ;;  %v1044_v13 = vld [vmem:[%s3716_s7] sm:$0xff] }
 0x48e   :  { %v661_v15 = vmul.f32 1.442695, %v658_v14 }
 0x490   :  { %3039 = vpow2.f32 %v661_v15 }
 0x49b   :  { %v653_v22 = vpop.xlane.xlu0 %652 }
 0x49c   :  { %v657_v23 = vsub.f32 %v649_v10, %v653_v22  ;;  %v1047_v10 = vld [vmem:[%s3716_s7 + $0x18] sm:$0xff] }
 0x49d   :  { %v3040_v16 = vpop.eup %3039 }
 0x49e   :  { %v666_v19 = vsel %vm324_vm3, %v3040_v16, 0.0  ;;  %v659_v24 = vmul.f32 1.442695, %v657_v23 }
 0x49f   :  { %667 = vadd.xlane.f32.xlu0 %v666_v19 }
 0x4a0   :  { %3041 = vpow2.f32 %v659_v24 }
 0x4ad   :  { %v3042_v25 = vpop.eup %3041 }
 0x4ae   :  { %v663_v26 = vsel %vm324_vm3, %v3042_v25, 0.0 }
 0x4b5   :  { %674 = vrot.lane.b32.xlu0 %v3252_v33, %s3091_s30 }
 0x4d4   :  { %664 = vadd.xlane.f32.xlu0 %v663_v26 }
 0x4ea   :  { %751 = vrot.lane.b32.xlu0 %v156_v61, %s3091_s30 }
 0x528   :  { %v668_v27 = vpop.xlane.xlu0 %667 }
 0x529   :  { %3043 = vrcp.f32 %v668_v27  ;;  %v2592_v27 = vld [vmem:[%s3718_s6] ss:$0 sm:$0xff] }
 0x52c   :  { %v675_v28 = vpop.permute.xlu0 %674 }
 0x52d   :  { %2825 = vmatpush3.msra.mxu1 %v675_v28 }
 0x536   :  { %v3044_v31 = vpop.eup %3043 }
 0x537   :  { %v672_v34 = vmul.f32 %v3044_v31, %v3040_v16 }
 0x55d   :  { %v665_v30 = vpop.xlane.xlu0 %664 }
 0x55e   :  { %3045 = vrcp.f32 %v665_v30 }
 0x561   :  { %v752_v32 = vpop.permute.xlu0 %751 }
 0x562   :  { %2830 = vmatpush3.msra.mxu0 %v752_v32 }
 0x563   :  { %2832 = vmatmul.mubr.msk.f32.vlgmr.msra.gmra.mxu0 %vm324_vm3, %v672_v34  ;;  %2834 = vmatprep.subr.mxu0 %v165_v36 }
 0x564   :  { %2835 = vmatpush3.msra.mxu0 %v165_v36  ;;  %v1172_v36 = vld [vmem:[%s3719_s9 + $0x70] sm:$0xff] }
 0x565   :  { %2836 = vmatprep.subr.mxu0 %v164_v37 }
 0x566   :  { %2837 = vmatpush3.msra.mxu0 %v164_v37  ;;  %v1171_v37 = vld [vmem:[%s3719_s9 + $0x68] sm:$0xff] }
 0x567   :  { %2838 = vmatprep.subr.mxu0 %v163_v38 }
 0x568   :  { %2839 = vmatpush3.msra.mxu0 %v163_v38  ;;  %v1170_v38 = vld [vmem:[%s3719_s9 + $0x60] sm:$0xff] }
 0x569   :  { %2840 = vmatprep.subr.mxu0 %v162_v39 }
 0x56a   :  { %2841 = vmatpush3.msra.mxu0 %v162_v39  ;;  %v1169_v39 = vld [vmem:[%s3719_s9 + $0x58] sm:$0xff] }
 0x56b   :  { %v3046_v33 = vpop.eup %3045  ;;  %2845 = vmatprep.subr.mxu0 %v161_v40 }
 0x56c   :  { %v671_v35 = vmul.f32 %v3046_v33, %v3042_v25  ;;  %v2591_v25 = vld [vmem:[%s3717_s5] ss:$0 sm:$0xff] }
 0x56e   :  { %2827 = vmatmul.mubr.msk.f32.vlgmr.msra.gmra.mxu1 %vm324_vm3, %v671_v35  ;;  %v1173_v35 = vld [vmem:[%s3719_s9 + $0x78] sm:$0xff] }
 0x623   :  { %v823_v41 = vpop.f32.mrf.mxu0 }
 0x625   :  { %v2833_v42 = vpop.f32.mrf.mxu0 }
 0x626   :  { %v1166_v42 = vld [vmem:[%s3719_s9 + $0x40] sm:$0xff] }
 0x62e   :  { %v746_v43 = vpop.f32.mrf.mxu1 }
 0x62f   :  { %2842 = vmatprep.mubr.msk.f32.mxu0 %vm170_vm2, %v746_v43  ;;  %v1165_v43 = vld [vmem:[%s3719_s9 + $0x38] sm:$0xff] }
 0x630   :  { %v2828_v45 = vpop.f32.mrf.mxu1  ;;  %2843 = vmatmul.mubr.msk.f32.vlgmr.msra.gmra.mxu0 %vm170_vm2, %v823_v41  ;;  %v1167_v41 = vld [vmem:[%s3719_s9 + $0x48] sm:$0xff] }
 0x631   :  { %2846 = vmatpush3.msra.mxu0 %v161_v40  ;;  %2853 = vmatprep.mubr.msk.f32.mxu0 %vm170_vm2, %v416_v5  ;;  %v1168_v40 = vld [vmem:[%s3719_s9 + $0x50] sm:$0xff]  ;;  %v1163_v45 = vld [vmem:[%s3719_s9 + $0x28] sm:$0xff] }
 0x632   :  { %2847 = vmatprep.subr.mxu0 %v160_v44 }
 0x633   :  { %2848 = vmatpush3.msra.mxu0 %v160_v44  ;;  %v1164_v44 = vld [vmem:[%s3719_s9 + $0x30] sm:$0xff] }
 0x634   :  { %2849 = vmatprep.subr.mxu0 %v159_v46 }
 0x635   :  { %2850 = vmatpush3.msra.mxu0 %v159_v46  ;;  %v1162_v46 = vld [vmem:[%s3719_s9 + $0x20] sm:$0xff] }
 0x636   :  { %2851 = vmatprep.subr.mxu0 %v158_v47 }
 0x637   :  { %2852 = vmatpush3.msra.mxu0 %v158_v47  ;;  %v1161_v47 = vld [vmem:[%s3719_s9 + $0x18] sm:$0xff] }
 0x638   :  { %2854 = vmatmul.mubr.msk.f32.vlgmr.msra.gmra.mxu0 %vm170_vm2, %v3285_v7  ;;  %v1050_v7 = vld [vmem:[%s3716_s7 + $0x30] sm:$0xff]  ;;  %2875 = vmatprep.subr.mxu0 %v1173_v35 }
 0x639   :  { %2876 = vmatpush3.msra.mxu0 %v1173_v35  ;;  %v2612_v35 = vld [vmem:[%s3711_s1 + $0xe8] sm:$0xff] }
 0x63a   :  { %2877 = vmatprep.subr.mxu0 %v1172_v36 }
 0x63b   :  { %2878 = vmatpush3.msra.mxu0 %v1172_v36  ;;  %v2611_v36 = vld [vmem:[%s3711_s1 + $0xe0] sm:$0xff] }
 0x63c   :  { %2879 = vmatprep.subr.mxu0 %v1171_v37 }
 0x63d   :  { %2880 = vmatpush3.msra.mxu0 %v1171_v37  ;;  %v2610_v37 = vld [vmem:[%s3711_s1 + $0xd8] sm:$0xff] }
 0x63e   :  { %2881 = vmatprep.subr.mxu0 %v1170_v38 }
 0x63f   :  { %2882 = vmatpush3.msra.mxu0 %v1170_v38  ;;  %v2609_v38 = vld [vmem:[%s3711_s1 + $0xd0] sm:$0xff] }
 0x640   :  { %2883 = vmatprep.subr.mxu0 %v1169_v39 }
 0x641   :  { %2884 = vmatpush3.msra.mxu0 %v1169_v39  ;;  %v2608_v39 = vld [vmem:[%s3711_s1 + $0xc8] sm:$0xff] }
 0x642   :  { %2885 = vmatprep.subr.mxu0 %v1168_v40 }
 0x643   :  { %2886 = vmatpush3.msra.mxu0 %v1168_v40  ;;  %v2607_v40 = vld [vmem:[%s3711_s1 + $0xc0] sm:$0xff] }
 0x644   :  { %2887 = vmatprep.subr.mxu0 %v1167_v41 }
 0x645   :  { %2888 = vmatpush3.msra.mxu0 %v1167_v41  ;;  %v2606_v41 = vld [vmem:[%s3711_s1 + $0xb8] sm:$0xff] }
 0x646   :  { %2889 = vmatprep.subr.mxu0 %v1166_v42 }
 0x647   :  { %2890 = vmatpush3.msra.mxu0 %v1166_v42  ;;  %v2605_v42 = vld [vmem:[%s3711_s1 + $0xb0] sm:$0xff] }
 0x648   :  { %2891 = vmatprep.subr.mxu0 %v1165_v43 }
 0x649   :  { %2892 = vmatpush3.msra.mxu0 %v1165_v43  ;;  %v2604_v43 = vld [vmem:[%s3711_s1 + $0xa8] sm:$0xff] }
 0x64a   :  { %2893 = vmatprep.subr.mxu0 %v1164_v44 }
 0x64b   :  { %2894 = vmatpush3.msra.mxu0 %v1164_v44  ;;  %v2603_v44 = vld [vmem:[%s3711_s1 + $0xa0] sm:$0xff] }
 0x64c   :  { %2895 = vmatprep.subr.mxu0 %v1163_v45 }
 0x64d   :  { %2896 = vmatpush3.msra.mxu0 %v1163_v45  ;;  %v2602_v45 = vld [vmem:[%s3711_s1 + $0x98] sm:$0xff] }
 0x64e   :  { %2897 = vmatprep.subr.mxu0 %v1162_v46 }
 0x64f   :  { %2898 = vmatpush3.msra.mxu0 %v1162_v46  ;;  %v2601_v46 = vld [vmem:[%s3711_s1 + $0x90] sm:$0xff] }
 0x650   :  { %2899 = vmatprep.subr.mxu0 %v1161_v47 }
 0x651   :  { %2900 = vmatpush3.msra.mxu0 %v1161_v47  ;;  %v2600_v47 = vld [vmem:[%s3711_s1 + $0x88] sm:$0xff] }
 0x6f0   :  { %v2844_v48 = vpop.f32.mrf.mxu0 }
 0x6f2   :  { %v899_v49 = vpop.f32.mrf.mxu0 }
 0x6f8   :  { %v2855_v51 = vpop.f32.mrf.mxu0 }
 0x6f9   :  { %v986_v52 = vadd.f32 %v2855_v51, %v2844_v48  ;;  %v1160_v48 = vld [vmem:[%s3719_s9 + $0x10] sm:$0xff]  ;;  %v2593_v51 = vld [vmem:[%s3720_s8] ss:$0 sm:$0xff] }
 0x6fa   :  { %v980_v53 = vpop.f32.mrf.mxu0  ;;  %2901 = vmatprep.subr.mxu0 %v1160_v48 }
 0x6fb   :  { %v996_v54 = vadd.f32 %v2590_v50, %v986_v52  ;;  %v981_v55 = vadd.f32 %v980_v53, %v899_v49  ;;  %v1159_v49 = vld [vmem:[%s3719_s9 + $0x8] sm:$0xff]  ;;  %2902 = vmatpush3.msra.mxu0 %v1160_v48  ;;  %v2599_v48 = vld [vmem:[%s3711_s1 + $0x80] sm:$0xff] }
 0x6fc   :  { %2903 = vmatprep.subr.mxu0 %v1159_v49 }
 0x6fd   :  { %v995_v56 = vadd.f32 %v2590_v50, %v981_v55  ;;  %v998_v57 = vadd.f32 %v996_v54, %v3224_v18  ;;  %v1158_v50 = vld [vmem:[%s3719_s9] sm:$0xff]  ;;  %2904 = vmatpush3.msra.mxu0 %v1159_v49 }
 0x6fe   :  { %2905 = vmatprep.subr.mxu0 %v1158_v50 }
 0x6ff   :  { %v1004_v58 = vsel %vm74_vm0, %v998_v57, 0.0  ;;  %v997_v59 = vadd.f32 %v995_v56, %v3215_v17  ;;  %v1051_v17 = vld [vmem:[%s3716_s7 + $0x38] sm:$0xff]  ;;  %2906 = vmatpush3.msra.mxu0 %v1158_v50 }
 0x700   :  { %1005 = vadd.xlane.f32.xlu1 %v1004_v58  ;;  %2856 = vmatprep.subr.mxu1 %v1051_v17 }
 0x701   :  { %v1001_v60 = vsel %vm74_vm0, %v997_v59, 0.0  ;;  %2857 = vmatpush3.msra.mxu1 %v1051_v17  ;;  %2910 = vmatprep.subr.mxu0 %v3087_v3 }
 0x702   :  { %1002 = vadd.xlane.f32.xlu0 %v1001_v60  ;;  %2858 = vmatprep.subr.mxu1 %v1050_v7 }
 0x703   :  { %2859 = vmatpush3.msra.mxu1 %v1050_v7 }
 0x704   :  { %2860 = vmatprep.subr.mxu1 %v1049_v8 }
 0x705   :  { %2861 = vmatpush3.msra.mxu1 %v1049_v8 }
 0x706   :  { %2862 = vmatprep.subr.mxu1 %v1048_v9 }
 0x707   :  { %2863 = vmatpush3.msra.mxu1 %v1048_v9 }
 0x708   :  { %2864 = vmatprep.subr.mxu1 %v1047_v10 }
 0x709   :  { %2865 = vmatpush3.msra.mxu1 %v1047_v10  ;;  %v2596_v10 = vld [vmem:[%s3721_s10] ss:$0 sm:$0xff] }
 0x70a   :  { %2866 = vmatprep.subr.mxu1 %v1046_v11 }
 0x70b   :  { %2867 = vmatpush3.msra.mxu1 %v1046_v11 }
 0x70c   :  { %2868 = vmatprep.subr.mxu1 %v1045_v12 }
 0x70d   :  { %2869 = vmatpush3.msra.mxu1 %v1045_v12 }
 0x70e   :  { %2870 = vmatprep.subr.mxu1 %v1044_v13 }
 0x70f   :  { %2871 = vmatpush3.msra.mxu1 %v1044_v13 }
 0x789   :  { %v1006_v61 = vpop.xlane.xlu1 %1005 }
 0x78a   :  { %v1009_v62 = vmul.f32 0.015625, %v1006_v61 }
 0x78b   :  { %v1003_v63 = vpop.xlane.xlu0 %1002 }
 0x78c   :  { %v1008_v0 = vmul.f32 0.015625, %v1003_v63  ;;  %v1011_v1 = vsub.f32 %v998_v57, %v1009_v62 }
 0x78e   :  { %v1010_v2 = vsub.f32 %v997_v59, %v1008_v0  ;;  %v1013_v6 = vmul.f32 %v1011_v1, %v1011_v1 }
 0x790   :  { %v1012_v4 = vmul.f32 %v1010_v2, %v1010_v2  ;;  %v1017_v18 = vsel %vm74_vm0, %v1013_v6, 0.0 }
 0x792   :  { %v1014_v5 = vsel %vm74_vm0, %v1012_v4, 0.0 }
 0x793   :  { %1015 = vadd.xlane.f32.xlu1 %v1014_v5 }
 0x797   :  { %1018 = vadd.xlane.f32.xlu1 %v1017_v18 }
 0x81c   :  { %v1016_v14 = vpop.xlane.xlu1 %1015 }
 0x81d   :  { %v1020_v15 = vmul.f32 0.015625, %v1016_v14 }
 0x81f   :  { %v1022_v16 = vadd.f32 1e-05, %v1020_v15 }
 0x820   :  { %v1019_v19 = vpop.xlane.xlu1 %1018 }
 0x821   :  { %3047 = vrsqrt.f32 %v1022_v16  ;;  %v1021_v22 = vmul.f32 0.015625, %v1019_v19 }
 0x823   :  { %v1023_v23 = vadd.f32 1e-05, %v1021_v22 }
 0x825   :  { %3049 = vrsqrt.f32 %v1023_v23 }
 0x82e   :  { %v3048_v24 = vpop.eup %3047 }
 0x82f   :  { %v1026_v26 = vmul.f32 %v3048_v24, %v1010_v2 }
 0x831   :  { %v1034_v28 = vmul.f32 %v2591_v25, %v1026_v26 }
 0x832   :  { %v3050_v30 = vpop.eup %3049 }
 0x833   :  { %v1027_v31 = vmul.f32 %v3050_v30, %v1011_v1  ;;  %v3363_v32 = vadd.f32 %v2592_v27, %v1034_v28 }
 0x835   :  { %v1035_v34 = vmul.f32 %v2591_v25, %v1027_v31  ;;  %2872 = vmatprep.mubr.msk.f32.mxu1 %vm74_vm0, %v3363_v32 }
 0x837   :  { %v3367_v33 = vadd.f32 %v2592_v27, %v1035_v34  ;;  %v2614_v34 = vld [vmem:[%s3711_s1 + $0xf8] sm:$0xff] }
 0x838   :  { %1354 = vmatprep.subr.mxu1 %v2614_v34 }
 0x839   :  { %2873 = vmatmul.mubr.msk.f32.vlgmr.msra.gmra.mxu1 %vm74_vm0, %v3367_v33 }
 0x83a   :  { %1402 = vmatprep.mubr.f32.mxu1 %v3087_v3 }
 0x8f9   :  { %v2874_v52 = vpop.f32.mrf.mxu1 }
 0x8fa   :  { %v1137_v53 = vadd.f32 %v2874_v52, %v2593_v51 }
 0x8fb   :  { %v1131_v54 = vpop.f32.mrf.mxu1 }
 0x8fc   :  { %v1141_v55 = vmul.f32 %v1137_v53, %v1137_v53  ;;  %v1132_v56 = vadd.f32 %v2593_v51, %v1131_v54 }
 0x8fe   :  { %v1143_v57 = vmul.f32 %v1141_v55, %v1137_v53  ;;  %v1140_v58 = vmul.f32 %v1132_v56, %v1132_v56 }
 0x900   :  { %v1145_v59 = vmul.f32 0.044715, %v1143_v57  ;;  %v1142_v60 = vmul.f32 %v1140_v58, %v1132_v56  ;;  %v2598_v58 = vld [vmem:[%s3723_s12] ss:$0 sm:$0xff] }
 0x902   :  { %v1147_v61 = vadd.f32 %v1145_v59, %v1137_v53  ;;  %v1144_v62 = vmul.f32 0.044715, %v1142_v60 }
 0x904   :  { %v1149_v63 = vmul.f32 0.7978846, %v1147_v61  ;;  %v1146_v0 = vadd.f32 %v1144_v62, %v1132_v56 }
 0x906   :  { %3051 = vtanh.f32 %v1149_v63  ;;  %v1148_v1 = vmul.f32 0.7978846, %v1146_v0 }
 0x908   :  { %3053 = vtanh.f32 %v1148_v1  ;;  %v2615_v1 = vld [vmem:[%s3713_s2 + $0x2] sm:$0x3] }
 0x913   :  { %v3052_v2 = vpop.eup %3051 }
 0x914   :  { %v1153_v4 = vadd.f32 1.0, %v3052_v2  ;;  %v1325_v2 = vrot.slane %v2615_v1, %v66_v21 }
 0x915   :  { %v3054_v5 = vpop.eup %3053 }
 0x916   :  { %v1152_v6 = vadd.f32 1.0, %v3054_v5  ;;  %v1155_v18 = vmul.f32 0.5, %v1153_v4 }
 0x918   :  { %v1154_v17 = vmul.f32 0.5, %v1152_v6  ;;  %v1157_v8 = vmul.f32 %v1155_v18, %v1137_v53 }
 0x91a   :  { %v1156_v7 = vmul.f32 %v1154_v17, %v1132_v56  ;;  %v2597_v56 = vld [vmem:[%s3722_s11] ss:$0 sm:$0xff] }
 0x91c   :  { %2907 = vmatprep.mubr.f32.mxu0 %v1156_v7  ;;  %v1329_v7 = vrot.slane %v2615_v1, %v70_v29 }
 0x91d   :  { %2908 = vmatmul.mubr.f32.vlgmr.msra.gmra.mxu0 %v1157_v8 }
 0x91e   :  { %2912 = vmatprep.mubr.msk.f32.mxu0 %vm3088_vm1, %v3087_v3 }
 0x9dd   :  { %v2909_v9 = vpop.f32.mrf.mxu0 }
 0x9de   :  { %v1253_v12 = vadd.f32 %v2909_v9, %v2596_v10 }
 0x9df   :  { %v1247_v11 = vpop.f32.mrf.mxu0 }
 0x9e0   :  { %v1248_v13 = vadd.f32 %v2596_v10, %v1247_v11  ;;  %v1257_v16 = vadd.f32 %v1253_v12, %v3367_v33  ;;  %v2613_v33 = vld [vmem:[%s3711_s1 + $0xf0] sm:$0xff] }
 0x9e1   :  { %1355 = vmatpush1.msra.mxu1 %v2613_v33 }
 0x9e2   :  { %v1256_v14 = vadd.f32 %v1248_v13, %v3363_v32  ;;  %v1263_v19 = vsel %vm74_vm0, %v1257_v16, 0.0  ;;  %1356 = vmatprep.subr.mxu1 %v2612_v35 }
 0x9e3   :  { %1357 = vmatpush1.msra.mxu1 %v2611_v36 }
 0x9e4   :  { %v1260_v15 = vsel %vm74_vm0, %v1256_v14, 0.0  ;;  %1358 = vmatprep.subr.mxu1 %v2610_v37 }
 0x9e5   :  { %1261 = vadd.xlane.f32.xlu1 %v1260_v15  ;;  %1359 = vmatpush1.msra.mxu1 %v2609_v38 }
 0x9e6   :  { %1360 = vmatprep.subr.mxu1 %v2608_v39 }
 0x9e7   :  { %1361 = vmatpush1.msra.mxu1 %v2607_v40 }
 0x9e8   :  { %1362 = vmatprep.subr.mxu1 %v2606_v41 }
 0x9e9   :  { %1264 = vadd.xlane.f32.xlu1 %v1263_v19  ;;  %1363 = vmatpush1.msra.mxu1 %v2605_v42 }
 0x9ea   :  { %1364 = vmatprep.subr.mxu1 %v2604_v43 }
 0x9eb   :  { %1365 = vmatpush1.msra.mxu1 %v2603_v44 }
 0x9ec   :  { %1366 = vmatprep.subr.mxu1 %v2602_v45 }
 0x9ed   :  { %1367 = vmatpush1.msra.mxu1 %v2601_v46 }
 0x9ee   :  { %1368 = vmatprep.subr.mxu1 %v2600_v47 }
 0x9ef   :  { %1369 = vmatpush1.msra.mxu1 %v2599_v48 }
 0x9f0   :  { %2915 = vmatprep.subr.mxu1 %v3087_v3 }
 0xa6e   :  { %v1262_v22 = vpop.xlane.xlu1 %1261 }
 0xa6f   :  { %v1266_v23 = vmul.f32 0.015625, %v1262_v22 }
 0xa71   :  { %v1268_v24 = vsub.f32 %v1256_v14, %v1266_v23 }
 0xa72   :  { %v1265_v25 = vpop.xlane.xlu1 %1264 }
 0xa73   :  { %v1267_v26 = vmul.f32 0.015625, %v1265_v25  ;;  %v1270_v27 = vmul.f32 %v1268_v24, %v1268_v24 }
 0xa75   :  { %v1269_v28 = vsub.f32 %v1257_v16, %v1267_v26  ;;  %v1272_v30 = vsel %vm74_vm0, %v1270_v27, 0.0 }
 0xa76   :  { %1273 = vadd.xlane.f32.xlu1 %v1272_v30 }
 0xa77   :  { %v1271_v31 = vmul.f32 %v1269_v28, %v1269_v28 }
 0xa79   :  { %v1275_v32 = vsel %vm74_vm0, %v1271_v31, 0.0 }
 0xa7a   :  { %1276 = vadd.xlane.f32.xlu1 %v1275_v32 }
 0xaff   :  { %v1274_v49 = vpop.xlane.xlu1 %1273 }
 0xb00   :  { %v1278_v50 = vmul.f32 0.015625, %v1274_v49 }
 0xb02   :  { %v1280_v51 = vadd.f32 1e-05, %v1278_v50 }
 0xb03   :  { %v1277_v52 = vpop.xlane.xlu1 %1276 }
 0xb04   :  { %3055 = vrsqrt.f32 %v1280_v51  ;;  %v1279_v53 = vmul.f32 0.015625, %v1277_v52 }
 0xb06   :  { %v1281_v54 = vadd.f32 1e-05, %v1279_v53 }
 0xb08   :  { %3057 = vrsqrt.f32 %v1281_v54 }
 0xb11   :  { %v3056_v55 = vpop.eup %3055 }
 0xb12   :  { %v1284_v57 = vmul.f32 %v3056_v55, %v1268_v24 }
 0xb14   :  { %v1292_v59 = vmul.f32 %v2597_v56, %v1284_v57 }
 0xb15   :  { %v3058_v60 = vpop.eup %3057 }
 0xb16   :  { %v3490_v61 = vadd.f32 %v2598_v58, %v1292_v59  ;;  %v1285_v62 = vmul.f32 %v3058_v60, %v1269_v28 }
 0xb18   :  { %2616 = vmatmul.mubr.msk.f32.vlgmr.msra.gmra.mxu1 %vm74_vm0, %v3490_v61  ;;  %v1293_v63 = vmul.f32 %v2597_v56, %v1285_v62 }
 0xb19   :  { %1408 = vmatprep.mubr.f32.mxu1 %v3087_v3 }
 0xb1a   :  { %v3495_v0 = vadd.f32 %v2598_v58, %v1293_v63 }
 0xb1c   :  { %2617 = vmatmul.mubr.msk.f32.gmra.mxu1 %vm74_vm0, %v3495_v0 }
 0xb1d   :  { %2917 = vmatprep.mubr.msk.f32.mxu1 %vm3088_vm1, %v3087_v3 }
 0xbd8   :  { %v1404_v4 = vpop.f32.mrf.mxu1 }
 0xbd9   :  { %v1405_v5 = vadd.f32 %v1404_v4, %v1325_v2  ;;  %v2625_v4 = vld [vmem:[%s3714_s3 + $0x78] sm:$0xff] }
 0xbda   :  { %v1406_v6 = vpop.f32.mrf.mxu1 }
 0xbdb   :  { %1427 = vrot.lane.b32.xlu1 %v1405_v5, %s3089_s0  ;;  %v3512_v9 = vadd.f32 %v1406_v6, %v1329_v7 }
 0xbdc   :  { %v1410_v18 = vpop.f32.mrf.mxu1 }
 0xbdd   :  { %v1411_v17 = vadd.f32 %v1410_v18, %v1325_v2  ;;  %v2621_v18 = vld [vmem:[%s3714_s3 + $0x58] sm:$0xff] }
 0xbde   :  { %v1412_v21 = vpop.f32.mrf.mxu1 }
 0xbdf   :  { %1504 = vrot.lane.b32.xlu0 %v1411_v17, %s3089_s0  ;;  %v3520_v20 = vadd.f32 %v1412_v21, %v1329_v7 }
 0xc4d   :  { %v1428_v8 = vpop.permute.xlu1 %1427 }
 0xc4e   :  { %2911 = vmatpush3.xpose.msk.msra.mxu0 %vm170_vm2, %v1428_v8 }
 0xc4f   :  { %2920 = vmatprep.subr.mxu0 %v3087_v3 }
 0xc51   :  { %v1505_v10 = vpop.permute.xlu0 %1504  ;;  %2913 = vmatmul.mubr.msk.f32.vlgmr.msra.gmra.mxu0 %vm170_vm2, %v1405_v5 }
 0xc52   :  { %2916 = vmatpush3.xpose.msk.msra.mxu1 %vm170_vm2, %v1505_v10  ;;  %2921 = vmatpush3.msra.mxu0 %v3512_v9 }
 0xc53   :  { %2925 = vmatprep.subr.mxu1 %v3087_v3  ;;  %2922 = vmatprep.mubr.msk.f32.mxu0 %vm3088_vm1, %v3087_v3 }
 0xc54   :  { %2930 = vmatprep.subr.mxu0 %v3087_v3 }
 0xc55   :  { %2918 = vmatmul.mubr.msk.f32.vlgmr.msra.gmra.mxu1 %vm170_vm2, %v1411_v17 }
 0xc56   :  { %2926 = vmatpush3.msra.mxu1 %v3520_v20  ;;  %2927 = vmatprep.mubr.msk.f32.mxu1 %vm3088_vm1, %v3087_v3 }
 0xc57   :  { %2935 = vmatprep.subr.mxu1 %v3087_v3 }
 0xd11   :  { %v1499_v29 = vpop.f32.mrf.mxu0 }
 0xd12   :  { %v1580_v11 = vmul.f32 0.17677669, %v1499_v29  ;;  %v2619_v29 = vld [vmem:[%s3714_s3 + $0x48] sm:$0xff] }
 0xd13   :  { %v2914_v12 = vpop.f32.mrf.mxu0 }
 0xd14   :  { %v1582_v13 = vsel %vm324_vm3, %v1580_v11, -inf  ;;  %v2623_v12 = vld [vmem:[%s3714_s3 + $0x68] sm:$0xff] }
 0xd15   :  { %v1576_v14 = vpop.f32.mrf.mxu1  ;;  %1583 = vmax.xlane.f32.xlu1 %v1582_v13  ;;  %v2622_v13 = vld [vmem:[%s3714_s3 + $0x60] sm:$0xff] }
 0xd16   :  { %v1581_v15 = vmul.f32 0.17677669, %v1576_v14 }
 0xd17   :  { %v2919_v16 = vpop.f32.mrf.mxu1 }
 0xd18   :  { %v1585_v19 = vsel %vm324_vm3, %v1581_v15, -inf }
 0xd19   :  { %1586 = vmax.xlane.f32.xlu0 %v1585_v19 }
 0xd26   :  { %1752 = vrot.lane.b32.xlu1 %v1405_v5, %s3090_s29 }
 0xd9e   :  { %v1584_v22 = vpop.xlane.xlu1 %1583 }
 0xd9f   :  { %v1588_v23 = vsub.f32 %v1580_v11, %v1584_v22  ;;  %v2618_v11 = vld [vmem:[%s3714_s3 + $0x40] sm:$0xff] }
 0xda1   :  { %v1590_v24 = vmul.f32 1.442695, %v1588_v23  ;;  %v2643_v23 = vld [vmem:[%s3715_s4 + $0x1] ss:$0 sm:$0xff] }
 0xda2   :  { %v1587_v25 = vpop.xlane.xlu0 %1586  ;;  %v1753_v34 = vpop.permute.xlu1 %1752 }
 0xda3   :  { %3059 = vpow2.f32 %v1590_v24  ;;  %v1589_v26 = vsub.f32 %v1581_v15, %v1587_v25 }
 0xda5   :  { %v1592_v27 = vmul.f32 1.442695, %v1589_v26 }
 0xda7   :  { %3061 = vpow2.f32 %v1592_v27 }
 0xdb0   :  { %v3060_v28 = vpop.eup %3059 }
 0xdb1   :  { %v1594_v30 = vsel %vm324_vm3, %v3060_v28, 0.0 }
 0xdb2   :  { %1595 = vadd.xlane.f32.xlu1 %v1594_v30 }
 0xdb4   :  { %v3062_v31 = vpop.eup %3061 }
 0xdb5   :  { %v1597_v32 = vsel %vm324_vm3, %v3062_v31, 0.0 }
 0xdb6   :  { %1598 = vadd.xlane.f32.xlu0 %v1597_v32 }
 0xdc3   :  { %1750 = vrot.lane.b32.xlu1 %v1405_v5, %s3091_s30 }
 0xdc7   :  { %1828 = vrot.lane.b32.xlu1 %v1411_v17, %s3091_s30 }
 0xdcc   :  { %1830 = vrot.lane.b32.xlu0 %v1411_v17, %s3090_s29 }
 0xe3b   :  { %v1596_v33 = vpop.xlane.xlu1 %1595 }
 0xe3c   :  { %3063 = vrcp.f32 %v1596_v33 }
 0xe3f   :  { %v1599_v35 = vpop.xlane.xlu0 %1598  ;;  %v1751_v39 = vpop.permute.xlu1 %1750 }
 0xe40   :  { %3065 = vrcp.f32 %v1599_v35 }
 0xe43   :  { %v1831_v41 = vpop.permute.xlu0 %1830  ;;  %v1829_v42 = vpop.permute.xlu1 %1828 }
 0xe49   :  { %v3064_v36 = vpop.eup %3063 }
 0xe4a   :  { %v1602_v37 = vmul.f32 %v3064_v36, %v3060_v28 }
 0xe4c   :  { %2923 = vmatmul.mubr.msk.f32.vlgmr.msra.gmra.mxu0 %vm324_vm3, %v1602_v37 }
 0xe4d   :  { %v3066_v38 = vpop.eup %3065  ;;  %2931 = vmatpush3.xpose.msk.msra.mxu0 %vm170_vm2, %v1753_v34  ;;  %2932 = vmatprep.mubr.msk.f32.mxu0 %vm3088_vm1, %v3087_v3 }
 0xe4e   :  { %v1603_v40 = vmul.f32 %v3066_v38, %v3062_v31  ;;  %2940 = vmatprep.subr.mxu0 %v3087_v3 }
 0xe50   :  { %2928 = vmatmul.mubr.msk.f32.vlgmr.msra.gmra.mxu1 %vm324_vm3, %v1603_v40  ;;  %2933 = vmatmul.mubr.msk.f32.vlgmr.msra.gmra.mxu0 %vm170_vm2, %v1751_v39 }
 0xe51   :  { %2936 = vmatpush3.xpose.msk.msra.mxu1 %vm170_vm2, %v1831_v41  ;;  %2937 = vmatprep.mubr.msk.f32.mxu1 %vm3088_vm1, %v3087_v3 }
 0xe52   :  { %2945 = vmatprep.subr.mxu1 %v3087_v3  ;;  %2942 = vmatprep.mubr.msk.f32.mxu0 %vm3088_vm1, %v3087_v3 }
 0xe54   :  { %2938 = vmatmul.mubr.msk.f32.vlgmr.msra.gmra.mxu1 %vm170_vm2, %v1829_v42 }
 0xe55   :  { %2947 = vmatprep.mubr.msk.f32.mxu1 %vm3088_vm1, %v3087_v3 }
 0xf0c   :  { %v1673_v43 = vpop.f32.mrf.mxu0 }
 0xf0e   :  { %v2924_v44 = vpop.f32.mrf.mxu0 }
 0xf10   :  { %v1746_v45 = vpop.f32.mrf.mxu1  ;;  %v1824_v46 = vpop.f32.mrf.mxu0 }
 0xf11   :  { %v1906_v47 = vmul.f32 0.17677669, %v1824_v46  ;;  %v2653_v46 = vld [vmem:[%s3716_s7 + $0x68] sm:$0xff] }
 0xf12   :  { %v2929_v48 = vpop.f32.mrf.mxu1  ;;  %v2934_v49 = vpop.f32.mrf.mxu0 }
 0xf13   :  { %v1908_v50 = vsel %vm324_vm3, %v1906_v47, -inf  ;;  %v2651_v48 = vld [vmem:[%s3716_s7 + $0x58] sm:$0xff]  ;;  %v2650_v49 = vld [vmem:[%s3716_s7 + $0x50] sm:$0xff] }
 0xf14   :  { %v1902_v51 = vpop.f32.mrf.mxu1  ;;  %1909 = vmax.xlane.f32.xlu0 %v1908_v50  ;;  %v2649_v50 = vld [vmem:[%s3716_s7 + $0x48] sm:$0xff] }
 0xf15   :  { %v1907_v52 = vmul.f32 0.17677669, %v1902_v51  ;;  %v2648_v51 = vld [vmem:[%s3716_s7 + $0x40] sm:$0xff] }
 0xf16   :  { %v2939_v53 = vpop.f32.mrf.mxu1 }
 0xf17   :  { %v1911_v54 = vsel %vm324_vm3, %v1907_v52, -inf }
 0xf18   :  { %1912 = vmax.xlane.f32.xlu1 %v1911_v54 }
 0xf29   :  { %1931 = vrot.lane.b32.xlu1 %v3512_v9, %s3091_s30  ;;  %v2624_v9 = vld [vmem:[%s3714_s3 + $0x70] sm:$0xff] }
 0xf9d   :  { %v1910_v3 = vpop.xlane.xlu0 %1909 }
 0xf9e   :  { %v1914_v55 = vsub.f32 %v1906_v47, %v1910_v3  ;;  %v2652_v47 = vld [vmem:[%s3716_s7 + $0x60] sm:$0xff] }
 0xfa0   :  { %v1916_v56 = vmul.f32 1.442695, %v1914_v55 }
 0xfa1   :  { %v1913_v57 = vpop.xlane.xlu1 %1912 }
 0xfa2   :  { %3067 = vpow2.f32 %v1916_v56  ;;  %v1915_v58 = vsub.f32 %v1907_v52, %v1913_v57 }
 0xfa4   :  { %v1918_v59 = vmul.f32 1.442695, %v1915_v58  ;;  %v2646_v58 = vld [vmem:[%s3717_s5 + $0x1] ss:$0 sm:$0xff] }
 0xfa5   :  { %v1932_v60 = vpop.permute.xlu1 %1931 }
 0xfa6   :  { %3069 = vpow2.f32 %v1918_v59  ;;  %2941 = vmatpush3.msra.mxu0 %v1932_v60 }
 0xfa7   :  { %2950 = vmatprep.subr.mxu0 %v2625_v4 }
 0xfaf   :  { %v3068_v62 = vpop.eup %3067 }
 0xfb0   :  { %v1920_v63 = vsel %vm324_vm3, %v3068_v62, 0.0 }
 0xfb1   :  { %1921 = vadd.xlane.f32.xlu0 %v1920_v63 }
 0xfb3   :  { %v3070_v1 = vpop.eup %3069 }
 0xfb4   :  { %v1923_v2 = vsel %vm324_vm3, %v3070_v1, 0.0 }
 0xfb5   :  { %1924 = vadd.xlane.f32.xlu0 %v1923_v2 }
 0xfcb   :  { %2008 = vrot.lane.b32.xlu0 %v3520_v20, %s3091_s30  ;;  %v2620_v20 = vld [vmem:[%s3714_s3 + $0x50] sm:$0xff] }
0x103a   :  { %v1922_v5 = vpop.xlane.xlu0 %1921 }
0x103b   :  { %3071 = vrcp.f32 %v1922_v5 }
0x103e   :  { %v1925_v6 = vpop.xlane.xlu0 %1924 }
0x103f   :  { %3073 = vrcp.f32 %v1925_v6  ;;  %v2675_v6 = vld [vmem:[%s3719_s9 + $0xf8] sm:$0xff] }
0x1042   :  { %v2009_v17 = vpop.permute.xlu0 %2008 }
0x1043   :  { %2946 = vmatpush3.msra.mxu1 %v2009_v17  ;;  %v2673_v17 = vld [vmem:[%s3719_s9 + $0xe8] sm:$0xff] }
0x1044   :  { %2961 = vmatprep.subr.mxu1 %v2621_v18 }
0x1048   :  { %v3072_v7 = vpop.eup %3071 }
0x1049   :  { %v1928_v8 = vmul.f32 %v3072_v7, %v3068_v62  ;;  %v2672_v7 = vld [vmem:[%s3719_s9 + $0xe0] sm:$0xff] }
0x104b   :  { %2943 = vmatmul.mubr.msk.f32.vlgmr.msra.gmra.mxu0 %vm324_vm3, %v1928_v8  ;;  %v2671_v8 = vld [vmem:[%s3719_s9 + $0xd8] sm:$0xff] }
0x104c   :  { %v3074_v21 = vpop.eup %3073  ;;  %2951 = vmatpush3.msra.mxu0 %v2625_v4 }
0x104d   :  { %v1929_v10 = vmul.f32 %v3074_v21, %v3070_v1  ;;  %2952 = vmatprep.subr.mxu0 %v2624_v9  ;;  %v2647_v1 = vld [vmem:[%s3718_s6 + $0x1] ss:$0 sm:$0xff]  ;;  %v2669_v21 = vld [vmem:[%s3719_s9 + $0xc8] sm:$0xff] }
0x104e   :  { %2953 = vmatpush3.msra.mxu0 %v2624_v9  ;;  %v2670_v9 = vld [vmem:[%s3719_s9 + $0xd0] sm:$0xff] }
0x104f   :  { %2948 = vmatmul.mubr.msk.f32.vlgmr.msra.gmra.mxu1 %vm324_vm3, %v1929_v10  ;;  %2954 = vmatprep.subr.mxu0 %v2623_v12  ;;  %v2668_v10 = vld [vmem:[%s3719_s9 + $0xc0] sm:$0xff] }
0x1050   :  { %2962 = vmatpush3.msra.mxu1 %v2621_v18  ;;  %2969 = vmatprep.mubr.msk.f32.mxu1 %vm170_vm2, %v1673_v43  ;;  %v2674_v18 = vld [vmem:[%s3719_s9 + $0xf0] sm:$0xff] }
0x1051   :  { %2963 = vmatprep.subr.mxu1 %v2620_v20  ;;  %2955 = vmatpush3.msra.mxu0 %v2623_v12  ;;  %v2664_v12 = vld [vmem:[%s3719_s9 + $0xa0] sm:$0xff] }
0x1052   :  { %2964 = vmatpush3.msra.mxu1 %v2620_v20  ;;  %2956 = vmatprep.subr.mxu0 %v2622_v13  ;;  %v2667_v20 = vld [vmem:[%s3719_s9 + $0xb8] sm:$0xff] }
0x1053   :  { %2965 = vmatprep.subr.mxu1 %v2619_v29  ;;  %2957 = vmatpush3.msra.mxu0 %v2622_v13  ;;  %v2663_v13 = vld [vmem:[%s3719_s9 + $0x98] sm:$0xff] }
0x1054   :  { %2966 = vmatpush3.msra.mxu1 %v2619_v29  ;;  %v2666_v29 = vld [vmem:[%s3719_s9 + $0xb0] sm:$0xff] }
0x1055   :  { %2967 = vmatprep.subr.mxu1 %v2618_v11 }
0x1056   :  { %2968 = vmatpush3.msra.mxu1 %v2618_v11  ;;  %v2665_v11 = vld [vmem:[%s3719_s9 + $0xa8] sm:$0xff] }
0x1057   :  { %2970 = vmatmul.mubr.msk.f32.vlgmr.msra.gmra.mxu1 %vm170_vm2, %v1746_v45  ;;  %v2654_v45 = vld [vmem:[%s3716_s7 + $0x70] sm:$0xff]  ;;  %2991 = vmatprep.subr.mxu1 %v2675_v6 }
0x1058   :  { %2992 = vmatpush3.msra.mxu1 %v2675_v6 }
0x1059   :  { %2993 = vmatprep.subr.mxu1 %v2674_v18 }
0x105a   :  { %2994 = vmatpush3.msra.mxu1 %v2674_v18  ;;  %v2680_v18 = vld [vmem:[%s3722_s11 + $0x1] ss:$0 sm:$0xff] }
0x105b   :  { %2995 = vmatprep.subr.mxu1 %v2673_v17 }
0x105c   :  { %2996 = vmatpush3.msra.mxu1 %v2673_v17 }
0x105d   :  { %2997 = vmatprep.subr.mxu1 %v2672_v7 }
0x105e   :  { %2998 = vmatpush3.msra.mxu1 %v2672_v7 }
0x105f   :  { %2999 = vmatprep.subr.mxu1 %v2671_v8 }
0x1060   :  { %3000 = vmatpush3.msra.mxu1 %v2671_v8  ;;  %v2681_v8 = vld [vmem:[%s3723_s12 + $0x1] ss:$0 sm:$0xff] }
0x1061   :  { %3001 = vmatprep.subr.mxu1 %v2670_v9 }
0x1062   :  { %3002 = vmatpush3.msra.mxu1 %v2670_v9 }
0x1063   :  { %3003 = vmatprep.subr.mxu1 %v2669_v21 }
0x1064   :  { %3004 = vmatpush3.msra.mxu1 %v2669_v21 }
0x1065   :  { %3005 = vmatprep.subr.mxu1 %v2668_v10 }
0x1066   :  { %3006 = vmatpush3.msra.mxu1 %v2668_v10 }
0x1067   :  { %3007 = vmatprep.subr.mxu1 %v2667_v20 }
0x1068   :  { %3008 = vmatpush3.msra.mxu1 %v2667_v20 }
0x1069   :  { %3009 = vmatprep.subr.mxu1 %v2666_v29 }
0x106a   :  { %3010 = vmatpush3.msra.mxu1 %v2666_v29 }
0x106b   :  { %3011 = vmatprep.subr.mxu1 %v2665_v11 }
0x106c   :  { %3012 = vmatpush3.msra.mxu1 %v2665_v11 }
0x106d   :  { %3013 = vmatprep.subr.mxu1 %v2664_v12 }
0x106e   :  { %3014 = vmatpush3.msra.mxu1 %v2664_v12 }
0x106f   :  { %3015 = vmatprep.subr.mxu1 %v2663_v13 }
0x1070   :  { %3016 = vmatpush3.msra.mxu1 %v2663_v13 }
0x110b   :  { %v2003_v14 = vpop.f32.mrf.mxu0 }
0x110c   :  { %2958 = vmatprep.mubr.msk.f32.mxu0 %vm170_vm2, %v2003_v14  ;;  %v2662_v14 = vld [vmem:[%s3719_s9 + $0x90] sm:$0xff] }
0x110d   :  { %v2944_v15 = vpop.f32.mrf.mxu0  ;;  %3017 = vmatprep.subr.mxu1 %v2662_v14 }
0x110e   :  { %v2661_v15 = vld [vmem:[%s3719_s9 + $0x88] sm:$0xff]  ;;  %3018 = vmatpush3.msra.mxu1 %v2662_v14 }
0x110f   :  { %v2080_v16 = vpop.f32.mrf.mxu1  ;;  %3019 = vmatprep.subr.mxu1 %v2661_v15 }
0x1110   :  { %2959 = vmatmul.mubr.msk.f32.vlgmr.msra.gmra.mxu0 %vm170_vm2, %v2080_v16  ;;  %v2660_v16 = vld [vmem:[%s3719_s9 + $0x80] sm:$0xff]  ;;  %3020 = vmatpush3.msra.mxu1 %v2661_v15 }
0x1111   :  { %v2949_v19 = vpop.f32.mrf.mxu1  ;;  %3021 = vmatprep.subr.mxu1 %v2660_v16 }
0x1112   :  { %3022 = vmatpush3.msra.mxu1 %v2660_v16  ;;  %v2657_v19 = vld [vmem:[%s3720_s8 + $0x1] ss:$0 sm:$0xff] }
0x1117   :  { %v2971_v22 = vpop.f32.mrf.mxu1 }
0x1119   :  { %v2237_v26 = vpop.f32.mrf.mxu1 }
0x11d0   :  { %v2960_v24 = vpop.f32.mrf.mxu0 }
0x11d1   :  { %v2243_v25 = vadd.f32 %v2971_v22, %v2960_v24 }
0x11d2   :  { %v2156_v27 = vpop.f32.mrf.mxu0 }
0x11d3   :  { %v2253_v28 = vadd.f32 %v2643_v23, %v2243_v25  ;;  %v2238_v30 = vadd.f32 %v2237_v26, %v2156_v27 }
0x11d5   :  { %v2252_v31 = vadd.f32 %v2643_v23, %v2238_v30  ;;  %v2255_v32 = vadd.f32 %v2253_v28, %v3495_v0 }
0x11d7   :  { %v2263_v34 = vsel %vm74_vm0, %v2255_v32, 0.0  ;;  %v2254_v33 = vadd.f32 %v2252_v31, %v3490_v61  ;;  %v2655_v61 = vld [vmem:[%s3716_s7 + $0x78] sm:$0xff] }
0x11d8   :  { %2264 = vadd.xlane.f32.xlu0 %v2263_v34  ;;  %2972 = vmatprep.subr.mxu0 %v2655_v61 }
0x11d9   :  { %v2260_v35 = vsel %vm74_vm0, %v2254_v33, 0.0  ;;  %2973 = vmatpush3.msra.mxu0 %v2655_v61 }
0x11da   :  { %2261 = vadd.xlane.f32.xlu1 %v2260_v35  ;;  %2974 = vmatprep.subr.mxu0 %v2654_v45 }
0x11db   :  { %2975 = vmatpush3.msra.mxu0 %v2654_v45 }
0x11dc   :  { %2976 = vmatprep.subr.mxu0 %v2653_v46 }
0x11dd   :  { %2977 = vmatpush3.msra.mxu0 %v2653_v46 }
0x11de   :  { %2978 = vmatprep.subr.mxu0 %v2652_v47 }
0x11df   :  { %2979 = vmatpush3.msra.mxu0 %v2652_v47 }
0x11e0   :  { %2980 = vmatprep.subr.mxu0 %v2651_v48 }
0x11e1   :  { %2981 = vmatpush3.msra.mxu0 %v2651_v48 }
0x11e2   :  { %2982 = vmatprep.subr.mxu0 %v2650_v49 }
0x11e3   :  { %2983 = vmatpush3.msra.mxu0 %v2650_v49 }
0x11e4   :  { %2984 = vmatprep.subr.mxu0 %v2649_v50 }
0x11e5   :  { %2985 = vmatpush3.msra.mxu0 %v2649_v50 }
0x11e6   :  { %2986 = vmatprep.subr.mxu0 %v2648_v51 }
0x11e7   :  { %2987 = vmatpush3.msra.mxu0 %v2648_v51 }
0x1261   :  { %v2265_v36 = vpop.xlane.xlu0 %2264 }
0x1262   :  { %v2267_v37 = vmul.f32 0.015625, %v2265_v36 }
0x1263   :  { %v2262_v38 = vpop.xlane.xlu1 %2261 }
0x1264   :  { %v2269_v39 = vsub.f32 %v2255_v32, %v2267_v37  ;;  %v2266_v40 = vmul.f32 0.015625, %v2262_v38 }
0x1266   :  { %v2268_v41 = vsub.f32 %v2254_v33, %v2266_v40  ;;  %v2271_v42 = vmul.f32 %v2269_v39, %v2269_v39 }
0x1268   :  { %v2275_v43 = vsel %vm74_vm0, %v2271_v42, 0.0  ;;  %v2270_v44 = vmul.f32 %v2268_v41, %v2268_v41 }
0x1269   :  { %2276 = vadd.xlane.f32.xlu0 %v2275_v43 }
0x126a   :  { %v2272_v0 = vsel %vm74_vm0, %v2270_v44, 0.0 }
0x126b   :  { %2273 = vadd.xlane.f32.xlu1 %v2272_v0  ;;  %v2677_v0 = vld [vmem:[%s3721_s10 + $0x1] ss:$0 sm:$0xff] }
0x12f2   :  { %v2277_v52 = vpop.xlane.xlu0 %2276 }
0x12f3   :  { %v2279_v53 = vmul.f32 0.015625, %v2277_v52 }
0x12f4   :  { %v2274_v54 = vpop.xlane.xlu1 %2273 }
0x12f5   :  { %v2281_v3 = vadd.f32 1e-05, %v2279_v53  ;;  %v2278_v55 = vmul.f32 0.015625, %v2274_v54 }
0x12f7   :  { %3075 = vrsqrt.f32 %v2281_v3  ;;  %v2280_v56 = vadd.f32 1e-05, %v2278_v55 }
0x12f9   :  { %3077 = vrsqrt.f32 %v2280_v56 }
0x1304   :  { %v3076_v57 = vpop.eup %3075 }
0x1305   :  { %v2285_v59 = vmul.f32 %v3076_v57, %v2269_v39 }
0x1306   :  { %v3078_v60 = vpop.eup %3077 }
0x1307   :  { %v2284_v62 = vmul.f32 %v3078_v60, %v2268_v41  ;;  %v2293_v63 = vmul.f32 %v2646_v58, %v2285_v59 }
0x1309   :  { %v2292_v2 = vmul.f32 %v2646_v58, %v2284_v62  ;;  %v3631_v5 = vadd.f32 %v2647_v1, %v2293_v63 }
0x130b   :  { %v3629_v4 = vadd.f32 %v2647_v1, %v2292_v2 }
0x130d   :  { %2988 = vmatprep.mubr.msk.f32.mxu0 %vm74_vm0, %v3629_v4 }
0x130e   :  { %2989 = vmatmul.mubr.msk.f32.vlgmr.msra.gmra.mxu0 %vm74_vm0, %v3631_v5 }
0x13ce   :  { %v2990_v22 = vpop.f32.mrf.mxu0 }
0x13cf   :  { %v2397_v23 = vadd.f32 %v2990_v22, %v2657_v19 }
0x13d0   :  { %v2391_v24 = vpop.f32.mrf.mxu0 }
0x13d1   :  { %v2401_v25 = vmul.f32 %v2397_v23, %v2397_v23  ;;  %v2392_v26 = vadd.f32 %v2657_v19, %v2391_v24 }
0x13d3   :  { %v2403_v27 = vmul.f32 %v2401_v25, %v2397_v23  ;;  %v2400_v28 = vmul.f32 %v2392_v26, %v2392_v26 }
0x13d5   :  { %v2405_v30 = vmul.f32 0.044715, %v2403_v27  ;;  %v2402_v31 = vmul.f32 %v2400_v28, %v2392_v26 }
0x13d7   :  { %v2407_v32 = vadd.f32 %v2405_v30, %v2397_v23  ;;  %v2404_v34 = vmul.f32 0.044715, %v2402_v31 }
0x13d9   :  { %v2409_v33 = vmul.f32 0.7978846, %v2407_v32  ;;  %v2406_v35 = vadd.f32 %v2404_v34, %v2392_v26 }
0x13db   :  { %3079 = vtanh.f32 %v2409_v33  ;;  %v2408_v36 = vmul.f32 0.7978846, %v2406_v35 }
0x13dd   :  { %3081 = vtanh.f32 %v2408_v36 }
0x13e8   :  { %v3080_v37 = vpop.eup %3079 }
0x13e9   :  { %v2413_v38 = vadd.f32 1.0, %v3080_v37 }
0x13ea   :  { %v3082_v39 = vpop.eup %3081 }
0x13eb   :  { %v2412_v40 = vadd.f32 1.0, %v3082_v39  ;;  %v2415_v41 = vmul.f32 0.5, %v2413_v38 }
0x13ed   :  { %v2414_v42 = vmul.f32 0.5, %v2412_v40  ;;  %v2417_v44 = vmul.f32 %v2415_v41, %v2397_v23 }
0x13ef   :  { %v2416_v43 = vmul.f32 %v2414_v42, %v2392_v26 }
0x13f1   :  { %3023 = vmatprep.mubr.f32.mxu1 %v2416_v43 }
0x13f2   :  { %3024 = vmatmul.mubr.f32.vlgmr.msra.gmra.mxu1 %v2417_v44 }
0x14b2   :  { %v3025_v61 = vpop.f32.mrf.mxu1 }
0x14b3   :  { %v2515_v45 = vadd.f32 %v3025_v61, %v2677_v0 }
0x14b4   :  { %v2509_v46 = vpop.f32.mrf.mxu1 }
0x14b5   :  { %v2510_v47 = vadd.f32 %v2677_v0, %v2509_v46  ;;  %v2519_v48 = vadd.f32 %v2515_v45, %v3631_v5 }
0x14b7   :  { %v2527_v49 = vsel %vm74_vm0, %v2519_v48, 0.0  ;;  %v2518_v50 = vadd.f32 %v2510_v47, %v3629_v4 }
0x14b8   :  { %2528 = vadd.xlane.f32.xlu0 %v2527_v49 }
0x14b9   :  { %v2524_v51 = vsel %vm74_vm0, %v2518_v50, 0.0 }
0x14ba   :  { %2525 = vadd.xlane.f32.xlu1 %v2524_v51 }
0x1541   :  { %v2529_v52 = vpop.xlane.xlu0 %2528 }
0x1542   :  { %v2531_v53 = vmul.f32 0.015625, %v2529_v52 }
0x1543   :  { %v2526_v54 = vpop.xlane.xlu1 %2525 }
0x1544   :  { %v2533_v3 = vsub.f32 %v2519_v48, %v2531_v53  ;;  %v2530_v55 = vmul.f32 0.015625, %v2526_v54 }
0x1546   :  { %v2532_v56 = vsub.f32 %v2518_v50, %v2530_v55  ;;  %v2535_v57 = vmul.f32 %v2533_v3, %v2533_v3 }
0x1548   :  { %v2539_v58 = vsel %vm74_vm0, %v2535_v57, 0.0  ;;  %v2534_v59 = vmul.f32 %v2532_v56, %v2532_v56 }
0x1549   :  { %2540 = vadd.xlane.f32.xlu0 %v2539_v58 }
0x154a   :  { %v2536_v60 = vsel %vm74_vm0, %v2534_v59, 0.0 }
0x154b   :  { %2537 = vadd.xlane.f32.xlu1 %v2536_v60 }
0x15d2   :  { %v2541_v62 = vpop.xlane.xlu0 %2540 }
0x15d3   :  { %v2543_v63 = vmul.f32 0.015625, %v2541_v62 }
0x15d4   :  { %v2538_v1 = vpop.xlane.xlu1 %2537 }
0x15d5   :  { %v2545_v2 = vadd.f32 1e-05, %v2543_v63  ;;  %v2542_v4 = vmul.f32 0.015625, %v2538_v1 }
0x15d7   :  { %3083 = vrsqrt.f32 %v2545_v2  ;;  %v2544_v5 = vadd.f32 1e-05, %v2542_v4 }
0x15d9   :  { %3085 = vrsqrt.f32 %v2544_v5 }
0x15e4   :  { %v3084_v6 = vpop.eup %3083 }
0x15e5   :  { %v2549_v17 = vmul.f32 %v3084_v6, %v2533_v3 }
0x15e6   :  { %v3086_v7 = vpop.eup %3085 }
0x15e7   :  { %v2557_v9 = vmul.f32 %v2680_v18, %v2549_v17  ;;  %v2548_v21 = vmul.f32 %v3086_v7, %v2532_v56 }
0x15e9   :  { %v2565_v10 = vadd.f32 %v2681_v8, %v2557_v9  ;;  %v2556_v20 = vmul.f32 %v2680_v18, %v2548_v21 }
0x15eb   :  { %2567 = vst.msk [vmem:[%s3724_s13 + $0x8] sm:$0xff] %vm74_vm0, %v2565_v10  ;;  %v2564_v29 = vadd.f32 %v2681_v8, %v2556_v20 }
0x15ed   :  { %2566 = vst.msk [vmem:[%s3724_s13] sm:$0xff] %vm74_vm0, %v2564_v29 }

// kernel: closed_call.11
= control target key start
LH: loop header
LB: loop body
LE: loop exit
PB: predicated region body
PF: predicated region fallthrough
CT: control target
= control target key end

     0   :  { %v5922_v3 = vmov 0.0   ;;  %vm118_vm0 = vcmask 523264   ;;  %v84_v19 = vlaneseq  ;;  %vm5923_vm1 = vmmov 0   ;;  %s7080_s29 = smov 96   ;;  %s7042_s3 = inlined_call_operand.vmem [shape: f32[2,64,192], index: 3, kind: input, shape index: {}]   ;;  %s7043_s1 = inlined_call_operand.vmem [shape: f32[2,8,64], index: 1, kind: input, shape index: {}]   ;;  %s7044_s4 = inlined_call_operand.vmem [shape: f32[2,1,192], index: 4, kind: input, shape index: {}]   ;;  %s7045_s5 = inlined_call_operand.vmem [shape: f32[2,64,64], index: 5, kind: input, shape index: {}]   ;;  %s7046_s6 = inlined_call_operand.vmem [shape: f32[2,1,64], index: 6, kind: input, shape index: {}]   ;;  %s7047_s11 = inlined_call_operand.vmem [shape: f32[2,64,128], index: 11, kind: input, shape index: {}]   ;;  %s7048_s9 = inlined_call_operand.vmem [shape: f32[2,64,64], index: 9, kind: input, shape index: {}]   ;;  %s7049_s2 = inlined_call_operand.vmem [shape: f32[2,8,64], index: 2, kind: input, shape index: {}]   ;;  %s7050_s7 = inlined_call_operand.vmem [shape: f32[2,1,64], index: 7, kind: input, shape index: {}]   ;;  %s7051_s8 = inlined_call_operand.vmem [shape: f32[2,1,64], index: 8, kind: input, shape index: {}]   ;;  %s7052_s12 = inlined_call_operand.vmem [shape: f32[2,1,128], index: 12, kind: input, shape index: {}]   ;;  %s7053_s10 = inlined_call_operand.vmem [shape: f32[2,1,64], index: 10, kind: input, shape index: {}]   ;;  %s7054_s13 = inlined_call_operand.vmem [shape: f32[2,64,64], index: 13, kind: input, shape index: {}]   ;;  %s7055_s14 = inlined_call_operand.vmem [shape: f32[2,1,64], index: 14, kind: input, shape index: {}]   ;;  %s7056_s17 = inlined_call_operand.vmem [shape: f32[2,64,128], index: 17, kind: input, shape index: {}]   ;;  %s7057_s15 = inlined_call_operand.vmem [shape: f32[2,1,64], index: 15, kind: input, shape index: {}]   ;;  %s7058_s16 = inlined_call_operand.vmem [shape: f32[2,1,64], index: 16, kind: input, shape index: {}]   ;;  %s7059_s19 = inlined_call_operand.vmem [shape: f32[2,128,64], index: 19, kind: input, shape index: {}]   ;;  %s7060_s18 = inlined_call_operand.vmem [shape: f32[2,1,128], index: 18, kind: input, shape index: {}]   ;;  %s7061_s20 = inlined_call_operand.vmem [shape: f32[2,1,64], index: 20, kind: input, shape index: {}]   ;;  %s7062_s21 = inlined_call_operand.vmem [shape: f32[2,1,64], index: 21, kind: input, shape index: {}]   ;;  %s7063_s22 = inlined_call_operand.vmem [shape: f32[2,1,64], index: 22, kind: input, shape index: {}]   ;;  %s7064_s0 = inlined_call_operand.<no memory space> [shape: s32[1], index: 0, kind: input, shape index: {}]   ;;  %s7065_s23 = inlined_call_operand.vmem [shape: f32[64,128], index: 23, kind: input, shape index: {}]   ;;  %s7066_s24 = inlined_call_operand.vmem [shape: f32[1,128], index: 24, kind: input, shape index: {}]   ;;  %s7067_s25 = inlined_call_operand.vmem [shape: f32[2,128], index: 25, kind: output, shape index: {}]  }
   0x1   :  { %7088 = sst [smem:[#allocation4_spill]] %s7042_s3  ;;  %189 = vmatprep.mubr.f32.mxu0 %v5922_v3  ;;  %5360 = vmatprep.subr.mxu1 %v5922_v3  ;;  %vm214_vm2 = vcmask 261120   ;;  %v5925_v36 = vmov -1e+09   ;;  %vm370_vm4 = vcmask 64512   ;;  %s7078_s3 = smov 32  }
   0x2   :  { %7089 = sst [smem:[#allocation5_spill]] %s7043_s1  ;;  %v6124_v20 = vshrl.u32 %v84_v19, 7  ;;  %5362 = vmatprep.mubr.msk.f32.mxu1 %vm5923_vm1, %v5922_v3  ;;  %v6158_v34 = vand.u32 127, %v84_v19  ;;  %vm4780_vm6 = vcmask 130048  }
   0x3   :  { %7090 = sst [smem:[#allocation6_spill]] %s7044_s4 }
   0x4   :  { %7091 = sst [smem:[#allocation7_spill]] %s7045_s5  ;;  %v110_v21 = vsub.s32 0, %v6124_v20  ;;  %v114_v29 = vsub.s32 1, %v6124_v20  ;;  %vm88_vm3 = vcmp.ge.s32.totalorder %v6124_v20, %v6158_v34  ;;  %s7116_s5 = smov 96  }
   0x5   :  { %7092 = sst [smem:[#allocation8_spill]] %s7046_s6  ;;  %v6162_v37 = vsel %vm88_vm3, 0.0, %v5925_v36 }
   0x6   :  { %7093 = sst [smem:[#allocation9_spill]] %s7047_s11  ;;  %s7082_s11 = smov 64  }
   0x7   :  { %7094 = sst [smem:[#allocation10_spill]] %s7048_s9 }
   0x8   :  { %7095 = sst [smem:[#allocation11_spill]] %s7049_s2 }
   0x9   :  { %7096 = sst [smem:[#allocation12_spill]] %s7050_s7 }
   0xa   :  { %7097 = sst [smem:[#allocation13_spill]] %s7051_s8 }
   0xb   :  { %7098 = sst [smem:[#allocation14_spill]] %s7055_s14 }
   0xc   :  { %7099 = sst [smem:[#allocation15_spill]] %s7060_s18 }
   0xd   :  { %7100 = sst [smem:[#allocation16_spill]] %s7061_s20 }
   0xe   :  { %7101 = sst [smem:[#allocation17_spill]] %s7064_s0 }
   0xf   :  { %7102 = sst [smem:[#allocation18_spill]] %s7065_s23 }
  0x10   :  { %7103 = sst [smem:[#allocation19_spill]] %s7066_s24 }
  0x11   :  { %7104 = sst [smem:[#allocation20_spill]] %s7067_s25  ;;  %s7115_s25 = smov 64  }
  0x12   :  { %s7105_s9 = sld [smem:[#allocation4_spill]] }
  0x13   :  { %s7106_s1 = sld [smem:[#allocation5_spill]] }
  0x14   :  { %s7107_s8 = sld [smem:[#allocation6_spill]] }
  0x15   :  { %s7108_s2 = sld [smem:[#allocation7_spill]] }
  0x16   :  { %s7109_s4 = sld [smem:[#allocation8_spill]] }
  0x17   :  { %s7110_s26 = sld [smem:[#allocation9_spill]] }
  0x18   :  { %v105_v0 = vld [vmem:[%s7105_s9 + $0x78] sm:$0xff]  ;;  %v104_v1 = vld [vmem:[%s7105_s9 + $0x70] sm:$0xff]  ;;  %v103_v2 = vld [vmem:[%s7105_s9 + $0x68] sm:$0xff]  ;;  %s7112_s6 = sld [smem:[#allocation11_spill]] }
  0x19   :  { %141 = vmatprep.subr.mxu0 %v105_v0  ;;  %v102_v4 = vld [vmem:[%s7105_s9 + $0x60] sm:$0xff]  ;;  %v101_v5 = vld [vmem:[%s7105_s9 + $0x58] sm:$0xff]  ;;  %v100_v6 = vld [vmem:[%s7105_s9 + $0x50] sm:$0xff]  ;;  %s7113_s30 = sld [smem:[#allocation12_spill]] }
  0x1a   :  { %142 = vmatpush1.msra.mxu0 %v104_v1  ;;  %v99_v7 = vld [vmem:[%s7105_s9 + $0x48] sm:$0xff]  ;;  %v98_v8 = vld [vmem:[%s7105_s9 + $0x40] sm:$0xff]  ;;  %v97_v9 = vld [vmem:[%s7105_s9 + $0x38] sm:$0xff]  ;;  %s7114_s7 = sld [smem:[#allocation13_spill]] }
  0x1b   :  { %143 = vmatprep.subr.mxu0 %v103_v2  ;;  %v96_v10 = vld [vmem:[%s7105_s9 + $0x30] sm:$0xff]  ;;  %v95_v11 = vld [vmem:[%s7105_s9 + $0x28] sm:$0xff]  ;;  %v94_v12 = vld [vmem:[%s7105_s9 + $0x20] sm:$0xff] }
  0x1c   :  { %144 = vmatpush1.msra.mxu0 %v102_v4  ;;  %v93_v13 = vld [vmem:[%s7105_s9 + $0x18] sm:$0xff]  ;;  %v92_v14 = vld [vmem:[%s7105_s9 + $0x10] sm:$0xff]  ;;  %v91_v15 = vld [vmem:[%s7105_s9 + $0x8] sm:$0xff] }
  0x1d   :  { %145 = vmatprep.subr.mxu0 %v101_v5  ;;  %v90_v16 = vld [vmem:[%s7105_s9] sm:$0xff]  ;;  %v6120_v18 = vld [vmem:[%s7106_s1 + $0x8] sm:$0xff] }
  0x1e   :  { %146 = vmatpush1.msra.mxu0 %v100_v6  ;;  %v6111_v17 = vld [vmem:[%s7106_s1] sm:$0xff]  ;;  %s7117_s1 = smov 32  }
  0x1f   :  { %147 = vmatprep.subr.mxu0 %v99_v7  ;;  %v106_v22 = vld [vmem:[%s7107_s8] sm:$0x3] }
  0x20   :  { %148 = vmatpush1.msra.mxu0 %v98_v8  ;;  %v111_v23 = vrot.slane %v106_v22, %v110_v21  ;;  %v6143_v31 = vrot.slane %v106_v22, %v114_v29 }
  0x21   :  { %149 = vmatprep.subr.mxu0 %v97_v9 }
  0x22   :  { %150 = vmatpush1.msra.mxu0 %v96_v10 }
  0x23   :  { %151 = vmatprep.subr.mxu0 %v95_v11 }
  0x24   :  { %152 = vmatpush1.msra.mxu0 %v94_v12 }
  0x25   :  { %153 = vmatprep.subr.mxu0 %v93_v13 }
  0x26   :  { %154 = vmatpush1.msra.mxu0 %v92_v14 }
  0x27   :  { %155 = vmatprep.subr.mxu0 %v91_v15 }
  0x28   :  { %156 = vmatpush1.msra.mxu0 %v90_v16 }
  0x29   :  { %4947 = vmatmul.mubr.msk.f32.vlgmr.msra.gmra.mxu0 %vm118_vm0, %v6111_v17  ;;  %5385 = vmatprep.subr.mxu0 %v5922_v3 }
  0x2a   :  { %195 = vmatprep.mubr.f32.mxu0 %v5922_v3 }
  0x2d   :  { %4948 = vmatmul.mubr.msk.f32.gmra.mxu0 %vm118_vm0, %v6120_v18 }
  0x2e   :  { %5387 = vmatprep.mubr.msk.f32.mxu0 %vm5923_vm1, %v5922_v3 }
  0xe9   :  { %v191_v24 = vpop.f32.mrf.mxu0 }
  0xea   :  { %v192_v25 = vadd.f32 %v191_v24, %v111_v23 }
  0xeb   :  { %v193_v26 = vpop.f32.mrf.mxu0 }
  0xec   :  { %212 = vrot.lane.b32.xlu0 %v192_v25, %s7082_s11  ;;  %v6151_v33 = vadd.f32 %v193_v26, %v6143_v31 }
  0xed   :  { %v197_v27 = vpop.f32.mrf.mxu0 }
  0xee   :  { %v198_v28 = vadd.f32 %v197_v27, %v111_v23 }
  0xef   :  { %v199_v63 = vpop.f32.mrf.mxu0 }
  0xf0   :  { %290 = vrot.lane.b32.xlu0 %v198_v28, %s7082_s11  ;;  %v200_v2 = vadd.f32 %v199_v63, %v6143_v31 }
 0x15e   :  { %v213_v30 = vpop.permute.xlu0 %212 }
 0x15f   :  { %5361 = vmatpush3.xpose.msk.msra.mxu1 %vm214_vm2, %v213_v30 }
 0x160   :  { %5365 = vmatprep.subr.mxu1 %v5922_v3 }
 0x162   :  { %5363 = vmatmul.mubr.msk.f32.vlgmr.msra.gmra.mxu1 %vm214_vm2, %v192_v25  ;;  %v291_v32 = vpop.permute.xlu0 %290 }
 0x163   :  { %5366 = vmatpush3.xpose.msk.msra.mxu1 %vm214_vm2, %v291_v32  ;;  %5367 = vmatprep.mubr.msk.f32.mxu1 %vm5923_vm1, %v5922_v3 }
 0x164   :  { %5370 = vmatprep.subr.mxu1 %v5922_v3 }
 0x166   :  { %5368 = vmatmul.mubr.msk.f32.vlgmr.msra.gmra.mxu1 %vm214_vm2, %v198_v28 }
 0x167   :  { %5371 = vmatpush3.msra.mxu1 %v6151_v33  ;;  %5372 = vmatprep.mubr.msk.f32.mxu1 %vm5923_vm1, %v5922_v3 }
 0x168   :  { %5375 = vmatprep.subr.mxu1 %v5922_v3 }
 0x222   :  { %v285_v35 = vpop.f32.mrf.mxu1 }
 0x223   :  { %v366_v38 = vmul.f32 0.17677669, %v285_v35 }
 0x224   :  { %v5364_v39 = vpop.f32.mrf.mxu1 }
 0x225   :  { %v368_v40 = vadd.f32 %v366_v38, %v6162_v37 }
 0x226   :  { %v362_v41 = vpop.f32.mrf.mxu1 }
 0x227   :  { %v367_v42 = vmul.f32 0.17677669, %v362_v41  ;;  %v371_v43 = vsel %vm370_vm4, %v368_v40, -inf }
 0x228   :  { %372 = vmax.xlane.f32.xlu1 %v371_v43  ;;  %v5369_v44 = vpop.f32.mrf.mxu1 }
 0x229   :  { %v369_v45 = vadd.f32 %v367_v42, %v6162_v37  ;;  %v204_v44 = vld [vmem:[%s7108_s2 + $0x10] sm:$0xff] }
 0x22b   :  { %v374_v46 = vsel %vm370_vm4, %v369_v45, -inf }
 0x22c   :  { %375 = vmax.xlane.f32.xlu1 %v374_v46  ;;  %v202_v46 = vld [vmem:[%s7108_s2] sm:$0xff] }
 0x23d   :  { %541 = vrot.lane.b32.xlu1 %v192_v25, %s7078_s3 }
 0x241   :  { %619 = vrot.lane.b32.xlu1 %v198_v28, %s7078_s3 }
 0x245   :  { %539 = vrot.lane.b32.xlu1 %v192_v25, %s7080_s29 }
 0x2b1   :  { %v373_v47 = vpop.xlane.xlu1 %372 }
 0x2b2   :  { %v377_v48 = vsub.f32 %v368_v40, %v373_v47 }
 0x2b4   :  { %v379_v49 = vmul.f32 1.442695, %v377_v48 }
 0x2b5   :  { %v376_v50 = vpop.xlane.xlu1 %375 }
 0x2b6   :  { %5824 = vpow2.f32 %v379_v49  ;;  %v378_v51 = vsub.f32 %v369_v45, %v376_v50  ;;  %v203_v45 = vld [vmem:[%s7108_s2 + $0x8] sm:$0xff]  ;;  %v209_v49 = vld [vmem:[%s7108_s2 + $0x38] sm:$0xff]  ;;  %v208_v50 = vld [vmem:[%s7108_s2 + $0x30] sm:$0xff] }
 0x2b8   :  { %v381_v52 = vmul.f32 1.442695, %v378_v51  ;;  %v207_v51 = vld [vmem:[%s7108_s2 + $0x28] sm:$0xff] }
 0x2b9   :  { %v542_v53 = vpop.permute.xlu1 %541 }
 0x2ba   :  { %5826 = vpow2.f32 %v381_v52  ;;  %v206_v52 = vld [vmem:[%s7108_s2 + $0x20] sm:$0xff] }
 0x2bd   :  { %v620_v54 = vpop.permute.xlu1 %619 }
 0x2be   :  { %5386 = vmatpush3.xpose.msk.msra.mxu0 %vm214_vm2, %v620_v54 }
 0x2bf   :  { %5395 = vmatprep.subr.mxu0 %v5922_v3 }
 0x2c1   :  { %v540_v59 = vpop.permute.xlu1 %539 }
 0x2c3   :  { %v5825_v55 = vpop.eup %5824 }
 0x2c4   :  { %v383_v56 = vsel %vm370_vm4, %v5825_v55, 0.0 }
 0x2c5   :  { %384 = vadd.xlane.f32.xlu0 %v383_v56 }
 0x2c7   :  { %v5827_v57 = vpop.eup %5826 }
 0x2c8   :  { %v386_v58 = vsel %vm370_vm4, %v5827_v57, 0.0 }
 0x2c9   :  { %387 = vadd.xlane.f32.xlu1 %v386_v58  ;;  %v4965_v58 = vld [vmem:[%s7109_s4] ss:$0 sm:$0xff] }
 0x2da   :  { %617 = vrot.lane.b32.xlu1 %v198_v28, %s7080_s29 }
 0x34e   :  { %v385_v60 = vpop.xlane.xlu0 %384 }
 0x34f   :  { %5828 = vrcp.f32 %v385_v60 }
 0x352   :  { %v388_v61 = vpop.xlane.xlu1 %387 }
 0x353   :  { %5830 = vrcp.f32 %v388_v61 }
 0x356   :  { %v618_v62 = vpop.permute.xlu1 %617 }
 0x357   :  { %5388 = vmatmul.mubr.msk.f32.vlgmr.msra.gmra.mxu0 %vm214_vm2, %v618_v62 }
 0x358   :  { %5397 = vmatprep.mubr.msk.f32.mxu0 %vm5923_vm1, %v5922_v3 }
 0x35c   :  { %v5829_v0 = vpop.eup %5828 }
 0x35d   :  { %v391_v1 = vmul.f32 %v5829_v0, %v5825_v55 }
 0x35f   :  { %5373 = vmatmul.mubr.msk.f32.vlgmr.msra.gmra.mxu1 %vm370_vm4, %v391_v1 }
 0x360   :  { %v5831_v4 = vpop.eup %5830  ;;  %5376 = vmatpush3.msra.mxu1 %v200_v2  ;;  %5377 = vmatprep.mubr.msk.f32.mxu1 %vm5923_vm1, %v5922_v3 }
 0x361   :  { %5380 = vmatprep.subr.mxu1 %v5922_v3  ;;  %v392_v5 = vmul.f32 %v5831_v4, %v5827_v57 }
 0x363   :  { %5378 = vmatmul.mubr.msk.f32.vlgmr.msra.gmra.mxu1 %vm370_vm4, %v392_v5 }
 0x364   :  { %5381 = vmatpush3.xpose.msk.msra.mxu1 %vm214_vm2, %v542_v53  ;;  %5382 = vmatprep.mubr.msk.f32.mxu1 %vm5923_vm1, %v5922_v3 }
 0x365   :  { %5390 = vmatprep.subr.mxu1 %v5922_v3 }
 0x367   :  { %5383 = vmatmul.mubr.msk.f32.vlgmr.msra.gmra.mxu1 %vm214_vm2, %v540_v59 }
 0x368   :  { %5392 = vmatprep.mubr.msk.f32.mxu1 %vm5923_vm1, %v5922_v3 }
 0x417   :  { %v691_v6 = vpop.f32.mrf.mxu0 }
 0x418   :  { %v696_v7 = vmul.f32 0.17677669, %v691_v6 }
 0x419   :  { %v5389_v8 = vpop.f32.mrf.mxu0 }
 0x41a   :  { %v698_v9 = vadd.f32 %v696_v7, %v6162_v37 }
 0x41c   :  { %v702_v10 = vsel %vm370_vm4, %v698_v9, -inf }
 0x41d   :  { %703 = vmax.xlane.f32.xlu1 %v702_v10 }
 0x41f   :  { %v462_v11 = vpop.f32.mrf.mxu1 }
 0x421   :  { %v5374_v12 = vpop.f32.mrf.mxu1 }
 0x423   :  { %v535_v13 = vpop.f32.mrf.mxu1 }
 0x425   :  { %v5379_v14 = vpop.f32.mrf.mxu1 }
 0x427   :  { %v613_v15 = vpop.f32.mrf.mxu1 }
 0x428   :  { %v695_v16 = vmul.f32 0.17677669, %v613_v15  ;;  %v1195_v15 = vld [vmem:[%s7110_s26 + $0x38] sm:$0xff] }
 0x429   :  { %v5384_v19 = vpop.f32.mrf.mxu1 }
 0x42a   :  { %v697_v22 = vadd.f32 %v695_v16, %v6162_v37  ;;  %v1194_v16 = vld [vmem:[%s7110_s26 + $0x30] sm:$0xff]  ;;  %v1193_v19 = vld [vmem:[%s7110_s26 + $0x28] sm:$0xff] }
 0x42c   :  { %v699_v23 = vsel %vm370_vm4, %v697_v22, -inf }
 0x42d   :  { %700 = vmax.xlane.f32.xlu0 %v699_v23 }
 0x4a6   :  { %v704_v24 = vpop.xlane.xlu1 %703 }
 0x4a7   :  { %v706_v25 = vsub.f32 %v698_v9, %v704_v24  ;;  %v1192_v24 = vld [vmem:[%s7110_s26 + $0x20] sm:$0xff] }
 0x4a9   :  { %v709_v26 = vmul.f32 1.442695, %v706_v25 }
 0x4ab   :  { %5832 = vpow2.f32 %v709_v26  ;;  %v1191_v26 = vld [vmem:[%s7110_s26 + $0x18] sm:$0xff] }
 0x4b6   :  { %v701_v30 = vpop.xlane.xlu0 %700 }
 0x4b7   :  { %v705_v31 = vsub.f32 %v697_v22, %v701_v30 }
 0x4b8   :  { %v5833_v27 = vpop.eup %5832 }
 0x4b9   :  { %v714_v28 = vsel %vm370_vm4, %v5833_v27, 0.0  ;;  %v707_v32 = vmul.f32 1.442695, %v705_v31  ;;  %v1189_v31 = vld [vmem:[%s7110_s26 + $0x8] sm:$0xff] }
 0x4ba   :  { %715 = vadd.xlane.f32.xlu0 %v714_v28  ;;  %v1190_v28 = vld [vmem:[%s7110_s26 + $0x10] sm:$0xff] }
 0x4bb   :  { %5834 = vpow2.f32 %v707_v32 }
 0x4c8   :  { %v5835_v35 = vpop.eup %5834 }
 0x4c9   :  { %v711_v36 = vsel %vm370_vm4, %v5835_v35, 0.0 }
 0x4d0   :  { %722 = vrot.lane.b32.xlu0 %v6151_v33, %s7080_s29  ;;  %v205_v33 = vld [vmem:[%s7108_s2 + $0x18] sm:$0xff] }
 0x4ef   :  { %712 = vadd.xlane.f32.xlu0 %v711_v36  ;;  %v1188_v36 = vld [vmem:[%s7110_s26] sm:$0xff] }
 0x505   :  { %799 = vrot.lane.b32.xlu0 %v200_v2, %s7080_s29  ;;  %s7111_s29 = sld [smem:[#allocation10_spill]] }
 0x50b   :  { %v1099_v22 = vld [vmem:[%s7111_s29 + $0x38] sm:$0xff]  ;;  %v1098_v23 = vld [vmem:[%s7111_s29 + $0x30] sm:$0xff]  ;;  %v1097_v25 = vld [vmem:[%s7111_s29 + $0x28] sm:$0xff] }
 0x50c   :  { %v1095_v30 = vld [vmem:[%s7111_s29 + $0x18] sm:$0xff]  ;;  %v1094_v32 = vld [vmem:[%s7111_s29 + $0x10] sm:$0xff] }
 0x543   :  { %v716_v38 = vpop.xlane.xlu0 %715 }
 0x544   :  { %5836 = vrcp.f32 %v716_v38  ;;  %v1093_v38 = vld [vmem:[%s7111_s29 + $0x8] sm:$0xff] }
 0x547   :  { %v723_v39 = vpop.permute.xlu0 %722 }
 0x548   :  { %5391 = vmatpush3.msra.mxu1 %v723_v39  ;;  %v83_v39 = vld [vmem:[%s7112_s6 + $0x8] sm:$0xff] }
 0x549   :  { %5400 = vmatprep.subr.mxu1 %v209_v49 }
 0x551   :  { %v5837_v41 = vpop.eup %5836 }
 0x552   :  { %v720_v43 = vmul.f32 %v5837_v41, %v5833_v27  ;;  %v1096_v27 = vld [vmem:[%s7111_s29 + $0x20] sm:$0xff] }
 0x578   :  { %v713_v40 = vpop.xlane.xlu0 %712 }
 0x579   :  { %5838 = vrcp.f32 %v713_v40  ;;  %v1092_v40 = vld [vmem:[%s7111_s29] sm:$0xff] }
 0x57c   :  { %v800_v42 = vpop.permute.xlu0 %799 }
 0x57d   :  { %5396 = vmatpush3.msra.mxu0 %v800_v42 }
 0x57e   :  { %5398 = vmatmul.mubr.msk.f32.vlgmr.msra.gmra.mxu0 %vm370_vm4, %v720_v43  ;;  %5411 = vmatprep.subr.mxu0 %v205_v33 }
 0x57f   :  { %5412 = vmatpush3.msra.mxu0 %v205_v33  ;;  %5419 = vmatprep.mubr.msk.f32.mxu0 %vm214_vm2, %v462_v11 }
 0x580   :  { %5413 = vmatprep.subr.mxu0 %v204_v44 }
 0x581   :  { %5414 = vmatpush3.msra.mxu0 %v204_v44 }
 0x582   :  { %5415 = vmatprep.subr.mxu0 %v203_v45 }
 0x583   :  { %5416 = vmatpush3.msra.mxu0 %v203_v45 }
 0x584   :  { %5417 = vmatprep.subr.mxu0 %v202_v46 }
 0x585   :  { %5418 = vmatpush3.msra.mxu0 %v202_v46 }
 0x586   :  { %v5839_v47 = vpop.eup %5838  ;;  %5420 = vmatmul.mubr.msk.f32.vlgmr.msra.gmra.mxu0 %vm214_vm2, %v535_v13  ;;  %5441 = vmatprep.subr.mxu0 %v1195_v15 }
 0x587   :  { %v719_v48 = vmul.f32 %v5839_v47, %v5835_v35  ;;  %5442 = vmatpush3.msra.mxu0 %v1195_v15  ;;  %v82_v35 = vld [vmem:[%s7112_s6] sm:$0xff] }
 0x588   :  { %5443 = vmatprep.subr.mxu0 %v1194_v16  ;;  %5457 = vmatprep.mubr.msk.f32.mxu0 %vm118_vm0, %v82_v35  ;;  %v4966_v47 = vld [vmem:[%s7113_s30] ss:$0 sm:$0xff] }
 0x589   :  { %5393 = vmatmul.mubr.msk.f32.vlgmr.msra.gmra.mxu1 %vm370_vm4, %v719_v48  ;;  %5444 = vmatpush3.msra.mxu0 %v1194_v16 }
 0x58a   :  { %5401 = vmatpush3.msra.mxu1 %v209_v49  ;;  %5445 = vmatprep.subr.mxu0 %v1193_v19  ;;  %v4967_v49 = vld [vmem:[%s7114_s7] ss:$0 sm:$0xff] }
 0x58b   :  { %5402 = vmatprep.subr.mxu1 %v208_v50  ;;  %5446 = vmatpush3.msra.mxu0 %v1193_v19 }
 0x58c   :  { %5403 = vmatpush3.msra.mxu1 %v208_v50  ;;  %5447 = vmatprep.subr.mxu0 %v1192_v24 }
 0x58d   :  { %5404 = vmatprep.subr.mxu1 %v207_v51  ;;  %5448 = vmatpush3.msra.mxu0 %v1192_v24 }
 0x58e   :  { %5405 = vmatpush3.msra.mxu1 %v207_v51  ;;  %5449 = vmatprep.subr.mxu0 %v1191_v26 }
 0x58f   :  { %5406 = vmatprep.subr.mxu1 %v206_v52  ;;  %5450 = vmatpush3.msra.mxu0 %v1191_v26 }
 0x590   :  { %5407 = vmatpush3.msra.mxu1 %v206_v52  ;;  %5451 = vmatprep.subr.mxu0 %v1190_v28 }
 0x591   :  { %5422 = vmatprep.subr.mxu1 %v1099_v22  ;;  %5452 = vmatpush3.msra.mxu0 %v1190_v28 }
 0x592   :  { %5453 = vmatprep.subr.mxu0 %v1189_v31 }
 0x593   :  { %5454 = vmatpush3.msra.mxu0 %v1189_v31 }
 0x594   :  { %5455 = vmatprep.subr.mxu0 %v1188_v36 }
 0x595   :  { %5456 = vmatpush3.msra.mxu0 %v1188_v36 }
 0x596   :  { %5458 = vmatmul.mubr.msk.f32.vlgmr.msra.gmra.mxu0 %vm118_vm0, %v83_v39  ;;  %5465 = vmatprep.subr.mxu0 %v5922_v3 }
 0x597   :  { %5467 = vmatprep.mubr.msk.f32.mxu0 %vm5923_vm1, %v5922_v3 }
 0x63e   :  { %v871_v53 = vpop.f32.mrf.mxu0 }
 0x640   :  { %v5399_v54 = vpop.f32.mrf.mxu0 }
 0x646   :  { %v5421_v57 = vpop.f32.mrf.mxu0 }
 0x648   :  { %v1028_v61 = vpop.f32.mrf.mxu0 }
 0x649   :  { %v794_v55 = vpop.f32.mrf.mxu1 }
 0x64a   :  { %5408 = vmatprep.mubr.msk.f32.mxu1 %vm214_vm2, %v794_v55 }
 0x64b   :  { %v5394_v56 = vpop.f32.mrf.mxu1  ;;  %5409 = vmatmul.mubr.msk.f32.vlgmr.msra.gmra.mxu1 %vm214_vm2, %v871_v53 }
 0x64c   :  { %5423 = vmatpush3.msra.mxu1 %v1099_v22  ;;  %v4971_v56 = vld [vmem:[%s7052_s12] ss:$0 sm:$0xff] }
 0x64d   :  { %5424 = vmatprep.subr.mxu1 %v1098_v23 }
 0x64e   :  { %5425 = vmatpush3.msra.mxu1 %v1098_v23 }
 0x64f   :  { %5426 = vmatprep.subr.mxu1 %v1097_v25 }
 0x650   :  { %5427 = vmatpush3.msra.mxu1 %v1097_v25 }
 0x651   :  { %5428 = vmatprep.subr.mxu1 %v1096_v27 }
 0x652   :  { %5429 = vmatpush3.msra.mxu1 %v1096_v27 }
 0x653   :  { %5430 = vmatprep.subr.mxu1 %v1095_v30 }
 0x654   :  { %5431 = vmatpush3.msra.mxu1 %v1095_v30 }
 0x655   :  { %5432 = vmatprep.subr.mxu1 %v1094_v32 }
 0x656   :  { %5433 = vmatpush3.msra.mxu1 %v1094_v32 }
 0x657   :  { %5434 = vmatprep.subr.mxu1 %v1093_v38 }
 0x658   :  { %5435 = vmatpush3.msra.mxu1 %v1093_v38 }
 0x659   :  { %5436 = vmatprep.subr.mxu1 %v1092_v40 }
 0x65a   :  { %5437 = vmatpush3.msra.mxu1 %v1092_v40 }
 0x65b   :  { %5460 = vmatprep.subr.mxu1 %v5922_v3 }
 0x70b   :  { %v5410_v59 = vpop.f32.mrf.mxu1 }
 0x70c   :  { %v1034_v60 = vadd.f32 %v5421_v57, %v5410_v59  ;;  %v5459_v57 = vpop.f32.mrf.mxu0 }
 0x70d   :  { %v947_v62 = vpop.f32.mrf.mxu1 }
 0x70e   :  { %v1044_v63 = vadd.f32 %v4965_v58, %v1034_v60  ;;  %v1029_v0 = vadd.f32 %v1028_v61, %v947_v62  ;;  %v1275_v59 = vpop.f32.mrf.mxu0  ;;  %v4968_v61 = vld [vmem:[%s7053_s10] ss:$0 sm:$0xff] }
 0x70f   :  { %v6331_v60 = vadd.f32 %v4971_v56, %v1275_v59 }
 0x710   :  { %v1043_v1 = vadd.f32 %v4965_v58, %v1029_v0  ;;  %v1046_v2 = vadd.f32 %v1044_v63, %v6120_v18  ;;  %v6329_v58 = vadd.f32 %v5459_v57, %v4971_v56 }
 0x712   :  { %v1052_v4 = vsel %vm118_vm0, %v1046_v2, 0.0  ;;  %v1045_v5 = vadd.f32 %v1043_v1, %v6111_v17  ;;  %5466 = vmatpush3.xpose.msk.msra.mxu0 %vm214_vm2, %v6329_v58 }
 0x713   :  { %1053 = vadd.xlane.f32.xlu1 %v1052_v4  ;;  %5475 = vmatprep.subr.mxu0 %v5922_v3 }
 0x714   :  { %v1049_v6 = vsel %vm118_vm0, %v1045_v5, 0.0 }
 0x715   :  { %1050 = vadd.xlane.f32.xlu0 %v1049_v6 }
 0x72b   :  { %1545 = vrot.lane.b32.xlu0 %v6329_v58, %s7115_s25 }
 0x79c   :  { %v1054_v7 = vpop.xlane.xlu1 %1053 }
 0x79d   :  { %v1057_v8 = vmul.f32 0.015625, %v1054_v7 }
 0x79e   :  { %v1051_v9 = vpop.xlane.xlu0 %1050 }
 0x79f   :  { %v1056_v10 = vmul.f32 0.015625, %v1051_v9  ;;  %v6238_v11 = vsub.f32 %v1046_v2, %v1057_v8 }
 0x7a1   :  { %v6240_v12 = vsub.f32 %v1045_v5, %v1056_v10  ;;  %v1061_v17 = vmul.f32 %v6238_v11, %v6238_v11 }
 0x7a2   :  { %v1546_v0 = vpop.permute.xlu0 %1545 }
 0x7a3   :  { %v1060_v13 = vmul.f32 %v6240_v12, %v6240_v12  ;;  %v1065_v14 = vsel %vm118_vm0, %v1061_v17, 0.0 }
 0x7a5   :  { %v1062_v18 = vsel %vm118_vm0, %v1060_v13, 0.0 }
 0x7a6   :  { %1063 = vadd.xlane.f32.xlu1 %v1062_v18 }
 0x7aa   :  { %1066 = vadd.xlane.f32.xlu1 %v1065_v14 }
 0x82f   :  { %v1064_v41 = vpop.xlane.xlu1 %1063 }
 0x830   :  { %v1068_v33 = vmul.f32 0.015625, %v1064_v41 }
 0x832   :  { %v1070_v42 = vadd.f32 1e-05, %v1068_v33 }
 0x833   :  { %v1067_v43 = vpop.xlane.xlu1 %1066 }
 0x834   :  { %5840 = vrsqrt.f32 %v1070_v42  ;;  %v1069_v44 = vmul.f32 0.015625, %v1067_v43 }
 0x836   :  { %v1071_v45 = vadd.f32 1e-05, %v1069_v44 }
 0x838   :  { %5842 = vrsqrt.f32 %v1071_v45 }
 0x841   :  { %v5841_v46 = vpop.eup %5840 }
 0x842   :  { %v1074_v48 = vmul.f32 %v5841_v46, %v6240_v12 }
 0x844   :  { %v1082_v50 = vmul.f32 %v4966_v47, %v1074_v48 }
 0x845   :  { %v5843_v51 = vpop.eup %5842 }
 0x846   :  { %v1075_v52 = vmul.f32 %v5843_v51, %v6238_v11  ;;  %v6316_v53 = vadd.f32 %v4967_v49, %v1082_v50 }
 0x848   :  { %v1083_v54 = vmul.f32 %v4966_v47, %v1075_v52  ;;  %5438 = vmatprep.mubr.msk.f32.mxu1 %vm118_vm0, %v6316_v53 }
 0x84a   :  { %v6320_v55 = vadd.f32 %v4967_v49, %v1083_v54 }
 0x84c   :  { %5439 = vmatmul.mubr.msk.f32.vlgmr.msra.gmra.mxu1 %vm118_vm0, %v6320_v55 }
 0x84d   :  { %5462 = vmatprep.mubr.msk.f32.mxu1 %vm5923_vm1, %v5922_v3  ;;  %5461 = vmatpush3.xpose.msk.msra.mxu1 %vm214_vm2, %v6331_v60 }
 0x84e   :  { %5470 = vmatprep.subr.mxu1 %v5922_v3 }
 0x90c   :  { %v5440_v62 = vpop.f32.mrf.mxu1 }
 0x90d   :  { %v1185_v63 = vadd.f32 %v5440_v62, %v4968_v61 }
 0x90e   :  { %v1179_v1 = vpop.f32.mrf.mxu1 }
 0x90f   :  { %v1180_v2 = vadd.f32 %v4968_v61, %v1179_v1  ;;  %5468 = vmatmul.mubr.msk.f32.vlgmr.msra.gmra.mxu0 %vm214_vm2, %v1185_v63 }
 0x910   :  { %5476 = vmatpush3.msra.mxu0 %v1546_v0  ;;  %5477 = vmatprep.mubr.msk.f32.mxu0 %vm5923_vm1, %v5922_v3 }
 0x911   :  { %1621 = vrot.lane.b32.xlu0 %v1180_v2, %s7116_s5  ;;  %5463 = vmatmul.mubr.msk.f32.vlgmr.msra.gmra.mxu1 %vm214_vm2, %v1180_v2 }
 0x912   :  { %5485 = vmatprep.subr.mxu0 %v5922_v3  ;;  %5472 = vmatprep.mubr.msk.f32.mxu1 %vm5923_vm1, %v5922_v3 }
 0x983   :  { %v1622_v38 = vpop.permute.xlu0 %1621 }
 0x9cf   :  { %v1441_v4 = vpop.f32.mrf.mxu0 }
 0x9d0   :  { %v1446_v9 = vmul.f32 0.17677669, %v1441_v4  ;;  %v1287_v4 = vld [vmem:[%s7054_s13 + $0x18] sm:$0xff] }
 0x9d1   :  { %v1365_v5 = vpop.f32.mrf.mxu1  ;;  %v5469_v6 = vpop.f32.mrf.mxu0 }
 0x9d2   :  { %v1445_v7 = vmul.f32 0.17677669, %v1365_v5  ;;  %v1450_v11 = vsel %vm370_vm4, %v1446_v9, -inf }
 0x9d3   :  { %v5464_v8 = vpop.f32.mrf.mxu1 }
 0x9d4   :  { %v1447_v10 = vsel %vm370_vm4, %v1445_v7, -inf }
 0x9d5   :  { %1448 = vmax.xlane.f32.xlu1 %v1447_v10 }
 0x9d9   :  { %1451 = vmax.xlane.f32.xlu1 %v1450_v11  ;;  %v1284_v11 = vld [vmem:[%s7054_s13] sm:$0xff] }
 0x9ea   :  { %1469 = vrot.lane.b32.xlu1 %v6331_v60, %s7115_s25 }
 0x9ee   :  { %1623 = vrot.lane.b32.xlu1 %v6331_v60, %s7116_s5 }
 0x9f2   :  { %1701 = vrot.lane.b32.xlu1 %v6329_v58, %s7116_s5 }
 0xa5e   :  { %v1449_v12 = vpop.xlane.xlu1 %1448 }
 0xa5f   :  { %v1453_v13 = vsub.f32 %v1445_v7, %v1449_v12  ;;  %v1290_v12 = vld [vmem:[%s7054_s13 + $0x30] sm:$0xff] }
 0xa61   :  { %v1455_v14 = vmul.f32 1.442695, %v1453_v13  ;;  %v1289_v13 = vld [vmem:[%s7054_s13 + $0x28] sm:$0xff] }
 0xa62   :  { %v1452_v18 = vpop.xlane.xlu1 %1451 }
 0xa63   :  { %v1454_v17 = vsub.f32 %v1446_v9, %v1452_v18  ;;  %v1285_v9 = vld [vmem:[%s7054_s13 + $0x8] sm:$0xff]  ;;  %v1288_v18 = vld [vmem:[%s7054_s13 + $0x20] sm:$0xff] }
 0xa65   :  { %v1457_v15 = vmul.f32 1.442695, %v1454_v17 }
 0xa66   :  { %v1470_v16 = vpop.permute.xlu1 %1469 }
 0xa67   :  { %5844 = vpow2.f32 %v1457_v15  ;;  %5471 = vmatpush3.msra.mxu1 %v1470_v16 }
 0xa68   :  { %5480 = vmatprep.subr.mxu1 %v5922_v3  ;;  %5846 = vpow2.f32 %v1455_v14 }
 0xa6a   :  { %v1624_v25 = vpop.permute.xlu1 %1623 }
 0xa6e   :  { %v1702_v26 = vpop.permute.xlu1 %1701 }
 0xa74   :  { %v5845_v19 = vpop.eup %5844 }
 0xa75   :  { %v1462_v22 = vsel %vm370_vm4, %v5845_v19, 0.0  ;;  %v5847_v23 = vpop.eup %5846 }
 0xa76   :  { %1463 = vadd.xlane.f32.xlu1 %v1462_v22  ;;  %v1459_v24 = vsel %vm370_vm4, %v5847_v23, 0.0  ;;  %v4990_v22 = vld [vmem:[%s7055_s14] ss:$0 sm:$0xff]  ;;  %s7121_s14 = sld [smem:[#allocation17_spill]] }
 0xa7a   :  { %1460 = vadd.xlane.f32.xlu1 %v1459_v24 }
 0xa8b   :  { %1699 = vrot.lane.b32.xlu1 %v1185_v63, %s7116_s5 }
 0xaff   :  { %v1464_v27 = vpop.xlane.xlu1 %1463 }
 0xb00   :  { %5848 = vrcp.f32 %v1464_v27 }
 0xb03   :  { %v1461_v28 = vpop.xlane.xlu1 %1460 }
 0xb04   :  { %5850 = vrcp.f32 %v1461_v28 }
 0xb07   :  { %v1700_v36 = vpop.permute.xlu1 %1699 }
 0xb0d   :  { %v5849_v30 = vpop.eup %5848 }
 0xb0e   :  { %v1468_v31 = vmul.f32 %v5849_v30, %v5845_v19 }
 0xb10   :  { %5478 = vmatmul.mubr.msk.f32.vlgmr.msra.gmra.mxu0 %vm370_vm4, %v1468_v31 }
 0xb11   :  { %v5851_v32 = vpop.eup %5850  ;;  %5486 = vmatpush3.xpose.msk.msra.mxu0 %vm214_vm2, %v1702_v26  ;;  %5487 = vmatprep.mubr.msk.f32.mxu0 %vm5923_vm1, %v5922_v3 }
 0xb12   :  { %v1467_v35 = vmul.f32 %v5851_v32, %v5847_v23  ;;  %5495 = vmatprep.subr.mxu0 %v5922_v3 }
 0xb14   :  { %5473 = vmatmul.mubr.msk.f32.vlgmr.msra.gmra.mxu1 %vm370_vm4, %v1467_v35  ;;  %5488 = vmatmul.mubr.msk.f32.vlgmr.msra.gmra.mxu0 %vm214_vm2, %v1700_v36 }
 0xb15   :  { %5481 = vmatpush3.xpose.msk.msra.mxu1 %vm214_vm2, %v1624_v25  ;;  %5482 = vmatprep.mubr.msk.f32.mxu1 %vm5923_vm1, %v5922_v3 }
 0xb16   :  { %5490 = vmatprep.subr.mxu1 %v5922_v3  ;;  %5497 = vmatprep.mubr.msk.f32.mxu0 %vm5923_vm1, %v5922_v3 }
 0xb18   :  { %5483 = vmatmul.mubr.msk.f32.vlgmr.msra.gmra.mxu1 %vm214_vm2, %v1622_v38 }
 0xb19   :  { %5492 = vmatprep.mubr.msk.f32.mxu1 %vm5923_vm1, %v5922_v3 }
 0xbd0   :  { %v1617_v39 = vpop.f32.mrf.mxu0 }
 0xbd2   :  { %v5479_v40 = vpop.f32.mrf.mxu0 }
 0xbd4   :  { %v1541_v41 = vpop.f32.mrf.mxu1  ;;  %v1773_v33 = vpop.f32.mrf.mxu0 }
 0xbd5   :  { %v1778_v42 = vmul.f32 0.17677669, %v1773_v33 }
 0xbd6   :  { %v5474_v43 = vpop.f32.mrf.mxu1  ;;  %v5489_v44 = vpop.f32.mrf.mxu0 }
 0xbd7   :  { %v1782_v45 = vsel %vm370_vm4, %v1778_v42, -inf }
 0xbd8   :  { %1783 = vmax.xlane.f32.xlu1 %v1782_v45  ;;  %v1695_v46 = vpop.f32.mrf.mxu1 }
 0xbd9   :  { %v1777_v47 = vmul.f32 0.17677669, %v1695_v46  ;;  %v2175_v46 = vld [vmem:[%s7056_s17 + $0x30] sm:$0xff] }
 0xbda   :  { %v5484_v48 = vpop.f32.mrf.mxu1 }
 0xbdb   :  { %v1779_v49 = vsel %vm370_vm4, %v1777_v47, -inf  ;;  %v2173_v48 = vld [vmem:[%s7056_s17 + $0x20] sm:$0xff] }
 0xbdc   :  { %1780 = vmax.xlane.f32.xlu0 %v1779_v49  ;;  %v2172_v49 = vld [vmem:[%s7056_s17 + $0x18] sm:$0xff] }
 0xbe9   :  { %1801 = vrot.lane.b32.xlu1 %v6331_v60, %s7117_s1  ;;  %v1291_v60 = vld [vmem:[%s7054_s13 + $0x38] sm:$0xff] }
 0xc61   :  { %v1784_v50 = vpop.xlane.xlu1 %1783 }
 0xc62   :  { %v1786_v51 = vsub.f32 %v1778_v42, %v1784_v50  ;;  %v2171_v50 = vld [vmem:[%s7056_s17 + $0x10] sm:$0xff] }
 0xc64   :  { %v1789_v52 = vmul.f32 1.442695, %v1786_v51  ;;  %v2170_v51 = vld [vmem:[%s7056_s17 + $0x8] sm:$0xff] }
 0xc65   :  { %v1802_v54 = vpop.permute.xlu1 %1801  ;;  %v1781_v56 = vpop.xlane.xlu0 %1780 }
 0xc66   :  { %5852 = vpow2.f32 %v1789_v52  ;;  %v1785_v57 = vsub.f32 %v1777_v47, %v1781_v56  ;;  %5491 = vmatpush3.msra.mxu1 %v1802_v54  ;;  %v2174_v47 = vld [vmem:[%s7056_s17 + $0x28] sm:$0xff]  ;;  %v2169_v52 = vld [vmem:[%s7056_s17] sm:$0xff] }
 0xc67   :  { %5500 = vmatprep.subr.mxu1 %v1291_v60 }
 0xc68   :  { %v1787_v59 = vmul.f32 1.442695, %v1785_v57 }
 0xc6a   :  { %5854 = vpow2.f32 %v1787_v59 }
 0xc73   :  { %v5853_v61 = vpop.eup %5852 }
 0xc74   :  { %v1794_v62 = vsel %vm370_vm4, %v5853_v61, 0.0 }
 0xc75   :  { %1795 = vadd.xlane.f32.xlu0 %v1794_v62 }
 0xc77   :  { %v5855_v63 = vpop.eup %5854 }
 0xc78   :  { %v1791_v0 = vsel %vm370_vm4, %v5855_v63, 0.0 }
 0xc79   :  { %1792 = vadd.xlane.f32.xlu0 %v1791_v0  ;;  %v4991_v0 = vld [vmem:[%s7057_s15] ss:$0 sm:$0xff] }
 0xc8f   :  { %1877 = vrot.lane.b32.xlu0 %v6329_v58, %s7117_s1  ;;  %v1286_v58 = vld [vmem:[%s7054_s13 + $0x10] sm:$0xff] }
 0xcfe   :  { %v1796_v1 = vpop.xlane.xlu0 %1795 }
 0xcff   :  { %5856 = vrcp.f32 %v1796_v1 }
 0xd02   :  { %v1793_v2 = vpop.xlane.xlu0 %1792 }
 0xd03   :  { %5858 = vrcp.f32 %v1793_v2 }
 0xd06   :  { %v1878_v5 = vpop.permute.xlu0 %1877 }
 0xd07   :  { %5496 = vmatpush3.msra.mxu0 %v1878_v5  ;;  %v4992_v5 = vld [vmem:[%s7058_s16] ss:$0 sm:$0xff] }
 0xd08   :  { %5511 = vmatprep.subr.mxu0 %v1287_v4 }
 0xd0c   :  { %v5857_v6 = vpop.eup %5856 }
 0xd0d   :  { %v1800_v7 = vmul.f32 %v5857_v6, %v5853_v61 }
 0xd0f   :  { %5498 = vmatmul.mubr.msk.f32.vlgmr.msra.gmra.mxu0 %vm370_vm4, %v1800_v7 }
 0xd10   :  { %v5859_v8 = vpop.eup %5858  ;;  %5512 = vmatpush3.msra.mxu0 %v1287_v4  ;;  %5519 = vmatprep.mubr.msk.f32.mxu0 %vm214_vm2, %v1541_v41 }
 0xd11   :  { %5513 = vmatprep.subr.mxu0 %v1286_v58  ;;  %v1799_v10 = vmul.f32 %v5859_v8, %v5855_v63  ;;  %v2298_v8 = vld [vmem:[%s7059_s19 + $0x78] sm:$0xff] }
 0xd12   :  { %5514 = vmatpush3.msra.mxu0 %v1286_v58 }
 0xd13   :  { %5515 = vmatprep.subr.mxu0 %v1285_v9  ;;  %5493 = vmatmul.mubr.msk.f32.vlgmr.msra.gmra.mxu1 %vm370_vm4, %v1799_v10  ;;  %v2296_v10 = vld [vmem:[%s7059_s19 + $0x68] sm:$0xff] }
 0xd14   :  { %5516 = vmatpush3.msra.mxu0 %v1285_v9  ;;  %5501 = vmatpush3.msra.mxu1 %v1291_v60  ;;  %v2297_v9 = vld [vmem:[%s7059_s19 + $0x70] sm:$0xff] }
 0xd15   :  { %5517 = vmatprep.subr.mxu0 %v1284_v11  ;;  %5502 = vmatprep.subr.mxu1 %v1290_v12 }
 0xd16   :  { %5518 = vmatpush3.msra.mxu0 %v1284_v11  ;;  %5503 = vmatpush3.msra.mxu1 %v1290_v12  ;;  %v2295_v11 = vld [vmem:[%s7059_s19 + $0x60] sm:$0xff]  ;;  %v2294_v12 = vld [vmem:[%s7059_s19 + $0x58] sm:$0xff] }
 0xd17   :  { %5520 = vmatmul.mubr.msk.f32.vlgmr.msra.gmra.mxu0 %vm214_vm2, %v1617_v39  ;;  %5504 = vmatprep.subr.mxu1 %v1289_v13 }
 0xd18   :  { %5505 = vmatpush3.msra.mxu1 %v1289_v13  ;;  %5541 = vmatprep.subr.mxu0 %v2298_v8  ;;  %v2293_v13 = vld [vmem:[%s7059_s19 + $0x50] sm:$0xff] }
 0xd19   :  { %5506 = vmatprep.subr.mxu1 %v1288_v18  ;;  %5542 = vmatpush3.msra.mxu0 %v2298_v8 }
 0xd1a   :  { %5507 = vmatpush3.msra.mxu1 %v1288_v18  ;;  %5543 = vmatprep.subr.mxu0 %v2297_v9  ;;  %v2292_v18 = vld [vmem:[%s7059_s19 + $0x48] sm:$0xff] }
 0xd1b   :  { %5544 = vmatpush3.msra.mxu0 %v2297_v9  ;;  %v5013_v9 = vld [vmem:[%s7105_s9 + $0xf0] sm:$0xff] }
 0xd1c   :  { %5545 = vmatprep.subr.mxu0 %v2296_v10 }
 0xd1d   :  { %5546 = vmatpush3.msra.mxu0 %v2296_v10  ;;  %v5012_v10 = vld [vmem:[%s7105_s9 + $0xe8] sm:$0xff] }
 0xd1e   :  { %5547 = vmatprep.subr.mxu0 %v2295_v11 }
 0xd1f   :  { %5548 = vmatpush3.msra.mxu0 %v2295_v11  ;;  %v5011_v11 = vld [vmem:[%s7105_s9 + $0xe0] sm:$0xff] }
 0xd20   :  { %5549 = vmatprep.subr.mxu0 %v2294_v12 }
 0xd21   :  { %5550 = vmatpush3.msra.mxu0 %v2294_v12  ;;  %v5010_v12 = vld [vmem:[%s7105_s9 + $0xd8] sm:$0xff] }
 0xd22   :  { %5551 = vmatprep.subr.mxu0 %v2293_v13 }
 0xd23   :  { %5552 = vmatpush3.msra.mxu0 %v2293_v13  ;;  %v5009_v13 = vld [vmem:[%s7105_s9 + $0xd0] sm:$0xff] }
 0xd24   :  { %5553 = vmatprep.subr.mxu0 %v2292_v18 }
 0xd25   :  { %5554 = vmatpush3.msra.mxu0 %v2292_v18  ;;  %v5008_v18 = vld [vmem:[%s7105_s9 + $0xc8] sm:$0xff] }
 0xdcf   :  { %v1949_v17 = vpop.f32.mrf.mxu0 }
 0xdd1   :  { %v5499_v14 = vpop.f32.mrf.mxu0 }
 0xdd2   :  { %v2290_v14 = vld [vmem:[%s7059_s19 + $0x38] sm:$0xff] }
 0xdd3   :  { %v1873_v15 = vpop.f32.mrf.mxu1 }
 0xdd4   :  { %5508 = vmatprep.mubr.msk.f32.mxu1 %vm214_vm2, %v1873_v15  ;;  %v2289_v15 = vld [vmem:[%s7059_s19 + $0x30] sm:$0xff] }
 0xdd5   :  { %v5494_v16 = vpop.f32.mrf.mxu1  ;;  %5509 = vmatmul.mubr.msk.f32.vlgmr.msra.gmra.mxu1 %vm214_vm2, %v1949_v17  ;;  %v2291_v17 = vld [vmem:[%s7059_s19 + $0x40] sm:$0xff] }
 0xdd6   :  { %5555 = vmatprep.subr.mxu0 %v2291_v17  ;;  %v2288_v16 = vld [vmem:[%s7059_s19 + $0x28] sm:$0xff] }
 0xdd7   :  { %v5521_v19 = vpop.f32.mrf.mxu0  ;;  %5556 = vmatpush3.msra.mxu0 %v2291_v17  ;;  %v5007_v17 = vld [vmem:[%s7105_s9 + $0xc0] sm:$0xff] }
 0xdd8   :  { %5557 = vmatprep.subr.mxu0 %v2290_v14 }
 0xdd9   :  { %v2106_v25 = vpop.f32.mrf.mxu0  ;;  %5558 = vmatpush3.msra.mxu0 %v2290_v14  ;;  %v5006_v14 = vld [vmem:[%s7105_s9 + $0xb8] sm:$0xff] }
 0xdda   :  { %5559 = vmatprep.subr.mxu0 %v2289_v15 }
 0xddb   :  { %5560 = vmatpush3.msra.mxu0 %v2289_v15  ;;  %v5005_v15 = vld [vmem:[%s7105_s9 + $0xb0] sm:$0xff] }
 0xddc   :  { %5561 = vmatprep.subr.mxu0 %v2288_v16 }
 0xddd   :  { %5562 = vmatpush3.msra.mxu0 %v2288_v16  ;;  %v5004_v16 = vld [vmem:[%s7105_s9 + $0xa8] sm:$0xff] }
 0xe95   :  { %v5510_v23 = vpop.f32.mrf.mxu1 }
 0xe96   :  { %v2112_v24 = vadd.f32 %v5521_v19, %v5510_v23  ;;  %v2287_v19 = vld [vmem:[%s7059_s19 + $0x20] sm:$0xff]  ;;  %v2285_v23 = vld [vmem:[%s7059_s19 + $0x10] sm:$0xff] }
 0xe97   :  { %v2025_v26 = vpop.f32.mrf.mxu1  ;;  %5563 = vmatprep.subr.mxu0 %v2287_v19 }
 0xe98   :  { %v2122_v27 = vadd.f32 %v4990_v22, %v2112_v24  ;;  %v2107_v28 = vadd.f32 %v2106_v25, %v2025_v26  ;;  %5564 = vmatpush3.msra.mxu0 %v2287_v19  ;;  %v2284_v24 = vld [vmem:[%s7059_s19 + $0x8] sm:$0xff]  ;;  %v2283_v25 = vld [vmem:[%s7059_s19] sm:$0xff] }
 0xe99   :  { %v4993_v26 = vld [vmem:[%s7060_s18] ss:$0 sm:$0xff] }
 0xe9a   :  { %v2121_v30 = vadd.f32 %v4990_v22, %v2107_v28  ;;  %v2124_v31 = vadd.f32 %v2122_v27, %v6320_v55  ;;  %v2286_v22 = vld [vmem:[%s7059_s19 + $0x18] sm:$0xff]  ;;  %v5003_v19 = vld [vmem:[%s7105_s9 + $0xa0] sm:$0xff] }
 0xe9b   :  { %5565 = vmatprep.subr.mxu0 %v2286_v22 }
 0xe9c   :  { %v2130_v32 = vsel %vm118_vm0, %v2124_v31, 0.0  ;;  %v2123_v35 = vadd.f32 %v2121_v30, %v6316_v53  ;;  %v2176_v53 = vld [vmem:[%s7056_s17 + $0x38] sm:$0xff]  ;;  %5566 = vmatpush3.msra.mxu0 %v2286_v22 }
 0xe9d   :  { %2131 = vadd.xlane.f32.xlu0 %v2130_v32  ;;  %5522 = vmatprep.subr.mxu1 %v2176_v53  ;;  %v5002_v22 = vld [vmem:[%s7105_s9 + $0x98] sm:$0xff] }
 0xe9e   :  { %v2127_v36 = vsel %vm118_vm0, %v2123_v35, 0.0  ;;  %5523 = vmatpush3.msra.mxu1 %v2176_v53  ;;  %5567 = vmatprep.subr.mxu0 %v2285_v23 }
 0xe9f   :  { %2128 = vadd.xlane.f32.xlu1 %v2127_v36  ;;  %5524 = vmatprep.subr.mxu1 %v2175_v46 }
 0xea0   :  { %5525 = vmatpush3.msra.mxu1 %v2175_v46  ;;  %5568 = vmatpush3.msra.mxu0 %v2285_v23  ;;  %v5001_v23 = vld [vmem:[%s7105_s9 + $0x90] sm:$0xff] }
 0xea1   :  { %5526 = vmatprep.subr.mxu1 %v2174_v47  ;;  %5569 = vmatprep.subr.mxu0 %v2284_v24 }
 0xea2   :  { %5527 = vmatpush3.msra.mxu1 %v2174_v47  ;;  %5570 = vmatpush3.msra.mxu0 %v2284_v24  ;;  %v5000_v24 = vld [vmem:[%s7105_s9 + $0x88] sm:$0xff] }
 0xea3   :  { %5528 = vmatprep.subr.mxu1 %v2173_v48  ;;  %5571 = vmatprep.subr.mxu0 %v2283_v25 }
 0xea4   :  { %5529 = vmatpush3.msra.mxu1 %v2173_v48  ;;  %5572 = vmatpush3.msra.mxu0 %v2283_v25  ;;  %v4999_v25 = vld [vmem:[%s7105_s9 + $0x80] sm:$0xff] }
 0xea5   :  { %5530 = vmatprep.subr.mxu1 %v2172_v49  ;;  %5576 = vmatprep.subr.mxu0 %v5922_v3 }
 0xea6   :  { %5531 = vmatpush3.msra.mxu1 %v2172_v49 }
 0xea7   :  { %5532 = vmatprep.subr.mxu1 %v2171_v50 }
 0xea8   :  { %5533 = vmatpush3.msra.mxu1 %v2171_v50  ;;  %v4996_v50 = vld [vmem:[%s7061_s20] ss:$0 sm:$0xff] }
 0xea9   :  { %5534 = vmatprep.subr.mxu1 %v2170_v51 }
 0xeaa   :  { %5535 = vmatpush3.msra.mxu1 %v2170_v51 }
 0xeab   :  { %5536 = vmatprep.subr.mxu1 %v2169_v52 }
 0xeac   :  { %5537 = vmatpush3.msra.mxu1 %v2169_v52 }
 0xf26   :  { %v2132_v38 = vpop.xlane.xlu0 %2131 }
 0xf27   :  { %v2134_v39 = vmul.f32 0.015625, %v2132_v38 }
 0xf28   :  { %v2129_v40 = vpop.xlane.xlu1 %2128 }
 0xf29   :  { %v2136_v41 = vsub.f32 %v2124_v31, %v2134_v39  ;;  %v2133_v33 = vmul.f32 0.015625, %v2129_v40 }
 0xf2b   :  { %v2135_v42 = vsub.f32 %v2123_v35, %v2133_v33  ;;  %v2138_v43 = vmul.f32 %v2136_v41, %v2136_v41 }
 0xf2d   :  { %v2142_v44 = vsel %vm118_vm0, %v2138_v43, 0.0  ;;  %v2137_v45 = vmul.f32 %v2135_v42, %v2135_v42 }
 0xf2e   :  { %2143 = vadd.xlane.f32.xlu0 %v2142_v44 }
 0xf2f   :  { %v2139_v55 = vsel %vm118_vm0, %v2137_v45, 0.0 }
 0xf30   :  { %2140 = vadd.xlane.f32.xlu1 %v2139_v55 }
 0xfb7   :  { %v2144_v54 = vpop.xlane.xlu0 %2143 }
 0xfb8   :  { %v2146_v56 = vmul.f32 0.015625, %v2144_v54 }
 0xfb9   :  { %v2141_v57 = vpop.xlane.xlu1 %2140 }
 0xfba   :  { %v2148_v59 = vadd.f32 1e-05, %v2146_v56  ;;  %v2145_v61 = vmul.f32 0.015625, %v2141_v57 }
 0xfbc   :  { %5860 = vrsqrt.f32 %v2148_v59  ;;  %v2147_v62 = vadd.f32 1e-05, %v2145_v61 }
 0xfbe   :  { %5862 = vrsqrt.f32 %v2147_v62 }
 0xfc9   :  { %v5861_v63 = vpop.eup %5860 }
 0xfca   :  { %v2152_v60 = vmul.f32 %v5861_v63, %v2136_v41 }
 0xfcb   :  { %v5863_v1 = vpop.eup %5862 }
 0xfcc   :  { %v2151_v2 = vmul.f32 %v5863_v1, %v2135_v42  ;;  %v2160_v4 = vmul.f32 %v4991_v0, %v2152_v60 }
 0xfce   :  { %v2159_v6 = vmul.f32 %v4991_v0, %v2151_v2  ;;  %v6459_v58 = vadd.f32 %v4992_v5, %v2160_v4 }
 0xfd0   :  { %v6457_v7 = vadd.f32 %v4992_v5, %v2159_v6 }
 0xfd2   :  { %5538 = vmatprep.mubr.msk.f32.mxu1 %vm118_vm0, %v6457_v7 }
 0xfd3   :  { %5539 = vmatmul.mubr.msk.f32.vlgmr.msra.gmra.mxu1 %vm118_vm0, %v6459_v58 }
 0xfd4   :  { %2527 = vmatprep.mubr.f32.mxu1 %v5922_v3 }
0x1093   :  { %v5540_v27 = vpop.f32.mrf.mxu1 }
0x1094   :  { %v2262_v28 = vadd.f32 %v5540_v27, %v4993_v26 }
0x1095   :  { %v2256_v30 = vpop.f32.mrf.mxu1 }
0x1096   :  { %v2266_v31 = vmul.f32 %v2262_v28, %v2262_v28  ;;  %v2257_v32 = vadd.f32 %v4993_v26, %v2256_v30 }
0x1098   :  { %v2268_v35 = vmul.f32 %v2266_v31, %v2262_v28  ;;  %v2265_v36 = vmul.f32 %v2257_v32, %v2257_v32 }
0x109a   :  { %v2270_v38 = vmul.f32 0.044715, %v2268_v35  ;;  %v2267_v39 = vmul.f32 %v2265_v36, %v2257_v32 }
0x109c   :  { %v2272_v40 = vadd.f32 %v2270_v38, %v2262_v28  ;;  %v2269_v41 = vmul.f32 0.044715, %v2267_v39 }
0x109e   :  { %v2274_v33 = vmul.f32 0.7978846, %v2272_v40  ;;  %v2271_v42 = vadd.f32 %v2269_v41, %v2257_v32  ;;  %v4997_v40 = vld [vmem:[%s7062_s21] ss:$0 sm:$0xff] }
0x10a0   :  { %5864 = vtanh.f32 %v2274_v33  ;;  %v2273_v43 = vmul.f32 0.7978846, %v2271_v42  ;;  %v4998_v33 = vld [vmem:[%s7063_s22] ss:$0 sm:$0xff] }
0x10a2   :  { %5866 = vtanh.f32 %v2273_v43 }
0x10ad   :  { %v5865_v44 = vpop.eup %5864 }
0x10ae   :  { %v2278_v45 = vadd.f32 1.0, %v5865_v44 }
0x10af   :  { %v5867_v55 = vpop.eup %5866 }
0x10b0   :  { %v2277_v53 = vadd.f32 1.0, %v5867_v55  ;;  %v2280_v46 = vmul.f32 0.5, %v2278_v45  ;;  %v5015_v45 = vld [vmem:[%s7107_s8 + $0x2] sm:$0x3] }
0x10b1   :  { %v2450_v55 = vrot.slane %v5015_v45, %v110_v21 }
0x10b2   :  { %v2279_v47 = vmul.f32 0.5, %v2277_v53  ;;  %v2282_v49 = vmul.f32 %v2280_v46, %v2262_v28 }
0x10b4   :  { %v2281_v48 = vmul.f32 %v2279_v47, %v2257_v32 }
0x10b6   :  { %5573 = vmatprep.mubr.f32.mxu0 %v2281_v48 }
0x10b7   :  { %5574 = vmatmul.mubr.f32.vlgmr.msra.gmra.mxu0 %v2282_v49 }
0x10b8   :  { %5578 = vmatprep.mubr.msk.f32.mxu0 %vm5923_vm1, %v5922_v3 }
0x1177   :  { %v5575_v51 = vpop.f32.mrf.mxu0 }
0x1178   :  { %v2378_v52 = vadd.f32 %v5575_v51, %v4996_v50 }
0x1179   :  { %v2372_v54 = vpop.f32.mrf.mxu0 }
0x117a   :  { %v2373_v56 = vadd.f32 %v4996_v50, %v2372_v54  ;;  %v2382_v57 = vadd.f32 %v2378_v52, %v6459_v58  ;;  %v2454_v50 = vrot.slane %v5015_v45, %v114_v29 }
0x117c   :  { %v2388_v59 = vsel %vm118_vm0, %v2382_v57, 0.0  ;;  %v2381_v61 = vadd.f32 %v2373_v56, %v6457_v7  ;;  %v5014_v7 = vld [vmem:[%s7105_s9 + $0xf8] sm:$0xff] }
0x117d   :  { %2389 = vadd.xlane.f32.xlu0 %v2388_v59  ;;  %2479 = vmatprep.subr.mxu1 %v5014_v7 }
0x117e   :  { %v2385_v62 = vsel %vm118_vm0, %v2381_v61, 0.0  ;;  %2480 = vmatpush1.msra.mxu1 %v5013_v9 }
0x117f   :  { %2386 = vadd.xlane.f32.xlu1 %v2385_v62  ;;  %2481 = vmatprep.subr.mxu1 %v5012_v10 }
0x1180   :  { %2482 = vmatpush1.msra.mxu1 %v5011_v11 }
0x1181   :  { %2483 = vmatprep.subr.mxu1 %v5010_v12 }
0x1182   :  { %2484 = vmatpush1.msra.mxu1 %v5009_v13 }
0x1183   :  { %2485 = vmatprep.subr.mxu1 %v5008_v18 }
0x1184   :  { %2486 = vmatpush1.msra.mxu1 %v5007_v17 }
0x1185   :  { %2487 = vmatprep.subr.mxu1 %v5006_v14 }
0x1186   :  { %2488 = vmatpush1.msra.mxu1 %v5005_v15 }
0x1187   :  { %2489 = vmatprep.subr.mxu1 %v5004_v16 }
0x1188   :  { %2490 = vmatpush1.msra.mxu1 %v5003_v19 }
0x1189   :  { %2491 = vmatprep.subr.mxu1 %v5002_v22 }
0x118a   :  { %2492 = vmatpush1.msra.mxu1 %v5001_v23 }
0x118b   :  { %2493 = vmatprep.subr.mxu1 %v5000_v24 }
0x118c   :  { %2494 = vmatpush1.msra.mxu1 %v4999_v25 }
0x118d   :  { %5581 = vmatprep.subr.mxu1 %v5922_v3 }
0x1206   :  { %v2390_v63 = vpop.xlane.xlu0 %2389 }
0x1207   :  { %v2392_v0 = vmul.f32 0.015625, %v2390_v63 }
0x1208   :  { %v2387_v60 = vpop.xlane.xlu1 %2386 }
0x1209   :  { %v2394_v1 = vsub.f32 %v2382_v57, %v2392_v0  ;;  %v2391_v2 = vmul.f32 0.015625, %v2387_v60 }
0x120b   :  { %v2393_v4 = vsub.f32 %v2381_v61, %v2391_v2  ;;  %v2396_v5 = vmul.f32 %v2394_v1, %v2394_v1 }
0x120d   :  { %v2400_v6 = vsel %vm118_vm0, %v2396_v5, 0.0  ;;  %v2395_v8 = vmul.f32 %v2393_v4, %v2393_v4 }
0x120e   :  { %2401 = vadd.xlane.f32.xlu0 %v2400_v6 }
0x120f   :  { %v2397_v58 = vsel %vm118_vm0, %v2395_v8, 0.0 }
0x1210   :  { %2398 = vadd.xlane.f32.xlu1 %v2397_v58 }
0x1297   :  { %v2402_v26 = vpop.xlane.xlu0 %2401 }
0x1298   :  { %v2404_v27 = vmul.f32 0.015625, %v2402_v26 }
0x1299   :  { %v2399_v28 = vpop.xlane.xlu1 %2398 }
0x129a   :  { %v2406_v30 = vadd.f32 1e-05, %v2404_v27  ;;  %v2403_v31 = vmul.f32 0.015625, %v2399_v28 }
0x129c   :  { %5868 = vrsqrt.f32 %v2406_v30  ;;  %v2405_v32 = vadd.f32 1e-05, %v2403_v31 }
0x129e   :  { %5870 = vrsqrt.f32 %v2405_v32 }
0x12a9   :  { %v5869_v35 = vpop.eup %5868 }
0x12aa   :  { %v2410_v39 = vmul.f32 %v5869_v35, %v2394_v1 }
0x12ab   :  { %v5871_v36 = vpop.eup %5870 }
0x12ac   :  { %v2409_v38 = vmul.f32 %v5871_v36, %v2393_v4  ;;  %v2418_v43 = vmul.f32 %v4997_v40, %v2410_v39 }
0x12ae   :  { %v2417_v41 = vmul.f32 %v4997_v40, %v2409_v38  ;;  %v6589_v44 = vadd.f32 %v4998_v33, %v2418_v43 }
0x12b0   :  { %v6584_v42 = vadd.f32 %v4998_v33, %v2417_v41 }
0x12b2   :  { %5016 = vmatmul.mubr.msk.f32.vlgmr.msra.gmra.mxu1 %vm118_vm0, %v6584_v42 }
0x12b3   :  { %2533 = vmatprep.mubr.f32.mxu1 %v5922_v3 }
0x12b6   :  { %5017 = vmatmul.mubr.msk.f32.gmra.mxu1 %vm118_vm0, %v6589_v44 }
0x12b7   :  { %5583 = vmatprep.mubr.msk.f32.mxu1 %vm5923_vm1, %v5922_v3 }
0x1372   :  { %v2529_v53 = vpop.f32.mrf.mxu1 }
0x1373   :  { %v2530_v46 = vadd.f32 %v2529_v53, %v2450_v55 }
0x1374   :  { %v2531_v47 = vpop.f32.mrf.mxu1 }
0x1375   :  { %2552 = vrot.lane.b32.xlu1 %v2530_v46, %s7115_s25  ;;  %v6606_v52 = vadd.f32 %v2531_v47, %v2454_v50 }
0x1376   :  { %v2535_v48 = vpop.f32.mrf.mxu1 }
0x1377   :  { %v2536_v49 = vadd.f32 %v2535_v48, %v2450_v55 }
0x1378   :  { %v2537_v21 = vpop.f32.mrf.mxu1 }
0x1379   :  { %2629 = vrot.lane.b32.xlu0 %v2536_v49, %s7115_s25  ;;  %v6614_v29 = vadd.f32 %v2537_v21, %v2454_v50 }
0x13e7   :  { %v2553_v51 = vpop.permute.xlu1 %2552 }
0x13e8   :  { %5577 = vmatpush3.xpose.msk.msra.mxu0 %vm214_vm2, %v2553_v51 }
0x13e9   :  { %5586 = vmatprep.subr.mxu0 %v5922_v3 }
0x13eb   :  { %v2630_v54 = vpop.permute.xlu0 %2629  ;;  %5579 = vmatmul.mubr.msk.f32.vlgmr.msra.gmra.mxu0 %vm214_vm2, %v2530_v46 }
0x13ec   :  { %5582 = vmatpush3.xpose.msk.msra.mxu1 %vm214_vm2, %v2630_v54  ;;  %5587 = vmatpush3.msra.mxu0 %v6606_v52 }
0x13ed   :  { %5591 = vmatprep.subr.mxu1 %v5922_v3  ;;  %5588 = vmatprep.mubr.msk.f32.mxu0 %vm5923_vm1, %v5922_v3 }
0x13ee   :  { %5596 = vmatprep.subr.mxu0 %v5922_v3 }
0x13ef   :  { %5584 = vmatmul.mubr.msk.f32.vlgmr.msra.gmra.mxu1 %vm214_vm2, %v2536_v49 }
0x13f0   :  { %5592 = vmatpush3.msra.mxu1 %v6614_v29  ;;  %5593 = vmatprep.mubr.msk.f32.mxu1 %vm5923_vm1, %v5922_v3 }
0x13f1   :  { %5601 = vmatprep.subr.mxu1 %v5922_v3 }
0x14ab   :  { %v2624_v56 = vpop.f32.mrf.mxu0 }
0x14ac   :  { %v2705_v57 = vmul.f32 0.17677669, %v2624_v56  ;;  %v5021_v56 = vld [vmem:[%s7108_s2 + $0x58] sm:$0xff] }
0x14ad   :  { %v5580_v59 = vpop.f32.mrf.mxu0 }
0x14ae   :  { %v2707_v61 = vadd.f32 %v2705_v57, %v6162_v37 }
0x14af   :  { %v2701_v62 = vpop.f32.mrf.mxu1 }
0x14b0   :  { %v2706_v63 = vmul.f32 0.17677669, %v2701_v62  ;;  %v2709_v0 = vsel %vm370_vm4, %v2707_v61, -inf }
0x14b1   :  { %v5585_v60 = vpop.f32.mrf.mxu1  ;;  %2710 = vmax.xlane.f32.xlu1 %v2709_v0  ;;  %v5020_v0 = vld [vmem:[%s7108_s2 + $0x50] sm:$0xff] }
0x14b2   :  { %v2708_v1 = vadd.f32 %v2706_v63, %v6162_v37  ;;  %v5019_v60 = vld [vmem:[%s7108_s2 + $0x48] sm:$0xff] }
0x14b4   :  { %v2712_v2 = vsel %vm370_vm4, %v2708_v1, -inf }
0x14b5   :  { %2713 = vmax.xlane.f32.xlu0 %v2712_v2  ;;  %v5920_v2 = vld [vmem:[%s7112_s6] sm:$0xff] }
0x14c2   :  { %2879 = vrot.lane.b32.xlu1 %v2530_v46, %s7117_s1 }
0x153a   :  { %v2711_v4 = vpop.xlane.xlu1 %2710 }
0x153b   :  { %v2715_v5 = vsub.f32 %v2707_v61, %v2711_v4  ;;  %v5023_v4 = vld [vmem:[%s7108_s2 + $0x68] sm:$0xff] }
0x153d   :  { %v2717_v6 = vmul.f32 1.442695, %v2715_v5  ;;  %v5022_v5 = vld [vmem:[%s7108_s2 + $0x60] sm:$0xff] }
0x153e   :  { %v2714_v8 = vpop.xlane.xlu0 %2713  ;;  %v2880_v13 = vpop.permute.xlu1 %2879 }
0x153f   :  { %5872 = vpow2.f32 %v2717_v6  ;;  %v2716_v58 = vsub.f32 %v2708_v1, %v2714_v8  ;;  %v5018_v1 = vld [vmem:[%s7108_s2 + $0x40] sm:$0xff] }
0x1541   :  { %v2719_v7 = vmul.f32 1.442695, %v2716_v58 }
0x1543   :  { %5874 = vpow2.f32 %v2719_v7 }
0x154c   :  { %v5873_v9 = vpop.eup %5872 }
0x154d   :  { %v2721_v10 = vsel %vm370_vm4, %v5873_v9, 0.0 }
0x154e   :  { %2722 = vadd.xlane.f32.xlu1 %v2721_v10  ;;  %v5043_v10 = vld [vmem:[%s7109_s4 + $0x1] ss:$0 sm:$0xff] }
0x1550   :  { %v5875_v11 = vpop.eup %5874 }
0x1551   :  { %v2724_v12 = vsel %vm370_vm4, %v5875_v11, 0.0 }
0x1552   :  { %2725 = vadd.xlane.f32.xlu0 %v2724_v12 }
0x155f   :  { %2877 = vrot.lane.b32.xlu1 %v2530_v46, %s7116_s5 }
0x1563   :  { %2955 = vrot.lane.b32.xlu1 %v2536_v49, %s7116_s5 }
0x1568   :  { %2957 = vrot.lane.b32.xlu0 %v2536_v49, %s7117_s1 }
0x15d7   :  { %v2723_v18 = vpop.xlane.xlu1 %2722 }
0x15d8   :  { %5876 = vrcp.f32 %v2723_v18 }
0x15db   :  { %v2726_v17 = vpop.xlane.xlu0 %2725  ;;  %v2878_v19 = vpop.permute.xlu1 %2877 }
0x15dc   :  { %5878 = vrcp.f32 %v2726_v17 }
0x15df   :  { %v2958_v23 = vpop.permute.xlu0 %2957  ;;  %v2956_v24 = vpop.permute.xlu1 %2955 }
0x15e5   :  { %v5877_v14 = vpop.eup %5876 }
0x15e6   :  { %v2729_v15 = vmul.f32 %v5877_v14, %v5873_v9 }
0x15e8   :  { %5589 = vmatmul.mubr.msk.f32.vlgmr.msra.gmra.mxu0 %vm370_vm4, %v2729_v15 }
0x15e9   :  { %v5879_v16 = vpop.eup %5878  ;;  %5597 = vmatpush3.xpose.msk.msra.mxu0 %vm214_vm2, %v2880_v13  ;;  %5598 = vmatprep.mubr.msk.f32.mxu0 %vm5923_vm1, %v5922_v3 }
0x15ea   :  { %v2730_v22 = vmul.f32 %v5879_v16, %v5875_v11  ;;  %5606 = vmatprep.subr.mxu0 %v5922_v3 }
0x15ec   :  { %5594 = vmatmul.mubr.msk.f32.vlgmr.msra.gmra.mxu1 %vm370_vm4, %v2730_v22  ;;  %5599 = vmatmul.mubr.msk.f32.vlgmr.msra.gmra.mxu0 %vm214_vm2, %v2878_v19 }
0x15ed   :  { %5602 = vmatpush3.xpose.msk.msra.mxu1 %vm214_vm2, %v2958_v23  ;;  %5603 = vmatprep.mubr.msk.f32.mxu1 %vm5923_vm1, %v5922_v3 }
0x15ee   :  { %5611 = vmatprep.subr.mxu1 %v5922_v3  ;;  %5608 = vmatprep.mubr.msk.f32.mxu0 %vm5923_vm1, %v5922_v3 }
0x15f0   :  { %5604 = vmatmul.mubr.msk.f32.vlgmr.msra.gmra.mxu1 %vm214_vm2, %v2956_v24 }
0x15f1   :  { %5613 = vmatprep.mubr.msk.f32.mxu1 %vm5923_vm1, %v5922_v3 }
0x16a8   :  { %v2800_v25 = vpop.f32.mrf.mxu0 }
0x16aa   :  { %v5590_v26 = vpop.f32.mrf.mxu0 }
0x16ac   :  { %v6648_v27 = vpop.f32.mrf.mxu1  ;;  %v2951_v28 = vpop.f32.mrf.mxu0 }
0x16ad   :  { %v3033_v30 = vmul.f32 0.17677669, %v2951_v28 }
0x16ae   :  { %v5595_v31 = vpop.f32.mrf.mxu1  ;;  %v5600_v32 = vpop.f32.mrf.mxu0 }
0x16af   :  { %v3035_v35 = vadd.f32 %v3033_v30, %v6162_v37 }
0x16b0   :  { %v3029_v36 = vpop.f32.mrf.mxu1 }
0x16b1   :  { %v3034_v38 = vmul.f32 0.17677669, %v3029_v36  ;;  %v3037_v39 = vsel %vm370_vm4, %v3035_v35, -inf  ;;  %v5066_v36 = vld [vmem:[%s7110_s26 + $0x70] sm:$0xff] }
0x16b2   :  { %v5605_v40 = vpop.f32.mrf.mxu1  ;;  %3038 = vmax.xlane.f32.xlu0 %v3037_v39  ;;  %v5054_v39 = vld [vmem:[%s7111_s29 + $0x70] sm:$0xff] }
0x16b3   :  { %v3036_v41 = vadd.f32 %v3034_v38, %v6162_v37  ;;  %v5055_v38 = vld [vmem:[%s7111_s29 + $0x78] sm:$0xff]  ;;  %v5065_v40 = vld [vmem:[%s7110_s26 + $0x68] sm:$0xff] }
0x16b5   :  { %v3040_v33 = vsel %vm370_vm4, %v3036_v41, -inf }
0x16b6   :  { %3041 = vmax.xlane.f32.xlu1 %v3040_v33  ;;  %v5064_v33 = vld [vmem:[%s7110_s26 + $0x60] sm:$0xff] }
0x16c7   :  { %3060 = vrot.lane.b32.xlu1 %v6606_v52, %s7116_s5  ;;  %v5025_v52 = vld [vmem:[%s7108_s2 + $0x78] sm:$0xff] }
0x173b   :  { %v3039_v43 = vpop.xlane.xlu0 %3038 }
0x173c   :  { %v3043_v45 = vsub.f32 %v3035_v35, %v3039_v43  ;;  %v5067_v35 = vld [vmem:[%s7110_s26 + $0x78] sm:$0xff]  ;;  %v5052_v43 = vld [vmem:[%s7111_s29 + $0x60] sm:$0xff] }
0x173e   :  { %v3045_v55 = vmul.f32 1.442695, %v3043_v45  ;;  %v5063_v45 = vld [vmem:[%s7110_s26 + $0x58] sm:$0xff] }
0x173f   :  { %v3042_v53 = vpop.xlane.xlu1 %3041 }
0x1740   :  { %5880 = vpow2.f32 %v3045_v55  ;;  %v3044_v46 = vsub.f32 %v3036_v41, %v3042_v53  ;;  %v5053_v41 = vld [vmem:[%s7111_s29 + $0x68] sm:$0xff]  ;;  %v5051_v55 = vld [vmem:[%s7111_s29 + $0x58] sm:$0xff]  ;;  %v5062_v53 = vld [vmem:[%s7110_s26 + $0x50] sm:$0xff] }
0x1742   :  { %v3047_v47 = vmul.f32 1.442695, %v3044_v46  ;;  %v5050_v46 = vld [vmem:[%s7111_s29 + $0x50] sm:$0xff] }
0x1743   :  { %v3061_v48 = vpop.permute.xlu1 %3060 }
0x1744   :  { %5882 = vpow2.f32 %v3047_v47  ;;  %5607 = vmatpush3.msra.mxu0 %v3061_v48  ;;  %v5061_v47 = vld [vmem:[%s7110_s26 + $0x48] sm:$0xff] }
0x1745   :  { %5616 = vmatprep.subr.mxu0 %v5025_v52  ;;  %v5049_v48 = vld [vmem:[%s7111_s29 + $0x48] sm:$0xff] }
0x174d   :  { %v5881_v49 = vpop.eup %5880 }
0x174e   :  { %v3049_v50 = vsel %vm370_vm4, %v5881_v49, 0.0 }
0x174f   :  { %3050 = vadd.xlane.f32.xlu0 %v3049_v50  ;;  %v5048_v50 = vld [vmem:[%s7111_s29 + $0x40] sm:$0xff]  ;;  %s7123_s29 = sld [smem:[#allocation19_spill]] }
0x1751   :  { %v5883_v37 = vpop.eup %5882 }
0x1752   :  { %v3052_v51 = vsel %vm370_vm4, %v5883_v37, 0.0 }
0x1753   :  { %3053 = vadd.xlane.f32.xlu0 %v3052_v51 }
0x1769   :  { %3137 = vrot.lane.b32.xlu0 %v6614_v29, %s7116_s5  ;;  %v5024_v29 = vld [vmem:[%s7108_s2 + $0x70] sm:$0xff] }
0x17d8   :  { %v3051_v21 = vpop.xlane.xlu0 %3050 }
0x17d9   :  { %5884 = vrcp.f32 %v3051_v21 }
0x17dc   :  { %v3054_v54 = vpop.xlane.xlu0 %3053 }
0x17dd   :  { %5886 = vrcp.f32 %v3054_v54 }
0x17e0   :  { %v3138_v57 = vpop.permute.xlu0 %3137 }
0x17e1   :  { %5612 = vmatpush3.msra.mxu1 %v3138_v57 }
0x17e2   :  { %5627 = vmatprep.subr.mxu1 %v5021_v56 }
0x17e6   :  { %v5885_v59 = vpop.eup %5884 }
0x17e7   :  { %v3057_v61 = vmul.f32 %v5885_v59, %v5881_v49  ;;  %v5060_v49 = vld [vmem:[%s7110_s26 + $0x40] sm:$0xff]  ;;  %s7119_s26 = sld [smem:[#allocation15_spill]] }
0x17e9   :  { %5609 = vmatmul.mubr.msk.f32.vlgmr.msra.gmra.mxu0 %vm370_vm4, %v3057_v61  ;;  %v5046_v61 = vld [vmem:[%s7113_s30 + $0x1] ss:$0 sm:$0xff] }
0x17ea   :  { %v5887_v62 = vpop.eup %5886  ;;  %5617 = vmatpush3.msra.mxu0 %v5025_v52 }
0x17eb   :  { %v3058_v63 = vmul.f32 %v5887_v62, %v5883_v37  ;;  %5618 = vmatprep.subr.mxu0 %v5024_v29  ;;  %v5921_v37 = vld [vmem:[%s7112_s6 + $0x8] sm:$0xff]  ;;  %s7118_s6 = sld [smem:[#allocation14_spill]] }
0x17ec   :  { %5619 = vmatpush3.msra.mxu0 %v5024_v29 }
0x17ed   :  { %5614 = vmatmul.mubr.msk.f32.vlgmr.msra.gmra.mxu1 %vm370_vm4, %v3058_v63  ;;  %5620 = vmatprep.subr.mxu0 %v5023_v4 }
0x17ee   :  { %5628 = vmatpush3.msra.mxu1 %v5021_v56  ;;  %5635 = vmatprep.mubr.msk.f32.mxu1 %vm214_vm2, %v2800_v25 }
0x17ef   :  { %5629 = vmatprep.subr.mxu1 %v5020_v0  ;;  %5621 = vmatpush3.msra.mxu0 %v5023_v4 }
0x17f0   :  { %5630 = vmatpush3.msra.mxu1 %v5020_v0  ;;  %5622 = vmatprep.subr.mxu0 %v5022_v5 }
0x17f1   :  { %5631 = vmatprep.subr.mxu1 %v5019_v60  ;;  %5623 = vmatpush3.msra.mxu0 %v5022_v5  ;;  %v5069_v5 = vld [vmem:[%s7052_s12 + $0x1] ss:$0 sm:$0xff] }
0x17f2   :  { %5632 = vmatpush3.msra.mxu1 %v5019_v60  ;;  %5638 = vmatprep.subr.mxu0 %v5055_v38  ;;  %v5047_v60 = vld [vmem:[%s7114_s7 + $0x1] ss:$0 sm:$0xff] }
0x17f3   :  { %5633 = vmatprep.subr.mxu1 %v5018_v1 }
0x17f4   :  { %5634 = vmatpush3.msra.mxu1 %v5018_v1 }
0x17f5   :  { %5636 = vmatmul.mubr.msk.f32.vlgmr.msra.gmra.mxu1 %vm214_vm2, %v6648_v27  ;;  %5657 = vmatprep.subr.mxu1 %v5067_v35 }
0x17f6   :  { %5673 = vmatprep.mubr.msk.f32.mxu1 %vm118_vm0, %v5920_v2  ;;  %5658 = vmatpush3.msra.mxu1 %v5067_v35 }
0x17f7   :  { %5659 = vmatprep.subr.mxu1 %v5066_v36 }
0x17f8   :  { %5660 = vmatpush3.msra.mxu1 %v5066_v36 }
0x17f9   :  { %5661 = vmatprep.subr.mxu1 %v5065_v40 }
0x17fa   :  { %5662 = vmatpush3.msra.mxu1 %v5065_v40 }
0x17fb   :  { %5663 = vmatprep.subr.mxu1 %v5064_v33 }
0x17fc   :  { %5664 = vmatpush3.msra.mxu1 %v5064_v33 }
0x17fd   :  { %5665 = vmatprep.subr.mxu1 %v5063_v45 }
0x17fe   :  { %5666 = vmatpush3.msra.mxu1 %v5063_v45 }
0x17ff   :  { %5667 = vmatprep.subr.mxu1 %v5062_v53 }
0x1800   :  { %5668 = vmatpush3.msra.mxu1 %v5062_v53 }
0x1801   :  { %5669 = vmatprep.subr.mxu1 %v5061_v47 }
0x1802   :  { %5670 = vmatpush3.msra.mxu1 %v5061_v47 }
0x1803   :  { %5671 = vmatprep.subr.mxu1 %v5060_v49 }
0x1804   :  { %5672 = vmatpush3.msra.mxu1 %v5060_v49 }
0x1805   :  { %5674 = vmatmul.mubr.msk.f32.vlgmr.msra.gmra.mxu1 %vm118_vm0, %v5921_v37  ;;  %5681 = vmatprep.subr.mxu1 %v5922_v3 }
0x1806   :  { %5683 = vmatprep.mubr.msk.f32.mxu1 %vm5923_vm1, %v5922_v3 }
0x18a9   :  { %v3132_v6 = vpop.f32.mrf.mxu0 }
0x18aa   :  { %5624 = vmatprep.mubr.msk.f32.mxu0 %vm214_vm2, %v3132_v6 }
0x18ab   :  { %v5610_v8 = vpop.f32.mrf.mxu0 }
0x18ad   :  { %v3209_v58 = vpop.f32.mrf.mxu1 }
0x18ae   :  { %5625 = vmatmul.mubr.msk.f32.vlgmr.msra.gmra.mxu0 %vm214_vm2, %v3209_v58 }
0x18af   :  { %v5615_v7 = vpop.f32.mrf.mxu1  ;;  %5639 = vmatpush3.msra.mxu0 %v5055_v38 }
0x18b0   :  { %5640 = vmatprep.subr.mxu0 %v5054_v39 }
0x18b1   :  { %5641 = vmatpush3.msra.mxu0 %v5054_v39 }
0x18b2   :  { %5642 = vmatprep.subr.mxu0 %v5053_v41 }
0x18b3   :  { %5643 = vmatpush3.msra.mxu0 %v5053_v41 }
0x18b4   :  { %5644 = vmatprep.subr.mxu0 %v5052_v43 }
0x18b5   :  { %v5637_v9 = vpop.f32.mrf.mxu1  ;;  %5645 = vmatpush3.msra.mxu0 %v5052_v43 }
0x18b6   :  { %5646 = vmatprep.subr.mxu0 %v5051_v55 }
0x18b7   :  { %v3366_v13 = vpop.f32.mrf.mxu1  ;;  %5647 = vmatpush3.msra.mxu0 %v5051_v55 }
0x18b8   :  { %5648 = vmatprep.subr.mxu0 %v5050_v46 }
0x18b9   :  { %5649 = vmatpush3.msra.mxu0 %v5050_v46 }
0x18ba   :  { %5650 = vmatprep.subr.mxu0 %v5049_v48 }
0x18bb   :  { %5651 = vmatpush3.msra.mxu0 %v5049_v48 }
0x18bc   :  { %5652 = vmatprep.subr.mxu0 %v5048_v50 }
0x18bd   :  { %5653 = vmatpush3.msra.mxu0 %v5048_v50 }
0x18be   :  { %5676 = vmatprep.subr.mxu0 %v5922_v3 }
0x18c5   :  { %v5675_v6 = vpop.f32.mrf.mxu1 }
0x18c6   :  { %v6789_v8 = vadd.f32 %v5675_v6, %v5069_v5 }
0x18c7   :  { %v3612_v58 = vpop.f32.mrf.mxu1 }
0x18c8   :  { %v6791_v7 = vadd.f32 %v5069_v5, %v3612_v58  ;;  %5682 = vmatpush3.xpose.msk.msra.mxu1 %vm214_vm2, %v6789_v8 }
0x18c9   :  { %5691 = vmatprep.subr.mxu1 %v5922_v3 }
0x196e   :  { %v5626_v11 = vpop.f32.mrf.mxu0 }
0x196f   :  { %v3372_v12 = vadd.f32 %v5637_v9, %v5626_v11  ;;  %v5057_v9 = vld [vmem:[%s7053_s10 + $0x1] ss:$0 sm:$0xff] }
0x1970   :  { %v3285_v18 = vpop.f32.mrf.mxu0 }
0x1971   :  { %v3382_v17 = vadd.f32 %v5043_v10, %v3372_v12  ;;  %v3367_v14 = vadd.f32 %v3366_v13, %v3285_v18 }
0x1973   :  { %v3381_v15 = vadd.f32 %v5043_v10, %v3367_v14  ;;  %v3384_v16 = vadd.f32 %v3382_v17, %v6589_v44 }
0x1975   :  { %v3392_v19 = vsel %vm118_vm0, %v3384_v16, 0.0  ;;  %v3383_v22 = vadd.f32 %v3381_v15, %v6584_v42 }
0x1976   :  { %3393 = vadd.xlane.f32.xlu0 %v3392_v19 }
0x1977   :  { %v3389_v23 = vsel %vm118_vm0, %v3383_v22, 0.0 }
0x1978   :  { %3390 = vadd.xlane.f32.xlu1 %v3389_v23 }
0x19ff   :  { %v3394_v24 = vpop.xlane.xlu0 %3393 }
0x1a00   :  { %v3396_v25 = vmul.f32 0.015625, %v3394_v24 }
0x1a01   :  { %v3391_v26 = vpop.xlane.xlu1 %3390 }
0x1a02   :  { %v6702_v27 = vsub.f32 %v3384_v16, %v3396_v25  ;;  %v3395_v28 = vmul.f32 0.015625, %v3391_v26 }
0x1a04   :  { %v6704_v30 = vsub.f32 %v3383_v22, %v3395_v28  ;;  %v3400_v31 = vmul.f32 %v6702_v27, %v6702_v27 }
0x1a06   :  { %v3404_v44 = vsel %vm118_vm0, %v3400_v31, 0.0  ;;  %v3399_v42 = vmul.f32 %v6704_v30, %v6704_v30 }
0x1a07   :  { %3405 = vadd.xlane.f32.xlu0 %v3404_v44 }
0x1a08   :  { %v3401_v32 = vsel %vm118_vm0, %v3399_v42, 0.0 }
0x1a09   :  { %3402 = vadd.xlane.f32.xlu1 %v3401_v32 }
0x1a90   :  { %v3406_v51 = vpop.xlane.xlu0 %3405 }
0x1a91   :  { %v3408_v52 = vmul.f32 0.015625, %v3406_v51 }
0x1a92   :  { %v3403_v21 = vpop.xlane.xlu1 %3402 }
0x1a93   :  { %v3410_v54 = vadd.f32 1e-05, %v3408_v52  ;;  %v3407_v56 = vmul.f32 0.015625, %v3403_v21 }
0x1a95   :  { %5888 = vrsqrt.f32 %v3410_v54  ;;  %v3409_v57 = vadd.f32 1e-05, %v3407_v56 }
0x1a97   :  { %5890 = vrsqrt.f32 %v3409_v57 }
0x1aa2   :  { %v5889_v59 = vpop.eup %5888 }
0x1aa3   :  { %v3414_v29 = vmul.f32 %v5889_v59, %v6702_v27 }
0x1aa4   :  { %v5891_v62 = vpop.eup %5890 }
0x1aa5   :  { %v3413_v63 = vmul.f32 %v5891_v62, %v6704_v30  ;;  %v3422_v0 = vmul.f32 %v5046_v61, %v3414_v29 }
0x1aa7   :  { %v3421_v1 = vmul.f32 %v5046_v61, %v3413_v63  ;;  %v6778_v4 = vadd.f32 %v5047_v60, %v3422_v0 }
0x1aa9   :  { %v6776_v2 = vadd.f32 %v5047_v60, %v3421_v1 }
0x1aab   :  { %5654 = vmatprep.mubr.msk.f32.mxu0 %vm118_vm0, %v6776_v2 }
0x1aac   :  { %5655 = vmatmul.mubr.msk.f32.vlgmr.msra.gmra.mxu0 %vm118_vm0, %v6778_v4 }
0x1aad   :  { %5678 = vmatprep.mubr.msk.f32.mxu0 %vm5923_vm1, %v5922_v3  ;;  %5677 = vmatpush3.xpose.msk.msra.mxu0 %vm214_vm2, %v6791_v7 }
0x1aae   :  { %5686 = vmatprep.subr.mxu0 %v5922_v3 }
0x1b6c   :  { %v5656_v10 = vpop.f32.mrf.mxu0 }
0x1b6d   :  { %v3526_v11 = vadd.f32 %v5656_v10, %v5057_v9 }
0x1b6e   :  { %v3520_v12 = vpop.f32.mrf.mxu0 }
0x1b6f   :  { %v3521_v13 = vadd.f32 %v5057_v9, %v3520_v12  ;;  %5684 = vmatmul.mubr.msk.f32.vlgmr.msra.gmra.mxu1 %vm214_vm2, %v3526_v11  ;;  %v5075_v12 = vld [vmem:[%s7054_s13 + $0x58] sm:$0xff] }
0x1b70   :  { %5693 = vmatprep.mubr.msk.f32.mxu1 %vm5923_vm1, %v5922_v3 }
0x1b71   :  { %5679 = vmatmul.mubr.msk.f32.vlgmr.msra.gmra.mxu0 %vm214_vm2, %v3521_v13 }
0x1b72   :  { %5688 = vmatprep.mubr.msk.f32.mxu0 %vm5923_vm1, %v5922_v3 }
0x1c2f   :  { %v3780_v18 = vpop.f32.mrf.mxu1 }
0x1c30   :  { %v3785_v17 = vmul.f32 0.17677669, %v3780_v18 }
0x1c31   :  { %v3704_v14 = vpop.f32.mrf.mxu0  ;;  %v5685_v15 = vpop.f32.mrf.mxu1 }
0x1c32   :  { %v3784_v16 = vmul.f32 0.17677669, %v3704_v14  ;;  %v3789_v19 = vsel %vm370_vm4, %v3785_v17, -inf  ;;  %v5073_v15 = vld [vmem:[%s7054_s13 + $0x48] sm:$0xff] }
0x1c33   :  { %3790 = vmax.xlane.f32.xlu0 %v3789_v19  ;;  %v5680_v22 = vpop.f32.mrf.mxu0  ;;  %v5072_v19 = vld [vmem:[%s7054_s13 + $0x40] sm:$0xff] }
0x1c34   :  { %v3786_v23 = vsel %vm370_vm4, %v3784_v16, -inf  ;;  %v5078_v22 = vld [vmem:[%s7054_s13 + $0x70] sm:$0xff] }
0x1c35   :  { %3787 = vmax.xlane.f32.xlu1 %v3786_v23  ;;  %v5077_v23 = vld [vmem:[%s7054_s13 + $0x68] sm:$0xff] }
0x1c46   :  { %3808 = vrot.lane.b32.xlu1 %v6791_v7, %s7115_s25 }
0x1c49   :  { %3884 = vrot.lane.b32.xlu0 %v6789_v8, %s7115_s25 }
0x1c4a   :  { %3962 = vrot.lane.b32.xlu1 %v6791_v7, %s7116_s5 }
0x1c4e   :  { %4040 = vrot.lane.b32.xlu1 %v6789_v8, %s7116_s5 }
0x1cbc   :  { %v3791_v24 = vpop.xlane.xlu0 %3790 }
0x1cbd   :  { %v3793_v25 = vsub.f32 %v3785_v17, %v3791_v24  ;;  %v5076_v24 = vld [vmem:[%s7054_s13 + $0x60] sm:$0xff] }
0x1cbe   :  { %v3788_v26 = vpop.xlane.xlu1 %3787 }
0x1cbf   :  { %v3796_v27 = vmul.f32 1.442695, %v3793_v25  ;;  %v3792_v28 = vsub.f32 %v3784_v16, %v3788_v26 }
0x1cc0   :  { %v3885_v30 = vpop.permute.xlu0 %3884 }
0x1cc1   :  { %5892 = vpow2.f32 %v3796_v27  ;;  %v3794_v31 = vmul.f32 1.442695, %v3792_v28  ;;  %5692 = vmatpush3.msra.mxu1 %v3885_v30 }
0x1cc2   :  { %v3809_v44 = vpop.permute.xlu1 %3808  ;;  %5701 = vmatprep.subr.mxu1 %v5922_v3 }
0x1cc3   :  { %5894 = vpow2.f32 %v3794_v31  ;;  %5687 = vmatpush3.msra.mxu0 %v3809_v44  ;;  %v5097_v31 = vld [vmem:[%s7118_s6 + $0x1] ss:$0 sm:$0xff]  ;;  %s7124_s6 = sld [smem:[#allocation20_spill]] }
0x1cc4   :  { %5696 = vmatprep.subr.mxu0 %v5922_v3 }
0x1cc6   :  { %v3963_v38 = vpop.permute.xlu1 %3962 }
0x1cca   :  { %v4041_v39 = vpop.permute.xlu1 %4040 }
0x1cce   :  { %v5893_v42 = vpop.eup %5892 }
0x1ccf   :  { %v3801_v32 = vsel %vm370_vm4, %v5893_v42, 0.0 }
0x1cd0   :  { %v5895_v35 = vpop.eup %5894  ;;  %3802 = vadd.xlane.f32.xlu0 %v3801_v32 }
0x1cd1   :  { %v3798_v36 = vsel %vm370_vm4, %v5895_v35, 0.0 }
0x1cd2   :  { %3799 = vadd.xlane.f32.xlu1 %v3798_v36 }
0x1ce3   :  { %4038 = vrot.lane.b32.xlu1 %v3526_v11, %s7116_s5 }
0x1ce6   :  { %3960 = vrot.lane.b32.xlu0 %v3521_v13, %s7116_s5  ;;  %s7122_s5 = sld [smem:[#allocation18_spill]] }
0x1d59   :  { %v3803_v40 = vpop.xlane.xlu0 %3802 }
0x1d5a   :  { %5896 = vrcp.f32 %v3803_v40 }
0x1d5b   :  { %v3800_v41 = vpop.xlane.xlu1 %3799 }
0x1d5c   :  { %5898 = vrcp.f32 %v3800_v41 }
0x1d5d   :  { %v3961_v46 = vpop.permute.xlu0 %3960 }
0x1d5f   :  { %v4039_v53 = vpop.permute.xlu1 %4038 }
0x1d67   :  { %v5897_v33 = vpop.eup %5896 }
0x1d68   :  { %v3807_v43 = vmul.f32 %v5897_v33, %v5893_v42 }
0x1d69   :  { %v5899_v45 = vpop.eup %5898 }
0x1d6a   :  { %5694 = vmatmul.mubr.msk.f32.vlgmr.msra.gmra.mxu1 %vm370_vm4, %v3807_v43  ;;  %v3806_v55 = vmul.f32 %v5899_v45, %v5895_v35 }
0x1d6b   :  { %5702 = vmatpush3.xpose.msk.msra.mxu1 %vm214_vm2, %v4041_v39  ;;  %5703 = vmatprep.mubr.msk.f32.mxu1 %vm5923_vm1, %v5922_v3 }
0x1d6c   :  { %5689 = vmatmul.mubr.msk.f32.vlgmr.msra.gmra.mxu0 %vm370_vm4, %v3806_v55  ;;  %5711 = vmatprep.subr.mxu1 %v5922_v3 }
0x1d6d   :  { %5697 = vmatpush3.xpose.msk.msra.mxu0 %vm214_vm2, %v3963_v38  ;;  %5698 = vmatprep.mubr.msk.f32.mxu0 %vm5923_vm1, %v5922_v3 }
0x1d6e   :  { %5704 = vmatmul.mubr.msk.f32.vlgmr.msra.gmra.mxu1 %vm214_vm2, %v4039_v53  ;;  %5706 = vmatprep.subr.mxu0 %v5922_v3 }
0x1d6f   :  { %5713 = vmatprep.mubr.msk.f32.mxu1 %vm5923_vm1, %v5922_v3 }
0x1d70   :  { %5699 = vmatmul.mubr.msk.f32.vlgmr.msra.gmra.mxu0 %vm214_vm2, %v3961_v46 }
0x1d71   :  { %5708 = vmatprep.mubr.msk.f32.mxu0 %vm5923_vm1, %v5922_v3 }
0x1e2a   :  { %v3956_v47 = vpop.f32.mrf.mxu1 }
0x1e2c   :  { %v3880_v48 = vpop.f32.mrf.mxu0  ;;  %v5695_v49 = vpop.f32.mrf.mxu1 }
0x1e2e   :  { %v5690_v50 = vpop.f32.mrf.mxu0  ;;  %v4112_v37 = vpop.f32.mrf.mxu1 }
0x1e2f   :  { %v4117_v51 = vmul.f32 0.17677669, %v4112_v37 }
0x1e30   :  { %v4034_v52 = vpop.f32.mrf.mxu0  ;;  %v5705_v21 = vpop.f32.mrf.mxu1 }
0x1e31   :  { %v4116_v54 = vmul.f32 0.17677669, %v4034_v52  ;;  %v4121_v56 = vsel %vm370_vm4, %v4117_v51, -inf  ;;  %v5107_v52 = vld [vmem:[%s7056_s17 + $0x68] sm:$0xff]  ;;  %v5106_v21 = vld [vmem:[%s7056_s17 + $0x60] sm:$0xff] }
0x1e32   :  { %4122 = vmax.xlane.f32.xlu1 %v4121_v56  ;;  %v5700_v57 = vpop.f32.mrf.mxu0  ;;  %v5104_v56 = vld [vmem:[%s7056_s17 + $0x50] sm:$0xff] }
0x1e33   :  { %v4118_v59 = vsel %vm370_vm4, %v4116_v54, -inf  ;;  %v5103_v57 = vld [vmem:[%s7056_s17 + $0x48] sm:$0xff] }
0x1e34   :  { %4119 = vmax.xlane.f32.xlu0 %v4118_v59  ;;  %v5102_v59 = vld [vmem:[%s7056_s17 + $0x40] sm:$0xff] }
0x1e43   :  { %4140 = vrot.lane.b32.xlu1 %v6791_v7, %s7117_s1  ;;  %v5079_v7 = vld [vmem:[%s7054_s13 + $0x78] sm:$0xff] }
0x1ebb   :  { %v4123_v61 = vpop.xlane.xlu1 %4122 }
0x1ebc   :  { %v4125_v29 = vsub.f32 %v4117_v51, %v4123_v61  ;;  %v5108_v51 = vld [vmem:[%s7056_s17 + $0x70] sm:$0xff] }
0x1ebd   :  { %v4120_v62 = vpop.xlane.xlu0 %4119 }
0x1ebe   :  { %v4128_v63 = vmul.f32 1.442695, %v4125_v29  ;;  %v4124_v0 = vsub.f32 %v4116_v54, %v4120_v62  ;;  %v5105_v54 = vld [vmem:[%s7056_s17 + $0x58] sm:$0xff] }
0x1ebf   :  { %v4141_v60 = vpop.permute.xlu1 %4140 }
0x1ec0   :  { %5900 = vpow2.f32 %v4128_v63  ;;  %v4126_v1 = vmul.f32 1.442695, %v4124_v0  ;;  %5707 = vmatpush3.msra.mxu0 %v4141_v60 }
0x1ec1   :  { %5716 = vmatprep.subr.mxu0 %v5079_v7 }
0x1ec2   :  { %5902 = vpow2.f32 %v4126_v1 }
0x1ecd   :  { %v5901_v5 = vpop.eup %5900 }
0x1ece   :  { %v4133_v6 = vsel %vm370_vm4, %v5901_v5, 0.0 }
0x1ecf   :  { %v5903_v58 = vpop.eup %5902  ;;  %4134 = vadd.xlane.f32.xlu0 %v4133_v6 }
0x1ed0   :  { %v4130_v9 = vsel %vm370_vm4, %v5903_v58, 0.0 }
0x1ed3   :  { %4131 = vadd.xlane.f32.xlu0 %v4130_v9 }
0x1ee9   :  { %4216 = vrot.lane.b32.xlu0 %v6789_v8, %s7117_s1  ;;  %v5074_v8 = vld [vmem:[%s7054_s13 + $0x50] sm:$0xff]  ;;  %s7120_s13 = sld [smem:[#allocation16_spill]] }
0x1f58   :  { %v4135_v10 = vpop.xlane.xlu0 %4134 }
0x1f59   :  { %5904 = vrcp.f32 %v4135_v10  ;;  %v5101_v10 = vld [vmem:[%s7058_s16 + $0x1] ss:$0 sm:$0xff] }
0x1f5c   :  { %v4132_v11 = vpop.xlane.xlu0 %4131 }
0x1f5d   :  { %5906 = vrcp.f32 %v4132_v11 }
0x1f60   :  { %v4217_v13 = vpop.permute.xlu0 %4216 }
0x1f61   :  { %5712 = vmatpush3.msra.mxu1 %v4217_v13 }
0x1f62   :  { %5727 = vmatprep.subr.mxu1 %v5075_v12 }
0x1f66   :  { %v5905_v18 = vpop.eup %5904 }
0x1f67   :  { %v4139_v17 = vmul.f32 %v5905_v18, %v5901_v5  ;;  %v5100_v5 = vld [vmem:[%s7057_s15 + $0x1] ss:$0 sm:$0xff]  ;;  %v5129_v18 = vld [vmem:[%s7059_s19 + $0xf8] sm:$0xff] }
0x1f69   :  { %5714 = vmatmul.mubr.msk.f32.vlgmr.msra.gmra.mxu1 %vm370_vm4, %v4139_v17  ;;  %v5128_v17 = vld [vmem:[%s7059_s19 + $0xf0] sm:$0xff] }
0x1f6a   :  { %v5907_v14 = vpop.eup %5906  ;;  %5728 = vmatpush3.msra.mxu1 %v5075_v12  ;;  %5735 = vmatprep.mubr.msk.f32.mxu1 %vm214_vm2, %v3880_v48 }
0x1f6b   :  { %5729 = vmatprep.subr.mxu1 %v5074_v8  ;;  %v4138_v16 = vmul.f32 %v5907_v14, %v5903_v58  ;;  %v5126_v14 = vld [vmem:[%s7059_s19 + $0xe0] sm:$0xff] }
0x1f6c   :  { %5730 = vmatpush3.msra.mxu1 %v5074_v8  ;;  %v5127_v8 = vld [vmem:[%s7059_s19 + $0xe8] sm:$0xff] }
0x1f6d   :  { %5731 = vmatprep.subr.mxu1 %v5073_v15  ;;  %5709 = vmatmul.mubr.msk.f32.vlgmr.msra.gmra.mxu0 %vm370_vm4, %v4138_v16  ;;  %v5124_v16 = vld [vmem:[%s7059_s19 + $0xd0] sm:$0xff] }
0x1f6e   :  { %5732 = vmatpush3.msra.mxu1 %v5073_v15  ;;  %5717 = vmatpush3.msra.mxu0 %v5079_v7  ;;  %v5125_v15 = vld [vmem:[%s7059_s19 + $0xd8] sm:$0xff] }
0x1f6f   :  { %5733 = vmatprep.subr.mxu1 %v5072_v19  ;;  %5718 = vmatprep.subr.mxu0 %v5078_v22 }
0x1f70   :  { %5734 = vmatpush3.msra.mxu1 %v5072_v19  ;;  %5719 = vmatpush3.msra.mxu0 %v5078_v22  ;;  %v5123_v19 = vld [vmem:[%s7059_s19 + $0xc8] sm:$0xff]  ;;  %v5122_v22 = vld [vmem:[%s7059_s19 + $0xc0] sm:$0xff] }
0x1f71   :  { %5736 = vmatmul.mubr.msk.f32.vlgmr.msra.gmra.mxu1 %vm214_vm2, %v3956_v47  ;;  %5720 = vmatprep.subr.mxu0 %v5077_v23 }
0x1f72   :  { %5721 = vmatpush3.msra.mxu0 %v5077_v23  ;;  %5757 = vmatprep.subr.mxu1 %v5129_v18  ;;  %v5121_v23 = vld [vmem:[%s7059_s19 + $0xb8] sm:$0xff] }
0x1f73   :  { %5722 = vmatprep.subr.mxu0 %v5076_v24  ;;  %5758 = vmatpush3.msra.mxu1 %v5129_v18 }
0x1f74   :  { %5723 = vmatpush3.msra.mxu0 %v5076_v24  ;;  %5759 = vmatprep.subr.mxu1 %v5128_v17  ;;  %v5120_v24 = vld [vmem:[%s7059_s19 + $0xb0] sm:$0xff] }
0x1f75   :  { %5760 = vmatpush3.msra.mxu1 %v5128_v17 }
0x1f76   :  { %5761 = vmatprep.subr.mxu1 %v5127_v8 }
0x1f77   :  { %5762 = vmatpush3.msra.mxu1 %v5127_v8 }
0x1f78   :  { %5763 = vmatprep.subr.mxu1 %v5126_v14 }
0x1f79   :  { %5764 = vmatpush3.msra.mxu1 %v5126_v14  ;;  %v4774_v14 = vmul.u32 8, %v6124_v20 }
0x1f7a   :  { %5765 = vmatprep.subr.mxu1 %v5125_v15 }
0x1f7b   :  { %5766 = vmatpush3.msra.mxu1 %v5125_v15  ;;  %v4775_v15 = vstv %s7121_s14 }
0x1f7c   :  { %5767 = vmatprep.subr.mxu1 %v5124_v16 }
0x1f7d   :  { %5768 = vmatpush3.msra.mxu1 %v5124_v16 }
0x1f7e   :  { %5769 = vmatprep.subr.mxu1 %v5123_v19 }
0x1f7f   :  { %5770 = vmatpush3.msra.mxu1 %v5123_v19  ;;  %v5134_v19 = vld [vmem:[%s7062_s21 + $0x1] ss:$0 sm:$0xff] }
0x1f80   :  { %5771 = vmatprep.subr.mxu1 %v5122_v22 }
0x1f81   :  { %5772 = vmatpush3.msra.mxu1 %v5122_v22  ;;  %v4776_v22 = vadd.s32 %v4775_v15, %v4774_v14 }
0x1f82   :  { %5773 = vmatprep.subr.mxu1 %v5121_v23 }
0x1f83   :  { %5774 = vmatpush3.msra.mxu1 %v5121_v23  ;;  %vm4777_vm5 = vcmp.eq.s32.totalorder %v6158_v34, %v4776_v22  ;;  %v4860_v34 = vld [vmem:[%s7122_s5 + $0x30] sm:$0xff] }
0x1f84   :  { %5775 = vmatprep.subr.mxu1 %v5120_v24 }
0x1f85   :  { %5776 = vmatpush3.msra.mxu1 %v5120_v24 }
0x2029   :  { %v4288_v25 = vpop.f32.mrf.mxu1 }
0x202b   :  { %v5715_v26 = vpop.f32.mrf.mxu1 }
0x202c   :  { %v5118_v26 = vld [vmem:[%s7059_s19 + $0xa0] sm:$0xff] }
0x202d   :  { %v4212_v27 = vpop.f32.mrf.mxu0 }
0x202e   :  { %5724 = vmatprep.mubr.msk.f32.mxu0 %vm214_vm2, %v4212_v27  ;;  %v5117_v27 = vld [vmem:[%s7059_s19 + $0x98] sm:$0xff] }
0x202f   :  { %v5710_v28 = vpop.f32.mrf.mxu0  ;;  %5725 = vmatmul.mubr.msk.f32.vlgmr.msra.gmra.mxu0 %vm214_vm2, %v4288_v25  ;;  %v5119_v25 = vld [vmem:[%s7059_s19 + $0xa8] sm:$0xff] }
0x2030   :  { %5777 = vmatprep.subr.mxu1 %v5119_v25  ;;  %v5116_v28 = vld [vmem:[%s7059_s19 + $0x90] sm:$0xff] }
0x2031   :  { %v5737_v30 = vpop.f32.mrf.mxu1  ;;  %5778 = vmatpush3.msra.mxu1 %v5119_v25  ;;  %v5135_v25 = vld [vmem:[%s7063_s22 + $0x1] ss:$0 sm:$0xff] }
0x2032   :  { %5779 = vmatprep.subr.mxu1 %v5118_v26 }
0x2033   :  { %v4445_v32 = vpop.f32.mrf.mxu1  ;;  %5780 = vmatpush3.msra.mxu1 %v5118_v26 }
0x2034   :  { %5781 = vmatprep.subr.mxu1 %v5117_v27 }
0x2035   :  { %5782 = vmatpush3.msra.mxu1 %v5117_v27 }
0x2036   :  { %5783 = vmatprep.subr.mxu1 %v5116_v28 }
0x2037   :  { %5784 = vmatpush3.msra.mxu1 %v5116_v28 }
0x20ef   :  { %v5726_v44 = vpop.f32.mrf.mxu0 }
0x20f0   :  { %v4451_v42 = vadd.f32 %v5737_v30, %v5726_v44  ;;  %v5115_v30 = vld [vmem:[%s7059_s19 + $0x88] sm:$0xff]  ;;  %v5111_v44 = vld [vmem:[%s7119_s26 + $0x1] ss:$0 sm:$0xff] }
0x20f1   :  { %v4364_v35 = vpop.f32.mrf.mxu0  ;;  %5785 = vmatprep.subr.mxu1 %v5115_v30 }
0x20f2   :  { %v4461_v36 = vadd.f32 %v5097_v31, %v4451_v42  ;;  %v4446_v38 = vadd.f32 %v4445_v32, %v4364_v35  ;;  %5786 = vmatpush3.msra.mxu1 %v5115_v30 }
0x20f4   :  { %v4460_v39 = vadd.f32 %v5097_v31, %v4446_v38  ;;  %v4463_v40 = vadd.f32 %v4461_v36, %v6778_v4  ;;  %v5114_v31 = vld [vmem:[%s7059_s19 + $0x80] sm:$0xff] }
0x20f5   :  { %5787 = vmatprep.subr.mxu1 %v5114_v31 }
0x20f6   :  { %v4471_v41 = vsel %vm118_vm0, %v4463_v40, 0.0  ;;  %v4462_v33 = vadd.f32 %v4460_v39, %v6776_v2  ;;  %v5109_v2 = vld [vmem:[%s7056_s17 + $0x78] sm:$0xff]  ;;  %5788 = vmatpush3.msra.mxu1 %v5114_v31  ;;  %v5136_v31 = vsel %vm4777_vm5, 1.0, %v5922_v3 }
0x20f7   :  { %4472 = vadd.xlane.f32.xlu0 %v4471_v41  ;;  %5738 = vmatprep.subr.mxu0 %v5109_v2 }
0x20f8   :  { %v4468_v43 = vsel %vm118_vm0, %v4462_v33, 0.0  ;;  %5739 = vmatpush3.msra.mxu0 %v5109_v2 }
0x20f9   :  { %4469 = vadd.xlane.f32.xlu1 %v4468_v43  ;;  %5740 = vmatprep.subr.mxu0 %v5108_v51 }
0x20fa   :  { %5741 = vmatpush3.msra.mxu0 %v5108_v51 }
0x20fb   :  { %5742 = vmatprep.subr.mxu0 %v5107_v52 }
0x20fc   :  { %5743 = vmatpush3.msra.mxu0 %v5107_v52  ;;  %v5131_v52 = vld [vmem:[%s7120_s13 + $0x1] ss:$0 sm:$0xff] }
0x20fd   :  { %5744 = vmatprep.subr.mxu0 %v5106_v21 }
0x20fe   :  { %5745 = vmatpush3.msra.mxu0 %v5106_v21 }
0x20ff   :  { %5746 = vmatprep.subr.mxu0 %v5105_v54 }
0x2100   :  { %5747 = vmatpush3.msra.mxu0 %v5105_v54 }
0x2101   :  { %5748 = vmatprep.subr.mxu0 %v5104_v56 }
0x2102   :  { %5749 = vmatpush3.msra.mxu0 %v5104_v56 }
0x2103   :  { %5750 = vmatprep.subr.mxu0 %v5103_v57 }
0x2104   :  { %5751 = vmatpush3.msra.mxu0 %v5103_v57 }
0x2105   :  { %5752 = vmatprep.subr.mxu0 %v5102_v59 }
0x2106   :  { %5753 = vmatpush3.msra.mxu0 %v5102_v59 }
0x2107   :  { %5792 = vmatprep.subr.mxu0 %v5922_v3 }
0x2180   :  { %v4473_v45 = vpop.xlane.xlu0 %4472 }
0x2181   :  { %v4475_v55 = vmul.f32 0.015625, %v4473_v45 }
0x2182   :  { %v4470_v53 = vpop.xlane.xlu1 %4469 }
0x2183   :  { %v4477_v46 = vsub.f32 %v4463_v40, %v4475_v55  ;;  %v4474_v47 = vmul.f32 0.015625, %v4470_v53 }
0x2185   :  { %v4476_v48 = vsub.f32 %v4462_v33, %v4474_v47  ;;  %v4479_v49 = vmul.f32 %v4477_v46, %v4477_v46 }
0x2187   :  { %v4483_v50 = vsel %vm118_vm0, %v4479_v49, 0.0  ;;  %v4478_v37 = vmul.f32 %v4476_v48, %v4476_v48 }
0x2188   :  { %4484 = vadd.xlane.f32.xlu0 %v4483_v50 }
0x2189   :  { %v4480_v4 = vsel %vm118_vm0, %v4478_v37, 0.0 }
0x218a   :  { %4481 = vadd.xlane.f32.xlu1 %v4480_v4 }
0x2211   :  { %v4485_v61 = vpop.xlane.xlu0 %4484 }
0x2212   :  { %v4487_v29 = vmul.f32 0.015625, %v4485_v61 }
0x2213   :  { %v4482_v62 = vpop.xlane.xlu1 %4481 }
0x2214   :  { %v4489_v63 = vadd.f32 1e-05, %v4487_v29  ;;  %v4486_v0 = vmul.f32 0.015625, %v4482_v62 }
0x2216   :  { %5908 = vrsqrt.f32 %v4489_v63  ;;  %v4488_v60 = vadd.f32 1e-05, %v4486_v0 }
0x2218   :  { %5910 = vrsqrt.f32 %v4488_v60 }
0x2223   :  { %v5909_v1 = vpop.eup %5908 }
0x2224   :  { %v4493_v6 = vmul.f32 %v5909_v1, %v4477_v46 }
0x2225   :  { %v5911_v58 = vpop.eup %5910 }
0x2226   :  { %v4492_v9 = vmul.f32 %v5911_v58, %v4476_v48  ;;  %v4501_v7 = vmul.f32 %v5100_v5, %v4493_v6 }
0x2228   :  { %v4500_v11 = vmul.f32 %v5100_v5, %v4492_v9  ;;  %v6920_v13 = vadd.f32 %v5101_v10, %v4501_v7 }
0x222a   :  { %v6918_v12 = vadd.f32 %v5101_v10, %v4500_v11 }
0x222c   :  { %5754 = vmatprep.mubr.msk.f32.mxu0 %vm118_vm0, %v6918_v12 }
0x222d   :  { %5755 = vmatmul.mubr.msk.f32.vlgmr.msra.gmra.mxu0 %vm118_vm0, %v6920_v13 }
0x222e   :  { %5796 = vmatprep.mubr.msk.f32.mxu0 %vm5923_vm1, %v5922_v3 }
0x22ed   :  { %v5756_v42 = vpop.f32.mrf.mxu0 }
0x22ee   :  { %v4605_v32 = vadd.f32 %v5756_v42, %v5111_v44  ;;  %v4859_v42 = vld [vmem:[%s7122_s5 + $0x28] sm:$0xff] }
0x22ef   :  { %v4599_v35 = vpop.f32.mrf.mxu0 }
0x22f0   :  { %v4609_v36 = vmul.f32 %v4605_v32, %v4605_v32  ;;  %v4600_v38 = vadd.f32 %v5111_v44, %v4599_v35  ;;  %v4861_v44 = vld [vmem:[%s7122_s5 + $0x38] sm:$0xff] }
0x22f1   :  { %v4857_v35 = vld [vmem:[%s7122_s5 + $0x18] sm:$0xff] }
0x22f2   :  { %v4611_v39 = vmul.f32 %v4609_v36, %v4605_v32  ;;  %v4608_v40 = vmul.f32 %v4600_v38, %v4600_v38  ;;  %v4856_v36 = vld [vmem:[%s7122_s5 + $0x10] sm:$0xff] }
0x22f4   :  { %v4613_v41 = vmul.f32 0.044715, %v4611_v39  ;;  %v4610_v33 = vmul.f32 %v4608_v40, %v4600_v38  ;;  %v4854_v39 = vld [vmem:[%s7122_s5] sm:$0xff] }
0x22f6   :  { %v4615_v43 = vadd.f32 %v4613_v41, %v4605_v32  ;;  %v4612_v45 = vmul.f32 0.044715, %v4610_v33  ;;  %v5138_v33 = vld [vmem:[%s7123_s29] ss:$0 sm:$0xff] }
0x22f8   :  { %v4617_v55 = vmul.f32 0.7978846, %v4615_v43  ;;  %v4614_v53 = vadd.f32 %v4612_v45, %v4600_v38 }
0x22fa   :  { %5912 = vtanh.f32 %v4617_v55  ;;  %v4616_v46 = vmul.f32 0.7978846, %v4614_v53 }
0x22fc   :  { %5914 = vtanh.f32 %v4616_v46 }
0x2307   :  { %v5913_v47 = vpop.eup %5912 }
0x2308   :  { %v4621_v48 = vadd.f32 1.0, %v5913_v47 }
0x2309   :  { %v5915_v49 = vpop.eup %5914 }
0x230a   :  { %v4620_v50 = vadd.f32 1.0, %v5915_v49  ;;  %v4623_v37 = vmul.f32 0.5, %v4621_v48 }
0x230c   :  { %v4622_v4 = vmul.f32 0.5, %v4620_v50  ;;  %v4625_v51 = vmul.f32 %v4623_v37, %v4605_v32  ;;  %v4858_v32 = vld [vmem:[%s7122_s5 + $0x20] sm:$0xff] }
0x230e   :  { %v4624_v2 = vmul.f32 %v4622_v4, %v4600_v38  ;;  %v4855_v38 = vld [vmem:[%s7122_s5 + $0x8] sm:$0xff] }
0x2310   :  { %5789 = vmatprep.mubr.f32.mxu1 %v4624_v2 }
0x2311   :  { %5790 = vmatmul.mubr.f32.vlgmr.msra.gmra.mxu1 %v4625_v51 }
0x23d1   :  { %v5791_v21 = vpop.f32.mrf.mxu1 }
0x23d2   :  { %v4723_v54 = vadd.f32 %v5791_v21, %v5131_v52 }
0x23d3   :  { %v4717_v56 = vpop.f32.mrf.mxu1 }
0x23d4   :  { %v4718_v57 = vadd.f32 %v5131_v52, %v4717_v56  ;;  %v4727_v59 = vadd.f32 %v4723_v54, %v6920_v13 }
0x23d6   :  { %v4735_v61 = vsel %vm118_vm0, %v4727_v59, 0.0  ;;  %v4726_v29 = vadd.f32 %v4718_v57, %v6918_v12 }
0x23d7   :  { %4736 = vadd.xlane.f32.xlu1 %v4735_v61 }
0x23d8   :  { %v4732_v62 = vsel %vm118_vm0, %v4726_v29, 0.0 }
0x23d9   :  { %4733 = vadd.xlane.f32.xlu0 %v4732_v62 }
0x2460   :  { %v4737_v63 = vpop.xlane.xlu1 %4736 }
0x2461   :  { %v4739_v0 = vmul.f32 0.015625, %v4737_v63 }
0x2462   :  { %v4734_v60 = vpop.xlane.xlu0 %4733 }
0x2463   :  { %v4741_v1 = vsub.f32 %v4727_v59, %v4739_v0  ;;  %v4738_v5 = vmul.f32 0.015625, %v4734_v60 }
0x2465   :  { %v4740_v6 = vsub.f32 %v4726_v29, %v4738_v5  ;;  %v4743_v58 = vmul.f32 %v4741_v1, %v4741_v1 }
0x2467   :  { %v4747_v9 = vsel %vm118_vm0, %v4743_v58, 0.0  ;;  %v4742_v7 = vmul.f32 %v4740_v6, %v4740_v6 }
0x2468   :  { %4748 = vadd.xlane.f32.xlu1 %v4747_v9 }
0x2469   :  { %v4744_v10 = vsel %vm118_vm0, %v4742_v7, 0.0 }
0x246a   :  { %4745 = vadd.xlane.f32.xlu0 %v4744_v10 }
0x24f1   :  { %v4749_v11 = vpop.xlane.xlu1 %4748 }
0x24f2   :  { %v4751_v12 = vmul.f32 0.015625, %v4749_v11 }
0x24f3   :  { %v4746_v13 = vpop.xlane.xlu0 %4745 }
0x24f4   :  { %v4753_v18 = vadd.f32 1e-05, %v4751_v12  ;;  %v4750_v17 = vmul.f32 0.015625, %v4746_v13 }
0x24f6   :  { %5916 = vrsqrt.f32 %v4753_v18  ;;  %v4752_v8 = vadd.f32 1e-05, %v4750_v17 }
0x24f8   :  { %5918 = vrsqrt.f32 %v4752_v8 }
0x2503   :  { %v5917_v16 = vpop.eup %5916 }
0x2504   :  { %v4757_v23 = vmul.f32 %v5917_v16, %v4741_v1 }
0x2505   :  { %v5919_v24 = vpop.eup %5918 }
0x2506   :  { %v4765_v26 = vmul.f32 %v5134_v19, %v4757_v23  ;;  %v4756_v27 = vmul.f32 %v5919_v24, %v4740_v6 }
0x2508   :  { %v4773_v20 = vadd.f32 %v5135_v25, %v4765_v26  ;;  %v4764_v28 = vmul.f32 %v5134_v19, %v4756_v27 }
0x250a   :  { %5793 = vmatpush3.msra.mxu0 %v4773_v20  ;;  %v4772_v30 = vadd.f32 %v5135_v25, %v4764_v28 }
0x250b   :  { %5794 = vmatprep.subr.mxu0 %v5922_v3 }
0x250c   :  { %5795 = vmatpush3.msra.mxu0 %v4772_v30 }
0x250d   :  { %5797 = vmatmul.mubr.msk.f32.vlgmr.msra.gmra.mxu0 %vm4780_vm6, %v5136_v31  ;;  %5799 = vmatprep.subr.mxu0 %v5922_v3 }
0x250e   :  { %5800 = vmatpush3.msra.mxu0 %v4861_v44  ;;  %5815 = vmatprep.mubr.msk.f32.mxu0 %vm5923_vm1, %v5922_v3 }
0x250f   :  { %5801 = vmatprep.subr.mxu0 %v5922_v3 }
0x2510   :  { %5802 = vmatpush3.msra.mxu0 %v4860_v34 }
0x2511   :  { %5803 = vmatprep.subr.mxu0 %v5922_v3 }
0x2512   :  { %5804 = vmatpush3.msra.mxu0 %v4859_v42 }
0x2513   :  { %5805 = vmatprep.subr.mxu0 %v5922_v3 }
0x2514   :  { %5806 = vmatpush3.msra.mxu0 %v4858_v32 }
0x2515   :  { %5807 = vmatprep.subr.mxu0 %v5922_v3 }
0x2516   :  { %5808 = vmatpush3.msra.mxu0 %v4857_v35 }
0x2517   :  { %5809 = vmatprep.subr.mxu0 %v5922_v3 }
0x2518   :  { %5810 = vmatpush3.msra.mxu0 %v4856_v36 }
0x2519   :  { %5811 = vmatprep.subr.mxu0 %v5922_v3 }
0x251a   :  { %5812 = vmatpush3.msra.mxu0 %v4855_v38 }
0x251b   :  { %5813 = vmatprep.subr.mxu0 %v5922_v3 }
0x251c   :  { %5814 = vmatpush3.msra.mxu0 %v4854_v39 }
0x25cd   :  { %v4850_v40 = vpop.f32.mrf.mxu0 }
0x25ce   :  { %5816 = vmatmul.mubr.msk.f32.vlgmr.msra.gmra.mxu0 %vm118_vm0, %v4850_v40 }
0x25cf   :  { %v5798_v41 = vpop.f32.mrf.mxu0 }
0x268e   :  { %v4938_v43 = vpop.f32.mrf.mxu0 }
0x268f   :  { %v4939_v45 = vadd.f32 %v5138_v33, %v4938_v43 }
0x2690   :  { %v5817_v55 = vpop.f32.mrf.mxu0 }
0x2691   :  { %4942 = vst [vmem:[%s7124_s6] sm:$0x3] %v4939_v45 }

</bundles_post_ra>
